<compile_context>
chip_gen: v7x
topology: tpu7x:2x2x1
jax: 0.10.0
libtpu: 0.0.40
codegen_flags: <defaults>
</compile_context>

<pallas_src>
import functools

import numpy as np

import jax
import jax.numpy as jnp
from jax import lax
from jax.experimental import pallas as pl
from jax.experimental.pallas import tpu as pltpu


def _ru(x, m):
    return (x + m - 1) // m * m


# ----------------------------------------------------------------------------
# In-kernel building blocks (everything here runs inside the Pallas kernel)
# ----------------------------------------------------------------------------
def _leaky_relu(a):
    # nn.LeakyReLU() default negative_slope = 0.01
    return jnp.where(a > 0, a, 0.01 * a)


def _batchnorm(a, g, be, *, count, lane_valid, eps=1e-5):
    """Training-mode BatchNorm over the valid lanes of a (C_pad, L) activation."""
    L = a.shape[-1]
    if lane_valid < L:
        lm = (lax.broadcasted_iota(jnp.int32, (1, L), 1) < lane_valid)
        lm = lm.astype(jnp.float32)
        mean = jnp.sum(a * lm, axis=-1, keepdims=True) / count
        d = (a - mean) * lm
    else:
        mean = jnp.sum(a, axis=-1, keepdims=True) / count
        d = a - mean
    var = jnp.sum(d * d, axis=-1, keepdims=True) / count      # biased variance
    return (a - mean) * lax.rsqrt(var + eps) * g + be


def _conv_taps(x, w_ref, m_ref, *, k, wdim):
    """Stride-1 'same' conv of a channel-major activation.

    x:     (Cin_p, L) f32, lane l = b*H*W + h*W + w (zero lane padding beyond).
    w_ref: (k*k, Cout_p, Cin_p) bf16, tap-major  (w[t, co, ci]).
    m_ref: (k*k, L) f32 0/1 per-tap border / lane-validity masks.
    Returns (Cout_p, L) f32.
    """
    _, L = x.shape
    cout_p = w_ref.shape[1]
    p = k // 2
    # Doubled buffer: a circular lane shift becomes one static slice.
    x2 = jnp.concatenate([x, x], axis=-1).astype(jnp.bfloat16)
    acc = jnp.zeros((cout_p, L), jnp.float32)
    idx = 0
    for ki in range(k):
        for kj in range(k):
            off = (ki - p) * wdim + (kj - p)
            s = off % L
            xs = x2[:, s:s + L]                # xs[:, l] = x[:, (l + off) % L]
            contrib = jnp.dot(w_ref[idx], xs,
                              preferred_element_type=jnp.float32)
            # mask commutes with the channel contraction; zero out-of-range taps
            acc = acc + contrib * m_ref[pl.ds(idx, 1), :]
            idx += 1
    return acc


def _encoder_kernel(x_ref,
                    w1_ref, b1_ref, m1_ref, sub1_ref,
                    w2_ref, b2_ref, g2_ref, be2_ref, m2_ref,
                    w3_ref, b3_ref, g3_ref, be3_ref, m3_ref, sub3_ref,
                    w4_ref, b4_ref, m4_ref,
                    o_ref, *, cfg):
    (k1, wd1), (k2, wd2), (k3, wd3), (k4, wd4) = cfg["taps"]
    n2, v2 = cfg["bn2"]
    n3, v3 = cfg["bn3"]

    x = x_ref[...]                                              # (Cp0, L0p) f32

    # ---- layer 1: Conv(3, ch, 5, s=2) + LeakyReLU ---------------------------
    a = _conv_taps(x, w1_ref, m1_ref, k=k1, wdim=wd1)           # (Cp1, L0p)
    a = jnp.dot(a.astype(jnp.bfloat16), sub1_ref[...],
                preferred_element_type=jnp.float32)             # stride-2 pick
    a = _leaky_relu(a + b1_ref[...])

    # ---- layer 2: Conv(ch, ch, 5, s=1) + LeakyReLU + BatchNorm --------------
    a = _conv_taps(a, w2_ref, m2_ref, k=k2, wdim=wd2)
    a = _leaky_relu(a + b2_ref[...])
    a = _batchnorm(a, g2_ref[...], be2_ref[...], count=n2, lane_valid=v2)

    # ---- layer 3: Conv(ch, 2ch, 3, s=2) + LeakyReLU + BatchNorm -------------
    a = _conv_taps(a, w3_ref, m3_ref, k=k3, wdim=wd3)
    a = jnp.dot(a.astype(jnp.bfloat16), sub3_ref[...],
                preferred_element_type=jnp.float32)             # stride-2 pick
    a = _leaky_relu(a + b3_ref[...])
    a = _batchnorm(a, g3_ref[...], be3_ref[...], count=n3, lane_valid=v3)

    # ---- layer 4: Conv(2ch, csize, 3, s=1) ----------------------------------
    a = _conv_taps(a, w4_ref, m4_ref, k=k4, wdim=wd4)
    a = a + b4_ref[...]

    o_ref[...] = a.astype(o_ref.dtype)


# ----------------------------------------------------------------------------
# Host-side constant construction (trace-time, hoisted by jit)
# ----------------------------------------------------------------------------
def _conv_out(h, k, s):
    p = k // 2
    return (h + 2 * p - k) // s + 1


def _tap_masks(B, H, W, k, l_pad):
    """(k*k, l_pad) f32 0/1 masks: tap (ki,kj) is in-range at lane l=(b,h,w)."""
    p = k // 2
    L = B * H * W
    l = np.arange(l_pad)
    valid = l < L
    h = (l % (H * W)) // W
    w = l % W
    rows = []
    for ki in range(k):
        for kj in range(k):
            di, dj = ki - p, kj - p
            m = valid & (h + di >= 0) & (h + di < H) & (w + dj >= 0) & (w + dj < W)
            rows.append(m)
    return jnp.asarray(np.stack(rows).astype(np.float32))


def _subsample_matrix(B, H, W, Ho, Wo, stride, l_in_pad, l_out_pad):
    """(l_in_pad, l_out_pad) bf16 0/1 selection picking lanes (b, s*ho, s*wo)."""
    S = np.zeros((l_in_pad, l_out_pad), np.float32)
    for b in range(B):
        for ho in range(Ho):
            for wo in range(Wo):
                li = b * H * W + (stride * ho) * W + (stride * wo)
                lo = b * Ho * Wo + ho * Wo + wo
                S[li, lo] = 1.0
    return jnp.asarray(S).astype(jnp.bfloat16)


def _pack_conv_weight(w_hwio, cin_p, cout_p):
    """HWIO (k,k,cin,cout) f32 -> (k*k, cout_p, cin_p) bf16 (tap-major)."""
    k = w_hwio.shape[0]
    cin, cout = w_hwio.shape[2], w_hwio.shape[3]
    wt = jnp.transpose(w_hwio, (0, 1, 3, 2)).reshape(k * k, cout, cin)
    wt = jnp.pad(wt, ((0, 0), (0, cout_p - cout), (0, cin_p - cin)))
    return wt.astype(jnp.bfloat16)


def _pack_col(v, c_p):
    return jnp.pad(v, (0, c_p - v.shape[0])).reshape(c_p, 1).astype(jnp.float32)


# ----------------------------------------------------------------------------
# Model: Conv(3,ch,5,s2) LReLU | Conv(ch,ch,5,s1) LReLU BN | Conv(ch,2ch,3,s2)
#        LReLU BN | Conv(2ch,csize,3,s1)
# ----------------------------------------------------------------------------
class EncoderNetworkLightPallas:
    def __init__(self, key, ch=8, csize=16):
        self.ch, self.csize = ch, csize
        ks = jax.random.split(key, 8)

        def conv_params(kw, kb, k, cin, cout):
            w = 0.1 * jax.random.normal(kw, (k, k, cin, cout), jnp.float32)  # HWIO
            b = 0.1 * jax.random.normal(kb, (cout,), jnp.float32)
            return w, b

        self.w1, self.b1 = conv_params(ks[0], ks[1], 5, 3, ch)
        self.w2, self.b2 = conv_params(ks[2], ks[3], 5, ch, ch)
        self.w3, self.b3 = conv_params(ks[4], ks[5], 3, ch, 2 * ch)
        self.w4, self.b4 = conv_params(ks[6], ks[7], 3, 2 * ch, csize)
        # BatchNorm2d default affine init: gamma = 1, beta = 0
        self.g2 = jnp.ones((ch,), jnp.float32)
        self.be2 = jnp.zeros((ch,), jnp.float32)
        self.g3 = jnp.ones((2 * ch,), jnp.float32)
        self.be3 = jnp.zeros((2 * ch,), jnp.float32)

        # Pack / pad weights once (hoisted out of the forward pass), bf16 for MXU.
        cp0, cp1 = _ru(3, 16), _ru(ch, 16)
        cp3, cp4 = _ru(2 * ch, 16), _ru(csize, 16)
        self.params = dict(
            w1=_pack_conv_weight(self.w1, cp0, cp1), b1=_pack_col(self.b1, cp1),
            w2=_pack_conv_weight(self.w2, cp1, cp1), b2=_pack_col(self.b2, cp1),
            g2=_pack_col(self.g2, cp1), be2=_pack_col(self.be2, cp1),
            w3=_pack_conv_weight(self.w3, cp1, cp3), b3=_pack_col(self.b3, cp3),
            g3=_pack_col(self.g3, cp3), be3=_pack_col(self.be3, cp3),
            w4=_pack_conv_weight(self.w4, cp3, cp4), b4=_pack_col(self.b4, cp4),
        )
        self._fwd = jax.jit(self._forward)

    def _forward(self, params, x):
        B, Cin, H, W = x.shape                                   # static under jit
        # layer geometry (padding = k // 2 for every conv)
        H1, W1 = _conv_out(H, 5, 2), _conv_out(W, 5, 2)
        H2, W2 = _conv_out(H1, 5, 1), _conv_out(W1, 5, 1)
        H3, W3 = _conv_out(H2, 3, 2), _conv_out(W2, 3, 2)
        H4, W4 = _conv_out(H3, 3, 1), _conv_out(W3, 3, 1)
        L0, L1, L3 = B * H * W, B * H1 * W1, B * H3 * W3
        L0p, L1p, L3p = _ru(L0, 128), _ru(L1, 128), _ru(L3, 128)
        cp0 = params["w1"].shape[2]
        cp4 = params["w4"].shape[1]

        # Shape-dependent constants, built at trace time (cached by jit).
        m1 = _tap_masks(B, H, W, 5, L0p)
        m2 = _tap_masks(B, H1, W1, 5, L1p)
        m3 = _tap_masks(B, H2, W2, 3, L1p)
        m4 = _tap_masks(B, H3, W3, 3, L3p)
        sub1 = _subsample_matrix(B, H, W, H1, W1, 2, L0p, L1p)
        sub3 = _subsample_matrix(B, H2, W2, H3, W3, 2, L1p, L3p)

        # NCHW -> channel-major (C_pad, B*H*W padded to a lane multiple)
        x2d = jnp.transpose(x, (1, 0, 2, 3)).reshape(Cin, L0).astype(jnp.float32)
        x2d = jnp.pad(x2d, ((0, cp0 - Cin), (0, L0p - L0)))

        cfg = dict(taps=((5, W), (5, W1), (3, W2), (3, W3)),
                   bn2=(L1, L1), bn3=(L3, L3))

        inputs = (x2d,
                  params["w1"], params["b1"], m1, sub1,
                  params["w2"], params["b2"], params["g2"], params["be2"], m2,
                  params["w3"], params["b3"], params["g3"], params["be3"], m3, sub3,
                  params["w4"], params["b4"], m4)

        def full_spec(a):
            shape = tuple(a.shape)
            return pl.BlockSpec(shape, lambda i, _z=(0,) * len(shape): _z)

        out2d = pl.pallas_call(
            functools.partial(_encoder_kernel, cfg=cfg),
            out_shape=jax.ShapeDtypeStruct((cp4, L3p), jnp.float32),
            grid=(1,),
            in_specs=[full_spec(a) for a in inputs],
            out_specs=pl.BlockSpec((cp4, L3p), lambda i: (0, 0)),
            compiler_params=pltpu.CompilerParams(
                dimension_semantics=("arbitrary",)),
        )(*inputs)

        out = out2d[: self.csize, :L3].reshape(self.csize, B, H4, W4)
        return jnp.transpose(out, (1, 0, 2, 3))                  # -> NCHW

    def __call__(self, x_nchw):
        return self._fwd(self.params, x_nchw)


# ----------------------------------------------------------------------------
# Pure-JAX f32 reference of the module's forward pass (for a numerical check)
# ----------------------------------------------------------------------------
def _reference_forward(model, x):
    def conv(a, w_hwio, b, stride):
        k = w_hwio.shape[0]
        p = k // 2
        y = lax.conv_general_dilated(
            a, w_hwio, window_strides=(stride, stride),
            padding=[(p, p), (p, p)],
            dimension_numbers=("NCHW", "HWIO", "NCHW"),
            precision=lax.Precision.HIGHEST)
        return y + b.reshape(1, -1, 1, 1)

    def leaky(a):
        return jnp.where(a > 0, a, 0.01 * a)

    def bn(a, g, be, eps=1e-5):
        mean = jnp.mean(a, axis=(0, 2, 3), keepdims=True)
        var = jnp.mean((a - mean) ** 2, axis=(0, 2, 3), keepdims=True)
        return ((a - mean) * lax.rsqrt(var + eps) * g.reshape(1, -1, 1, 1)
                + be.reshape(1, -1, 1, 1))

    a = leaky(conv(x, model.w1, model.b1, 2))
    a = bn(leaky(conv(a, model.w2, model.b2, 1)), model.g2, model.be2)
    a = bn(leaky(conv(a, model.w3, model.b3, 2)), model.g3, model.be3)
    return conv(a, model.w4, model.b4, 1)


if __name__ == "__main__":
    key = jax.random.PRNGKey(0)
    k_x, k_p = jax.random.split(key)
    # Small shapes consistent with the module: B=2, Cin=3, H=W=16, ch=8, csize=16
    x = jax.random.normal(k_x, (2, 3, 16, 16), jnp.float32)

    model = EncoderNetworkLightPallas(k_p, ch=8, csize=16)
    out = jax.block_until_ready(model(x))

    # 16 -(5,s2)-> 8 -(5,s1)-> 8 -(3,s2)-> 4 -(3,s1)-> 4 ; channels -> csize
    assert out.shape == (2, 16, 4, 4), out.shape
    assert bool(jnp.all(jnp.isfinite(out)))

    # Numerical check against a pure-JAX f32 reference (kernel uses bf16 MXU
    # operands with f32 accumulation -> loose tolerance).
    ref = jax.block_until_ready(_reference_forward(model, x))
    max_err = float(jnp.max(jnp.abs(out - ref)))
    assert max_err < 0.2, max_err

    print("KERNEL_OK")
</pallas_src>

<mosaic_0001>
module attributes {stable_mosaic.version = 11 : i64} {
  func.func @_encoder_kernel(%arg0: i32, %arg1: memref<16x512xf32, #tpu.memory_space<vmem>>, %arg2: memref<25x16x16xbf16, #tpu.memory_space<vmem>>, %arg3: memref<16x1xf32, #tpu.memory_space<vmem>>, %arg4: memref<25x512xf32, #tpu.memory_space<vmem>>, %arg5: memref<512x128xbf16, #tpu.memory_space<vmem>>, %arg6: memref<25x16x16xbf16, #tpu.memory_space<vmem>>, %arg7: memref<16x1xf32, #tpu.memory_space<vmem>>, %arg8: memref<16x1xf32, #tpu.memory_space<vmem>>, %arg9: memref<16x1xf32, #tpu.memory_space<vmem>>, %arg10: memref<25x128xf32, #tpu.memory_space<vmem>>, %arg11: memref<9x16x16xbf16, #tpu.memory_space<vmem>>, %arg12: memref<16x1xf32, #tpu.memory_space<vmem>>, %arg13: memref<16x1xf32, #tpu.memory_space<vmem>>, %arg14: memref<16x1xf32, #tpu.memory_space<vmem>>, %arg15: memref<9x128xf32, #tpu.memory_space<vmem>>, %arg16: memref<128x128xbf16, #tpu.memory_space<vmem>>, %arg17: memref<9x16x16xbf16, #tpu.memory_space<vmem>>, %arg18: memref<16x1xf32, #tpu.memory_space<vmem>>, %arg19: memref<9x128xf32, #tpu.memory_space<vmem>>, %arg20: memref<16x128xf32, #tpu.memory_space<vmem>>) attributes {dimension_semantics = [#tpu.dimension_semantics<arbitrary>], iteration_bounds = array<i64: 1>, scalar_prefetch = 0 : i64, scratch_operands = 0 : i64, tpu.core_type = #tpu.core_type<tc>, window_params = [{pipeline_mode = #tpu.pipeline_mode<synchronous>, transform_indices = @transform_0, window_bounds = array<i64: 16, 512>}, {pipeline_mode = #tpu.pipeline_mode<synchronous>, transform_indices = @transform_1, window_bounds = array<i64: 25, 16, 16>}, {pipeline_mode = #tpu.pipeline_mode<synchronous>, transform_indices = @transform_2, window_bounds = array<i64: 16, 1>}, {pipeline_mode = #tpu.pipeline_mode<synchronous>, transform_indices = @transform_3, window_bounds = array<i64: 25, 512>}, {pipeline_mode = #tpu.pipeline_mode<synchronous>, transform_indices = @transform_4, window_bounds = array<i64: 512, 128>}, {pipeline_mode = #tpu.pipeline_mode<synchronous>, transform_indices = @transform_5, window_bounds = array<i64: 25, 16, 16>}, {pipeline_mode = #tpu.pipeline_mode<synchronous>, transform_indices = @transform_6, window_bounds = array<i64: 16, 1>}, {pipeline_mode = #tpu.pipeline_mode<synchronous>, transform_indices = @transform_7, window_bounds = array<i64: 16, 1>}, {pipeline_mode = #tpu.pipeline_mode<synchronous>, transform_indices = @transform_8, window_bounds = array<i64: 16, 1>}, {pipeline_mode = #tpu.pipeline_mode<synchronous>, transform_indices = @transform_9, window_bounds = array<i64: 25, 128>}, {pipeline_mode = #tpu.pipeline_mode<synchronous>, transform_indices = @transform_10, window_bounds = array<i64: 9, 16, 16>}, {pipeline_mode = #tpu.pipeline_mode<synchronous>, transform_indices = @transform_11, window_bounds = array<i64: 16, 1>}, {pipeline_mode = #tpu.pipeline_mode<synchronous>, transform_indices = @transform_12, window_bounds = array<i64: 16, 1>}, {pipeline_mode = #tpu.pipeline_mode<synchronous>, transform_indices = @transform_13, window_bounds = array<i64: 16, 1>}, {pipeline_mode = #tpu.pipeline_mode<synchronous>, transform_indices = @transform_14, window_bounds = array<i64: 9, 128>}, {pipeline_mode = #tpu.pipeline_mode<synchronous>, transform_indices = @transform_15, window_bounds = array<i64: 128, 128>}, {pipeline_mode = #tpu.pipeline_mode<synchronous>, transform_indices = @transform_16, window_bounds = array<i64: 9, 16, 16>}, {pipeline_mode = #tpu.pipeline_mode<synchronous>, transform_indices = @transform_17, window_bounds = array<i64: 16, 1>}, {pipeline_mode = #tpu.pipeline_mode<synchronous>, transform_indices = @transform_18, window_bounds = array<i64: 9, 128>}, {pipeline_mode = #tpu.pipeline_mode<synchronous>, transform_indices = @transform_19, window_bounds = array<i64: 16, 128>}]} {
    %c0 = arith.constant 0 : index
    %c0_0 = arith.constant 0 : index
    %0 = vector.load %arg1[%c0, %c0_0] : memref<16x512xf32, #tpu.memory_space<vmem>>, vector<16x512xf32>
    %1 = tpu.concatenate %0, %0 in 1 : vector<16x512xf32>, vector<16x512xf32> -> vector<16x1024xf32>
    %2 = arith.truncf %1 : vector<16x1024xf32> to vector<16x1024xbf16>
    %cst = arith.constant 0.000000e+00 : f32
    %3 = vector.broadcast %cst : f32 to vector<16x512xf32>
    %4 = vector.extract_strided_slice %2 {offsets = [0, 478], sizes = [16, 512], strides = [1, 1]} : vector<16x1024xbf16> to vector<16x512xbf16>
    %c0_1 = arith.constant 0 : index
    %c0_2 = arith.constant 0 : index
    %c0_3 = arith.constant 0 : index
    %5 = vector.load %arg2[%c0_1, %c0_2, %c0_3] : memref<25x16x16xbf16, #tpu.memory_space<vmem>>, vector<1x16x16xbf16>
    %6 = vector.shape_cast %5 : vector<1x16x16xbf16> to vector<16x16xbf16>
    %cst_4 = arith.constant dense<0.000000e+00> : vector<16x512xf32>
    %7 = tpu.matmul %6, %4, %cst_4 {dimension_numbers = #tpu.dot_dimension_numbers<[1], [0], [0], [1], [0, 0, 1, 1], [], []>} : vector<16x16xbf16>, vector<16x512xbf16>, vector<16x512xf32> -> vector<16x512xf32>
    %c0_5 = arith.constant 0 : index
    %c0_6 = arith.constant 0 : index
    %8 = vector.load %arg4[%c0_5, %c0_6] : memref<25x512xf32, #tpu.memory_space<vmem>>, vector<1x512xf32>
    %9 = vector.broadcast %8 : vector<1x512xf32> to vector<16x512xf32>
    %10 = arith.mulf %7, %9 : vector<16x512xf32>
    %11 = arith.addf %3, %10 : vector<16x512xf32>
    %12 = vector.extract_strided_slice %2 {offsets = [0, 479], sizes = [16, 512], strides = [1, 1]} : vector<16x1024xbf16> to vector<16x512xbf16>
    %c1 = arith.constant 1 : index
    %c0_7 = arith.constant 0 : index
    %c0_8 = arith.constant 0 : index
    %13 = vector.load %arg2[%c1, %c0_7, %c0_8] : memref<25x16x16xbf16, #tpu.memory_space<vmem>>, vector<1x16x16xbf16>
    %14 = vector.shape_cast %13 : vector<1x16x16xbf16> to vector<16x16xbf16>
    %cst_9 = arith.constant dense<0.000000e+00> : vector<16x512xf32>
    %15 = tpu.matmul %14, %12, %cst_9 {dimension_numbers = #tpu.dot_dimension_numbers<[1], [0], [0], [1], [0, 0, 1, 1], [], []>} : vector<16x16xbf16>, vector<16x512xbf16>, vector<16x512xf32> -> vector<16x512xf32>
    %c1_10 = arith.constant 1 : index
    %c0_11 = arith.constant 0 : index
    %16 = vector.load %arg4[%c1_10, %c0_11] : memref<25x512xf32, #tpu.memory_space<vmem>>, vector<1x512xf32>
    %17 = vector.broadcast %16 : vector<1x512xf32> to vector<16x512xf32>
    %18 = arith.mulf %15, %17 : vector<16x512xf32>
    %19 = arith.addf %11, %18 : vector<16x512xf32>
    %20 = vector.extract_strided_slice %2 {offsets = [0, 480], sizes = [16, 512], strides = [1, 1]} : vector<16x1024xbf16> to vector<16x512xbf16>
    %c2 = arith.constant 2 : index
    %c0_12 = arith.constant 0 : index
    %c0_13 = arith.constant 0 : index
    %21 = vector.load %arg2[%c2, %c0_12, %c0_13] : memref<25x16x16xbf16, #tpu.memory_space<vmem>>, vector<1x16x16xbf16>
    %22 = vector.shape_cast %21 : vector<1x16x16xbf16> to vector<16x16xbf16>
    %cst_14 = arith.constant dense<0.000000e+00> : vector<16x512xf32>
    %23 = tpu.matmul %22, %20, %cst_14 {dimension_numbers = #tpu.dot_dimension_numbers<[1], [0], [0], [1], [0, 0, 1, 1], [], []>} : vector<16x16xbf16>, vector<16x512xbf16>, vector<16x512xf32> -> vector<16x512xf32>
    %c2_15 = arith.constant 2 : index
    %c0_16 = arith.constant 0 : index
    %24 = vector.load %arg4[%c2_15, %c0_16] : memref<25x512xf32, #tpu.memory_space<vmem>>, vector<1x512xf32>
    %25 = vector.broadcast %24 : vector<1x512xf32> to vector<16x512xf32>
    %26 = arith.mulf %23, %25 : vector<16x512xf32>
    %27 = arith.addf %19, %26 : vector<16x512xf32>
    %28 = vector.extract_strided_slice %2 {offsets = [0, 481], sizes = [16, 512], strides = [1, 1]} : vector<16x1024xbf16> to vector<16x512xbf16>
    %c3 = arith.constant 3 : index
    %c0_17 = arith.constant 0 : index
    %c0_18 = arith.constant 0 : index
    %29 = vector.load %arg2[%c3, %c0_17, %c0_18] : memref<25x16x16xbf16, #tpu.memory_space<vmem>>, vector<1x16x16xbf16>
    %30 = vector.shape_cast %29 : vector<1x16x16xbf16> to vector<16x16xbf16>
    %cst_19 = arith.constant dense<0.000000e+00> : vector<16x512xf32>
    %31 = tpu.matmul %30, %28, %cst_19 {dimension_numbers = #tpu.dot_dimension_numbers<[1], [0], [0], [1], [0, 0, 1, 1], [], []>} : vector<16x16xbf16>, vector<16x512xbf16>, vector<16x512xf32> -> vector<16x512xf32>
    %c3_20 = arith.constant 3 : index
    %c0_21 = arith.constant 0 : index
    %32 = vector.load %arg4[%c3_20, %c0_21] : memref<25x512xf32, #tpu.memory_space<vmem>>, vector<1x512xf32>
    %33 = vector.broadcast %32 : vector<1x512xf32> to vector<16x512xf32>
    %34 = arith.mulf %31, %33 : vector<16x512xf32>
    %35 = arith.addf %27, %34 : vector<16x512xf32>
    %36 = vector.extract_strided_slice %2 {offsets = [0, 482], sizes = [16, 512], strides = [1, 1]} : vector<16x1024xbf16> to vector<16x512xbf16>
    %c4 = arith.constant 4 : index
    %c0_22 = arith.constant 0 : index
    %c0_23 = arith.constant 0 : index
    %37 = vector.load %arg2[%c4, %c0_22, %c0_23] : memref<25x16x16xbf16, #tpu.memory_space<vmem>>, vector<1x16x16xbf16>
    %38 = vector.shape_cast %37 : vector<1x16x16xbf16> to vector<16x16xbf16>
    %cst_24 = arith.constant dense<0.000000e+00> : vector<16x512xf32>
    %39 = tpu.matmul %38, %36, %cst_24 {dimension_numbers = #tpu.dot_dimension_numbers<[1], [0], [0], [1], [0, 0, 1, 1], [], []>} : vector<16x16xbf16>, vector<16x512xbf16>, vector<16x512xf32> -> vector<16x512xf32>
    %c4_25 = arith.constant 4 : index
    %c0_26 = arith.constant 0 : index
    %40 = vector.load %arg4[%c4_25, %c0_26] : memref<25x512xf32, #tpu.memory_space<vmem>>, vector<1x512xf32>
    %41 = vector.broadcast %40 : vector<1x512xf32> to vector<16x512xf32>
    %42 = arith.mulf %39, %41 : vector<16x512xf32>
    %43 = arith.addf %35, %42 : vector<16x512xf32>
    %44 = vector.extract_strided_slice %2 {offsets = [0, 494], sizes = [16, 512], strides = [1, 1]} : vector<16x1024xbf16> to vector<16x512xbf16>
    %c5 = arith.constant 5 : index
    %c0_27 = arith.constant 0 : index
    %c0_28 = arith.constant 0 : index
    %45 = vector.load %arg2[%c5, %c0_27, %c0_28] : memref<25x16x16xbf16, #tpu.memory_space<vmem>>, vector<1x16x16xbf16>
    %46 = vector.shape_cast %45 : vector<1x16x16xbf16> to vector<16x16xbf16>
    %cst_29 = arith.constant dense<0.000000e+00> : vector<16x512xf32>
    %47 = tpu.matmul %46, %44, %cst_29 {dimension_numbers = #tpu.dot_dimension_numbers<[1], [0], [0], [1], [0, 0, 1, 1], [], []>} : vector<16x16xbf16>, vector<16x512xbf16>, vector<16x512xf32> -> vector<16x512xf32>
    %c5_30 = arith.constant 5 : index
    %c0_31 = arith.constant 0 : index
    %48 = vector.load %arg4[%c5_30, %c0_31] : memref<25x512xf32, #tpu.memory_space<vmem>>, vector<1x512xf32>
    %49 = vector.broadcast %48 : vector<1x512xf32> to vector<16x512xf32>
    %50 = arith.mulf %47, %49 : vector<16x512xf32>
    %51 = arith.addf %43, %50 : vector<16x512xf32>
    %52 = vector.extract_strided_slice %2 {offsets = [0, 495], sizes = [16, 512], strides = [1, 1]} : vector<16x1024xbf16> to vector<16x512xbf16>
    %c6 = arith.constant 6 : index
    %c0_32 = arith.constant 0 : index
    %c0_33 = arith.constant 0 : index
    %53 = vector.load %arg2[%c6, %c0_32, %c0_33] : memref<25x16x16xbf16, #tpu.memory_space<vmem>>, vector<1x16x16xbf16>
    %54 = vector.shape_cast %53 : vector<1x16x16xbf16> to vector<16x16xbf16>
    %cst_34 = arith.constant dense<0.000000e+00> : vector<16x512xf32>
    %55 = tpu.matmul %54, %52, %cst_34 {dimension_numbers = #tpu.dot_dimension_numbers<[1], [0], [0], [1], [0, 0, 1, 1], [], []>} : vector<16x16xbf16>, vector<16x512xbf16>, vector<16x512xf32> -> vector<16x512xf32>
    %c6_35 = arith.constant 6 : index
    %c0_36 = arith.constant 0 : index
    %56 = vector.load %arg4[%c6_35, %c0_36] : memref<25x512xf32, #tpu.memory_space<vmem>>, vector<1x512xf32>
    %57 = vector.broadcast %56 : vector<1x512xf32> to vector<16x512xf32>
    %58 = arith.mulf %55, %57 : vector<16x512xf32>
    %59 = arith.addf %51, %58 : vector<16x512xf32>
    %60 = vector.extract_strided_slice %2 {offsets = [0, 496], sizes = [16, 512], strides = [1, 1]} : vector<16x1024xbf16> to vector<16x512xbf16>
    %c7 = arith.constant 7 : index
    %c0_37 = arith.constant 0 : index
    %c0_38 = arith.constant 0 : index
    %61 = vector.load %arg2[%c7, %c0_37, %c0_38] : memref<25x16x16xbf16, #tpu.memory_space<vmem>>, vector<1x16x16xbf16>
    %62 = vector.shape_cast %61 : vector<1x16x16xbf16> to vector<16x16xbf16>
    %cst_39 = arith.constant dense<0.000000e+00> : vector<16x512xf32>
    %63 = tpu.matmul %62, %60, %cst_39 {dimension_numbers = #tpu.dot_dimension_numbers<[1], [0], [0], [1], [0, 0, 1, 1], [], []>} : vector<16x16xbf16>, vector<16x512xbf16>, vector<16x512xf32> -> vector<16x512xf32>
    %c7_40 = arith.constant 7 : index
    %c0_41 = arith.constant 0 : index
    %64 = vector.load %arg4[%c7_40, %c0_41] : memref<25x512xf32, #tpu.memory_space<vmem>>, vector<1x512xf32>
    %65 = vector.broadcast %64 : vector<1x512xf32> to vector<16x512xf32>
    %66 = arith.mulf %63, %65 : vector<16x512xf32>
    %67 = arith.addf %59, %66 : vector<16x512xf32>
    %68 = vector.extract_strided_slice %2 {offsets = [0, 497], sizes = [16, 512], strides = [1, 1]} : vector<16x1024xbf16> to vector<16x512xbf16>
    %c8 = arith.constant 8 : index
    %c0_42 = arith.constant 0 : index
    %c0_43 = arith.constant 0 : index
    %69 = vector.load %arg2[%c8, %c0_42, %c0_43] : memref<25x16x16xbf16, #tpu.memory_space<vmem>>, vector<1x16x16xbf16>
    %70 = vector.shape_cast %69 : vector<1x16x16xbf16> to vector<16x16xbf16>
    %cst_44 = arith.constant dense<0.000000e+00> : vector<16x512xf32>
    %71 = tpu.matmul %70, %68, %cst_44 {dimension_numbers = #tpu.dot_dimension_numbers<[1], [0], [0], [1], [0, 0, 1, 1], [], []>} : vector<16x16xbf16>, vector<16x512xbf16>, vector<16x512xf32> -> vector<16x512xf32>
    %c8_45 = arith.constant 8 : index
    %c0_46 = arith.constant 0 : index
    %72 = vector.load %arg4[%c8_45, %c0_46] : memref<25x512xf32, #tpu.memory_space<vmem>>, vector<1x512xf32>
    %73 = vector.broadcast %72 : vector<1x512xf32> to vector<16x512xf32>
    %74 = arith.mulf %71, %73 : vector<16x512xf32>
    %75 = arith.addf %67, %74 : vector<16x512xf32>
    %76 = vector.extract_strided_slice %2 {offsets = [0, 498], sizes = [16, 512], strides = [1, 1]} : vector<16x1024xbf16> to vector<16x512xbf16>
    %c9 = arith.constant 9 : index
    %c0_47 = arith.constant 0 : index
    %c0_48 = arith.constant 0 : index
    %77 = vector.load %arg2[%c9, %c0_47, %c0_48] : memref<25x16x16xbf16, #tpu.memory_space<vmem>>, vector<1x16x16xbf16>
    %78 = vector.shape_cast %77 : vector<1x16x16xbf16> to vector<16x16xbf16>
    %cst_49 = arith.constant dense<0.000000e+00> : vector<16x512xf32>
    %79 = tpu.matmul %78, %76, %cst_49 {dimension_numbers = #tpu.dot_dimension_numbers<[1], [0], [0], [1], [0, 0, 1, 1], [], []>} : vector<16x16xbf16>, vector<16x512xbf16>, vector<16x512xf32> -> vector<16x512xf32>
    %c9_50 = arith.constant 9 : index
    %c0_51 = arith.constant 0 : index
    %80 = vector.load %arg4[%c9_50, %c0_51] : memref<25x512xf32, #tpu.memory_space<vmem>>, vector<1x512xf32>
    %81 = vector.broadcast %80 : vector<1x512xf32> to vector<16x512xf32>
    %82 = arith.mulf %79, %81 : vector<16x512xf32>
    %83 = arith.addf %75, %82 : vector<16x512xf32>
    %84 = vector.extract_strided_slice %2 {offsets = [0, 510], sizes = [16, 512], strides = [1, 1]} : vector<16x1024xbf16> to vector<16x512xbf16>
    %c10 = arith.constant 10 : index
    %c0_52 = arith.constant 0 : index
    %c0_53 = arith.constant 0 : index
    %85 = vector.load %arg2[%c10, %c0_52, %c0_53] : memref<25x16x16xbf16, #tpu.memory_space<vmem>>, vector<1x16x16xbf16>
    %86 = vector.shape_cast %85 : vector<1x16x16xbf16> to vector<16x16xbf16>
    %cst_54 = arith.constant dense<0.000000e+00> : vector<16x512xf32>
    %87 = tpu.matmul %86, %84, %cst_54 {dimension_numbers = #tpu.dot_dimension_numbers<[1], [0], [0], [1], [0, 0, 1, 1], [], []>} : vector<16x16xbf16>, vector<16x512xbf16>, vector<16x512xf32> -> vector<16x512xf32>
    %c10_55 = arith.constant 10 : index
    %c0_56 = arith.constant 0 : index
    %88 = vector.load %arg4[%c10_55, %c0_56] : memref<25x512xf32, #tpu.memory_space<vmem>>, vector<1x512xf32>
    %89 = vector.broadcast %88 : vector<1x512xf32> to vector<16x512xf32>
    %90 = arith.mulf %87, %89 : vector<16x512xf32>
    %91 = arith.addf %83, %90 : vector<16x512xf32>
    %92 = vector.extract_strided_slice %2 {offsets = [0, 511], sizes = [16, 512], strides = [1, 1]} : vector<16x1024xbf16> to vector<16x512xbf16>
    %c11 = arith.constant 11 : index
    %c0_57 = arith.constant 0 : index
    %c0_58 = arith.constant 0 : index
    %93 = vector.load %arg2[%c11, %c0_57, %c0_58] : memref<25x16x16xbf16, #tpu.memory_space<vmem>>, vector<1x16x16xbf16>
    %94 = vector.shape_cast %93 : vector<1x16x16xbf16> to vector<16x16xbf16>
    %cst_59 = arith.constant dense<0.000000e+00> : vector<16x512xf32>
    %95 = tpu.matmul %94, %92, %cst_59 {dimension_numbers = #tpu.dot_dimension_numbers<[1], [0], [0], [1], [0, 0, 1, 1], [], []>} : vector<16x16xbf16>, vector<16x512xbf16>, vector<16x512xf32> -> vector<16x512xf32>
    %c11_60 = arith.constant 11 : index
    %c0_61 = arith.constant 0 : index
    %96 = vector.load %arg4[%c11_60, %c0_61] : memref<25x512xf32, #tpu.memory_space<vmem>>, vector<1x512xf32>
    %97 = vector.broadcast %96 : vector<1x512xf32> to vector<16x512xf32>
    %98 = arith.mulf %95, %97 : vector<16x512xf32>
    %99 = arith.addf %91, %98 : vector<16x512xf32>
    %100 = vector.extract_strided_slice %2 {offsets = [0, 0], sizes = [16, 512], strides = [1, 1]} : vector<16x1024xbf16> to vector<16x512xbf16>
    %c12 = arith.constant 12 : index
    %c0_62 = arith.constant 0 : index
    %c0_63 = arith.constant 0 : index
    %101 = vector.load %arg2[%c12, %c0_62, %c0_63] : memref<25x16x16xbf16, #tpu.memory_space<vmem>>, vector<1x16x16xbf16>
    %102 = vector.shape_cast %101 : vector<1x16x16xbf16> to vector<16x16xbf16>
    %cst_64 = arith.constant dense<0.000000e+00> : vector<16x512xf32>
    %103 = tpu.matmul %102, %100, %cst_64 {dimension_numbers = #tpu.dot_dimension_numbers<[1], [0], [0], [1], [0, 0, 1, 1], [], []>} : vector<16x16xbf16>, vector<16x512xbf16>, vector<16x512xf32> -> vector<16x512xf32>
    %c12_65 = arith.constant 12 : index
    %c0_66 = arith.constant 0 : index
    %104 = vector.load %arg4[%c12_65, %c0_66] : memref<25x512xf32, #tpu.memory_space<vmem>>, vector<1x512xf32>
    %105 = vector.broadcast %104 : vector<1x512xf32> to vector<16x512xf32>
    %106 = arith.mulf %103, %105 : vector<16x512xf32>
    %107 = arith.addf %99, %106 : vector<16x512xf32>
    %108 = vector.extract_strided_slice %2 {offsets = [0, 1], sizes = [16, 512], strides = [1, 1]} : vector<16x1024xbf16> to vector<16x512xbf16>
    %c13 = arith.constant 13 : index
    %c0_67 = arith.constant 0 : index
    %c0_68 = arith.constant 0 : index
    %109 = vector.load %arg2[%c13, %c0_67, %c0_68] : memref<25x16x16xbf16, #tpu.memory_space<vmem>>, vector<1x16x16xbf16>
    %110 = vector.shape_cast %109 : vector<1x16x16xbf16> to vector<16x16xbf16>
    %cst_69 = arith.constant dense<0.000000e+00> : vector<16x512xf32>
    %111 = tpu.matmul %110, %108, %cst_69 {dimension_numbers = #tpu.dot_dimension_numbers<[1], [0], [0], [1], [0, 0, 1, 1], [], []>} : vector<16x16xbf16>, vector<16x512xbf16>, vector<16x512xf32> -> vector<16x512xf32>
    %c13_70 = arith.constant 13 : index
    %c0_71 = arith.constant 0 : index
    %112 = vector.load %arg4[%c13_70, %c0_71] : memref<25x512xf32, #tpu.memory_space<vmem>>, vector<1x512xf32>
    %113 = vector.broadcast %112 : vector<1x512xf32> to vector<16x512xf32>
    %114 = arith.mulf %111, %113 : vector<16x512xf32>
    %115 = arith.addf %107, %114 : vector<16x512xf32>
    %116 = vector.extract_strided_slice %2 {offsets = [0, 2], sizes = [16, 512], strides = [1, 1]} : vector<16x1024xbf16> to vector<16x512xbf16>
    %c14 = arith.constant 14 : index
    %c0_72 = arith.constant 0 : index
    %c0_73 = arith.constant 0 : index
    %117 = vector.load %arg2[%c14, %c0_72, %c0_73] : memref<25x16x16xbf16, #tpu.memory_space<vmem>>, vector<1x16x16xbf16>
    %118 = vector.shape_cast %117 : vector<1x16x16xbf16> to vector<16x16xbf16>
    %cst_74 = arith.constant dense<0.000000e+00> : vector<16x512xf32>
    %119 = tpu.matmul %118, %116, %cst_74 {dimension_numbers = #tpu.dot_dimension_numbers<[1], [0], [0], [1], [0, 0, 1, 1], [], []>} : vector<16x16xbf16>, vector<16x512xbf16>, vector<16x512xf32> -> vector<16x512xf32>
    %c14_75 = arith.constant 14 : index
    %c0_76 = arith.constant 0 : index
    %120 = vector.load %arg4[%c14_75, %c0_76] : memref<25x512xf32, #tpu.memory_space<vmem>>, vector<1x512xf32>
    %121 = vector.broadcast %120 : vector<1x512xf32> to vector<16x512xf32>
    %122 = arith.mulf %119, %121 : vector<16x512xf32>
    %123 = arith.addf %115, %122 : vector<16x512xf32>
    %124 = vector.extract_strided_slice %2 {offsets = [0, 14], sizes = [16, 512], strides = [1, 1]} : vector<16x1024xbf16> to vector<16x512xbf16>
    %c15 = arith.constant 15 : index
    %c0_77 = arith.constant 0 : index
    %c0_78 = arith.constant 0 : index
    %125 = vector.load %arg2[%c15, %c0_77, %c0_78] : memref<25x16x16xbf16, #tpu.memory_space<vmem>>, vector<1x16x16xbf16>
    %126 = vector.shape_cast %125 : vector<1x16x16xbf16> to vector<16x16xbf16>
    %cst_79 = arith.constant dense<0.000000e+00> : vector<16x512xf32>
    %127 = tpu.matmul %126, %124, %cst_79 {dimension_numbers = #tpu.dot_dimension_numbers<[1], [0], [0], [1], [0, 0, 1, 1], [], []>} : vector<16x16xbf16>, vector<16x512xbf16>, vector<16x512xf32> -> vector<16x512xf32>
    %c15_80 = arith.constant 15 : index
    %c0_81 = arith.constant 0 : index
    %128 = vector.load %arg4[%c15_80, %c0_81] : memref<25x512xf32, #tpu.memory_space<vmem>>, vector<1x512xf32>
    %129 = vector.broadcast %128 : vector<1x512xf32> to vector<16x512xf32>
    %130 = arith.mulf %127, %129 : vector<16x512xf32>
    %131 = arith.addf %123, %130 : vector<16x512xf32>
    %132 = vector.extract_strided_slice %2 {offsets = [0, 15], sizes = [16, 512], strides = [1, 1]} : vector<16x1024xbf16> to vector<16x512xbf16>
    %c16 = arith.constant 16 : index
    %c0_82 = arith.constant 0 : index
    %c0_83 = arith.constant 0 : index
    %133 = vector.load %arg2[%c16, %c0_82, %c0_83] : memref<25x16x16xbf16, #tpu.memory_space<vmem>>, vector<1x16x16xbf16>
    %134 = vector.shape_cast %133 : vector<1x16x16xbf16> to vector<16x16xbf16>
    %cst_84 = arith.constant dense<0.000000e+00> : vector<16x512xf32>
    %135 = tpu.matmul %134, %132, %cst_84 {dimension_numbers = #tpu.dot_dimension_numbers<[1], [0], [0], [1], [0, 0, 1, 1], [], []>} : vector<16x16xbf16>, vector<16x512xbf16>, vector<16x512xf32> -> vector<16x512xf32>
    %c16_85 = arith.constant 16 : index
    %c0_86 = arith.constant 0 : index
    %136 = vector.load %arg4[%c16_85, %c0_86] : memref<25x512xf32, #tpu.memory_space<vmem>>, vector<1x512xf32>
    %137 = vector.broadcast %136 : vector<1x512xf32> to vector<16x512xf32>
    %138 = arith.mulf %135, %137 : vector<16x512xf32>
    %139 = arith.addf %131, %138 : vector<16x512xf32>
    %140 = vector.extract_strided_slice %2 {offsets = [0, 16], sizes = [16, 512], strides = [1, 1]} : vector<16x1024xbf16> to vector<16x512xbf16>
    %c17 = arith.constant 17 : index
    %c0_87 = arith.constant 0 : index
    %c0_88 = arith.constant 0 : index
    %141 = vector.load %arg2[%c17, %c0_87, %c0_88] : memref<25x16x16xbf16, #tpu.memory_space<vmem>>, vector<1x16x16xbf16>
    %142 = vector.shape_cast %141 : vector<1x16x16xbf16> to vector<16x16xbf16>
    %cst_89 = arith.constant dense<0.000000e+00> : vector<16x512xf32>
    %143 = tpu.matmul %142, %140, %cst_89 {dimension_numbers = #tpu.dot_dimension_numbers<[1], [0], [0], [1], [0, 0, 1, 1], [], []>} : vector<16x16xbf16>, vector<16x512xbf16>, vector<16x512xf32> -> vector<16x512xf32>
    %c17_90 = arith.constant 17 : index
    %c0_91 = arith.constant 0 : index
    %144 = vector.load %arg4[%c17_90, %c0_91] : memref<25x512xf32, #tpu.memory_space<vmem>>, vector<1x512xf32>
    %145 = vector.broadcast %144 : vector<1x512xf32> to vector<16x512xf32>
    %146 = arith.mulf %143, %145 : vector<16x512xf32>
    %147 = arith.addf %139, %146 : vector<16x512xf32>
    %148 = vector.extract_strided_slice %2 {offsets = [0, 17], sizes = [16, 512], strides = [1, 1]} : vector<16x1024xbf16> to vector<16x512xbf16>
    %c18 = arith.constant 18 : index
    %c0_92 = arith.constant 0 : index
    %c0_93 = arith.constant 0 : index
    %149 = vector.load %arg2[%c18, %c0_92, %c0_93] : memref<25x16x16xbf16, #tpu.memory_space<vmem>>, vector<1x16x16xbf16>
    %150 = vector.shape_cast %149 : vector<1x16x16xbf16> to vector<16x16xbf16>
    %cst_94 = arith.constant dense<0.000000e+00> : vector<16x512xf32>
    %151 = tpu.matmul %150, %148, %cst_94 {dimension_numbers = #tpu.dot_dimension_numbers<[1], [0], [0], [1], [0, 0, 1, 1], [], []>} : vector<16x16xbf16>, vector<16x512xbf16>, vector<16x512xf32> -> vector<16x512xf32>
    %c18_95 = arith.constant 18 : index
    %c0_96 = arith.constant 0 : index
    %152 = vector.load %arg4[%c18_95, %c0_96] : memref<25x512xf32, #tpu.memory_space<vmem>>, vector<1x512xf32>
    %153 = vector.broadcast %152 : vector<1x512xf32> to vector<16x512xf32>
    %154 = arith.mulf %151, %153 : vector<16x512xf32>
    %155 = arith.addf %147, %154 : vector<16x512xf32>
    %156 = vector.extract_strided_slice %2 {offsets = [0, 18], sizes = [16, 512], strides = [1, 1]} : vector<16x1024xbf16> to vector<16x512xbf16>
    %c19 = arith.constant 19 : index
    %c0_97 = arith.constant 0 : index
    %c0_98 = arith.constant 0 : index
    %157 = vector.load %arg2[%c19, %c0_97, %c0_98] : memref<25x16x16xbf16, #tpu.memory_space<vmem>>, vector<1x16x16xbf16>
    %158 = vector.shape_cast %157 : vector<1x16x16xbf16> to vector<16x16xbf16>
    %cst_99 = arith.constant dense<0.000000e+00> : vector<16x512xf32>
    %159 = tpu.matmul %158, %156, %cst_99 {dimension_numbers = #tpu.dot_dimension_numbers<[1], [0], [0], [1], [0, 0, 1, 1], [], []>} : vector<16x16xbf16>, vector<16x512xbf16>, vector<16x512xf32> -> vector<16x512xf32>
    %c19_100 = arith.constant 19 : index
    %c0_101 = arith.constant 0 : index
    %160 = vector.load %arg4[%c19_100, %c0_101] : memref<25x512xf32, #tpu.memory_space<vmem>>, vector<1x512xf32>
    %161 = vector.broadcast %160 : vector<1x512xf32> to vector<16x512xf32>
    %162 = arith.mulf %159, %161 : vector<16x512xf32>
    %163 = arith.addf %155, %162 : vector<16x512xf32>
    %164 = vector.extract_strided_slice %2 {offsets = [0, 30], sizes = [16, 512], strides = [1, 1]} : vector<16x1024xbf16> to vector<16x512xbf16>
    %c20 = arith.constant 20 : index
    %c0_102 = arith.constant 0 : index
    %c0_103 = arith.constant 0 : index
    %165 = vector.load %arg2[%c20, %c0_102, %c0_103] : memref<25x16x16xbf16, #tpu.memory_space<vmem>>, vector<1x16x16xbf16>
    %166 = vector.shape_cast %165 : vector<1x16x16xbf16> to vector<16x16xbf16>
    %cst_104 = arith.constant dense<0.000000e+00> : vector<16x512xf32>
    %167 = tpu.matmul %166, %164, %cst_104 {dimension_numbers = #tpu.dot_dimension_numbers<[1], [0], [0], [1], [0, 0, 1, 1], [], []>} : vector<16x16xbf16>, vector<16x512xbf16>, vector<16x512xf32> -> vector<16x512xf32>
    %c20_105 = arith.constant 20 : index
    %c0_106 = arith.constant 0 : index
    %168 = vector.load %arg4[%c20_105, %c0_106] : memref<25x512xf32, #tpu.memory_space<vmem>>, vector<1x512xf32>
    %169 = vector.broadcast %168 : vector<1x512xf32> to vector<16x512xf32>
    %170 = arith.mulf %167, %169 : vector<16x512xf32>
    %171 = arith.addf %163, %170 : vector<16x512xf32>
    %172 = vector.extract_strided_slice %2 {offsets = [0, 31], sizes = [16, 512], strides = [1, 1]} : vector<16x1024xbf16> to vector<16x512xbf16>
    %c21 = arith.constant 21 : index
    %c0_107 = arith.constant 0 : index
    %c0_108 = arith.constant 0 : index
    %173 = vector.load %arg2[%c21, %c0_107, %c0_108] : memref<25x16x16xbf16, #tpu.memory_space<vmem>>, vector<1x16x16xbf16>
    %174 = vector.shape_cast %173 : vector<1x16x16xbf16> to vector<16x16xbf16>
    %cst_109 = arith.constant dense<0.000000e+00> : vector<16x512xf32>
    %175 = tpu.matmul %174, %172, %cst_109 {dimension_numbers = #tpu.dot_dimension_numbers<[1], [0], [0], [1], [0, 0, 1, 1], [], []>} : vector<16x16xbf16>, vector<16x512xbf16>, vector<16x512xf32> -> vector<16x512xf32>
    %c21_110 = arith.constant 21 : index
    %c0_111 = arith.constant 0 : index
    %176 = vector.load %arg4[%c21_110, %c0_111] : memref<25x512xf32, #tpu.memory_space<vmem>>, vector<1x512xf32>
    %177 = vector.broadcast %176 : vector<1x512xf32> to vector<16x512xf32>
    %178 = arith.mulf %175, %177 : vector<16x512xf32>
    %179 = arith.addf %171, %178 : vector<16x512xf32>
    %180 = vector.extract_strided_slice %2 {offsets = [0, 32], sizes = [16, 512], strides = [1, 1]} : vector<16x1024xbf16> to vector<16x512xbf16>
    %c22 = arith.constant 22 : index
    %c0_112 = arith.constant 0 : index
    %c0_113 = arith.constant 0 : index
    %181 = vector.load %arg2[%c22, %c0_112, %c0_113] : memref<25x16x16xbf16, #tpu.memory_space<vmem>>, vector<1x16x16xbf16>
    %182 = vector.shape_cast %181 : vector<1x16x16xbf16> to vector<16x16xbf16>
    %cst_114 = arith.constant dense<0.000000e+00> : vector<16x512xf32>
    %183 = tpu.matmul %182, %180, %cst_114 {dimension_numbers = #tpu.dot_dimension_numbers<[1], [0], [0], [1], [0, 0, 1, 1], [], []>} : vector<16x16xbf16>, vector<16x512xbf16>, vector<16x512xf32> -> vector<16x512xf32>
    %c22_115 = arith.constant 22 : index
    %c0_116 = arith.constant 0 : index
    %184 = vector.load %arg4[%c22_115, %c0_116] : memref<25x512xf32, #tpu.memory_space<vmem>>, vector<1x512xf32>
    %185 = vector.broadcast %184 : vector<1x512xf32> to vector<16x512xf32>
    %186 = arith.mulf %183, %185 : vector<16x512xf32>
    %187 = arith.addf %179, %186 : vector<16x512xf32>
    %188 = vector.extract_strided_slice %2 {offsets = [0, 33], sizes = [16, 512], strides = [1, 1]} : vector<16x1024xbf16> to vector<16x512xbf16>
    %c23 = arith.constant 23 : index
    %c0_117 = arith.constant 0 : index
    %c0_118 = arith.constant 0 : index
    %189 = vector.load %arg2[%c23, %c0_117, %c0_118] : memref<25x16x16xbf16, #tpu.memory_space<vmem>>, vector<1x16x16xbf16>
    %190 = vector.shape_cast %189 : vector<1x16x16xbf16> to vector<16x16xbf16>
    %cst_119 = arith.constant dense<0.000000e+00> : vector<16x512xf32>
    %191 = tpu.matmul %190, %188, %cst_119 {dimension_numbers = #tpu.dot_dimension_numbers<[1], [0], [0], [1], [0, 0, 1, 1], [], []>} : vector<16x16xbf16>, vector<16x512xbf16>, vector<16x512xf32> -> vector<16x512xf32>
    %c23_120 = arith.constant 23 : index
    %c0_121 = arith.constant 0 : index
    %192 = vector.load %arg4[%c23_120, %c0_121] : memref<25x512xf32, #tpu.memory_space<vmem>>, vector<1x512xf32>
    %193 = vector.broadcast %192 : vector<1x512xf32> to vector<16x512xf32>
    %194 = arith.mulf %191, %193 : vector<16x512xf32>
    %195 = arith.addf %187, %194 : vector<16x512xf32>
    %196 = vector.extract_strided_slice %2 {offsets = [0, 34], sizes = [16, 512], strides = [1, 1]} : vector<16x1024xbf16> to vector<16x512xbf16>
    %c24 = arith.constant 24 : index
    %c0_122 = arith.constant 0 : index
    %c0_123 = arith.constant 0 : index
    %197 = vector.load %arg2[%c24, %c0_122, %c0_123] : memref<25x16x16xbf16, #tpu.memory_space<vmem>>, vector<1x16x16xbf16>
    %198 = vector.shape_cast %197 : vector<1x16x16xbf16> to vector<16x16xbf16>
    %cst_124 = arith.constant dense<0.000000e+00> : vector<16x512xf32>
    %199 = tpu.matmul %198, %196, %cst_124 {dimension_numbers = #tpu.dot_dimension_numbers<[1], [0], [0], [1], [0, 0, 1, 1], [], []>} : vector<16x16xbf16>, vector<16x512xbf16>, vector<16x512xf32> -> vector<16x512xf32>
    %c24_125 = arith.constant 24 : index
    %c0_126 = arith.constant 0 : index
    %200 = vector.load %arg4[%c24_125, %c0_126] : memref<25x512xf32, #tpu.memory_space<vmem>>, vector<1x512xf32>
    %201 = vector.broadcast %200 : vector<1x512xf32> to vector<16x512xf32>
    %202 = arith.mulf %199, %201 : vector<16x512xf32>
    %203 = arith.addf %195, %202 : vector<16x512xf32>
    %204 = arith.truncf %203 : vector<16x512xf32> to vector<16x512xbf16>
    %c0_127 = arith.constant 0 : index
    %c0_128 = arith.constant 0 : index
    %205 = vector.load %arg5[%c0_127, %c0_128] : memref<512x128xbf16, #tpu.memory_space<vmem>>, vector<512x128xbf16>
    %cst_129 = arith.constant dense<0.000000e+00> : vector<16x128xf32>
    %206 = tpu.matmul %204, %205, %cst_129 {dimension_numbers = #tpu.dot_dimension_numbers<[1], [0], [0], [1], [0, 0, 1, 1], [], []>} : vector<16x512xbf16>, vector<512x128xbf16>, vector<16x128xf32> -> vector<16x128xf32>
    %c0_130 = arith.constant 0 : index
    %c0_131 = arith.constant 0 : index
    %207 = vector.load %arg3[%c0_130, %c0_131] : memref<16x1xf32, #tpu.memory_space<vmem>>, vector<16x1xf32>
    %208 = vector.broadcast %207 : vector<16x1xf32> to vector<16x128xf32>
    %209 = arith.addf %206, %208 : vector<16x128xf32>
    %cst_132 = arith.constant 0.000000e+00 : f32
    %210 = vector.broadcast %cst_132 : f32 to vector<16x128xf32>
    %211 = arith.cmpf ogt, %209, %210 : vector<16x128xf32>
    %cst_133 = arith.constant 0.00999999977 : f32
    %212 = vector.broadcast %cst_133 : f32 to vector<16x128xf32>
    %213 = arith.mulf %212, %209 : vector<16x128xf32>
    %214 = arith.select %211, %209, %213 : vector<16x128xi1>, vector<16x128xf32>
    %215 = tpu.concatenate %214, %214 in 1 : vector<16x128xf32>, vector<16x128xf32> -> vector<16x256xf32>
    %216 = arith.truncf %215 : vector<16x256xf32> to vector<16x256xbf16>
    %cst_134 = arith.constant 0.000000e+00 : f32
    %217 = vector.broadcast %cst_134 : f32 to vector<16x128xf32>
    %218 = vector.extract_strided_slice %216 {offsets = [0, 110], sizes = [16, 128], strides = [1, 1]} : vector<16x256xbf16> to vector<16x128xbf16>
    %c0_135 = arith.constant 0 : index
    %c0_136 = arith.constant 0 : index
    %c0_137 = arith.constant 0 : index
    %219 = vector.load %arg6[%c0_135, %c0_136, %c0_137] : memref<25x16x16xbf16, #tpu.memory_space<vmem>>, vector<1x16x16xbf16>
    %220 = vector.shape_cast %219 : vector<1x16x16xbf16> to vector<16x16xbf16>
    %cst_138 = arith.constant dense<0.000000e+00> : vector<16x128xf32>
    %221 = tpu.matmul %220, %218, %cst_138 {dimension_numbers = #tpu.dot_dimension_numbers<[1], [0], [0], [1], [0, 0, 1, 1], [], []>} : vector<16x16xbf16>, vector<16x128xbf16>, vector<16x128xf32> -> vector<16x128xf32>
    %c0_139 = arith.constant 0 : index
    %c0_140 = arith.constant 0 : index
    %222 = vector.load %arg10[%c0_139, %c0_140] : memref<25x128xf32, #tpu.memory_space<vmem>>, vector<1x128xf32>
    %223 = vector.broadcast %222 : vector<1x128xf32> to vector<16x128xf32>
    %224 = arith.mulf %221, %223 : vector<16x128xf32>
    %225 = arith.addf %217, %224 : vector<16x128xf32>
    %226 = vector.extract_strided_slice %216 {offsets = [0, 111], sizes = [16, 128], strides = [1, 1]} : vector<16x256xbf16> to vector<16x128xbf16>
    %c1_141 = arith.constant 1 : index
    %c0_142 = arith.constant 0 : index
    %c0_143 = arith.constant 0 : index
    %227 = vector.load %arg6[%c1_141, %c0_142, %c0_143] : memref<25x16x16xbf16, #tpu.memory_space<vmem>>, vector<1x16x16xbf16>
    %228 = vector.shape_cast %227 : vector<1x16x16xbf16> to vector<16x16xbf16>
    %cst_144 = arith.constant dense<0.000000e+00> : vector<16x128xf32>
    %229 = tpu.matmul %228, %226, %cst_144 {dimension_numbers = #tpu.dot_dimension_numbers<[1], [0], [0], [1], [0, 0, 1, 1], [], []>} : vector<16x16xbf16>, vector<16x128xbf16>, vector<16x128xf32> -> vector<16x128xf32>
    %c1_145 = arith.constant 1 : index
    %c0_146 = arith.constant 0 : index
    %230 = vector.load %arg10[%c1_145, %c0_146] : memref<25x128xf32, #tpu.memory_space<vmem>>, vector<1x128xf32>
    %231 = vector.broadcast %230 : vector<1x128xf32> to vector<16x128xf32>
    %232 = arith.mulf %229, %231 : vector<16x128xf32>
    %233 = arith.addf %225, %232 : vector<16x128xf32>
    %234 = vector.extract_strided_slice %216 {offsets = [0, 112], sizes = [16, 128], strides = [1, 1]} : vector<16x256xbf16> to vector<16x128xbf16>
    %c2_147 = arith.constant 2 : index
    %c0_148 = arith.constant 0 : index
    %c0_149 = arith.constant 0 : index
    %235 = vector.load %arg6[%c2_147, %c0_148, %c0_149] : memref<25x16x16xbf16, #tpu.memory_space<vmem>>, vector<1x16x16xbf16>
    %236 = vector.shape_cast %235 : vector<1x16x16xbf16> to vector<16x16xbf16>
    %cst_150 = arith.constant dense<0.000000e+00> : vector<16x128xf32>
    %237 = tpu.matmul %236, %234, %cst_150 {dimension_numbers = #tpu.dot_dimension_numbers<[1], [0], [0], [1], [0, 0, 1, 1], [], []>} : vector<16x16xbf16>, vector<16x128xbf16>, vector<16x128xf32> -> vector<16x128xf32>
    %c2_151 = arith.constant 2 : index
    %c0_152 = arith.constant 0 : index
    %238 = vector.load %arg10[%c2_151, %c0_152] : memref<25x128xf32, #tpu.memory_space<vmem>>, vector<1x128xf32>
    %239 = vector.broadcast %238 : vector<1x128xf32> to vector<16x128xf32>
    %240 = arith.mulf %237, %239 : vector<16x128xf32>
    %241 = arith.addf %233, %240 : vector<16x128xf32>
    %242 = vector.extract_strided_slice %216 {offsets = [0, 113], sizes = [16, 128], strides = [1, 1]} : vector<16x256xbf16> to vector<16x128xbf16>
    %c3_153 = arith.constant 3 : index
    %c0_154 = arith.constant 0 : index
    %c0_155 = arith.constant 0 : index
    %243 = vector.load %arg6[%c3_153, %c0_154, %c0_155] : memref<25x16x16xbf16, #tpu.memory_space<vmem>>, vector<1x16x16xbf16>
    %244 = vector.shape_cast %243 : vector<1x16x16xbf16> to vector<16x16xbf16>
    %cst_156 = arith.constant dense<0.000000e+00> : vector<16x128xf32>
    %245 = tpu.matmul %244, %242, %cst_156 {dimension_numbers = #tpu.dot_dimension_numbers<[1], [0], [0], [1], [0, 0, 1, 1], [], []>} : vector<16x16xbf16>, vector<16x128xbf16>, vector<16x128xf32> -> vector<16x128xf32>
    %c3_157 = arith.constant 3 : index
    %c0_158 = arith.constant 0 : index
    %246 = vector.load %arg10[%c3_157, %c0_158] : memref<25x128xf32, #tpu.memory_space<vmem>>, vector<1x128xf32>
    %247 = vector.broadcast %246 : vector<1x128xf32> to vector<16x128xf32>
    %248 = arith.mulf %245, %247 : vector<16x128xf32>
    %249 = arith.addf %241, %248 : vector<16x128xf32>
    %250 = vector.extract_strided_slice %216 {offsets = [0, 114], sizes = [16, 128], strides = [1, 1]} : vector<16x256xbf16> to vector<16x128xbf16>
    %c4_159 = arith.constant 4 : index
    %c0_160 = arith.constant 0 : index
    %c0_161 = arith.constant 0 : index
    %251 = vector.load %arg6[%c4_159, %c0_160, %c0_161] : memref<25x16x16xbf16, #tpu.memory_space<vmem>>, vector<1x16x16xbf16>
    %252 = vector.shape_cast %251 : vector<1x16x16xbf16> to vector<16x16xbf16>
    %cst_162 = arith.constant dense<0.000000e+00> : vector<16x128xf32>
    %253 = tpu.matmul %252, %250, %cst_162 {dimension_numbers = #tpu.dot_dimension_numbers<[1], [0], [0], [1], [0, 0, 1, 1], [], []>} : vector<16x16xbf16>, vector<16x128xbf16>, vector<16x128xf32> -> vector<16x128xf32>
    %c4_163 = arith.constant 4 : index
    %c0_164 = arith.constant 0 : index
    %254 = vector.load %arg10[%c4_163, %c0_164] : memref<25x128xf32, #tpu.memory_space<vmem>>, vector<1x128xf32>
    %255 = vector.broadcast %254 : vector<1x128xf32> to vector<16x128xf32>
    %256 = arith.mulf %253, %255 : vector<16x128xf32>
    %257 = arith.addf %249, %256 : vector<16x128xf32>
    %258 = vector.extract_strided_slice %216 {offsets = [0, 118], sizes = [16, 128], strides = [1, 1]} : vector<16x256xbf16> to vector<16x128xbf16>
    %c5_165 = arith.constant 5 : index
    %c0_166 = arith.constant 0 : index
    %c0_167 = arith.constant 0 : index
    %259 = vector.load %arg6[%c5_165, %c0_166, %c0_167] : memref<25x16x16xbf16, #tpu.memory_space<vmem>>, vector<1x16x16xbf16>
    %260 = vector.shape_cast %259 : vector<1x16x16xbf16> to vector<16x16xbf16>
    %cst_168 = arith.constant dense<0.000000e+00> : vector<16x128xf32>
    %261 = tpu.matmul %260, %258, %cst_168 {dimension_numbers = #tpu.dot_dimension_numbers<[1], [0], [0], [1], [0, 0, 1, 1], [], []>} : vector<16x16xbf16>, vector<16x128xbf16>, vector<16x128xf32> -> vector<16x128xf32>
    %c5_169 = arith.constant 5 : index
    %c0_170 = arith.constant 0 : index
    %262 = vector.load %arg10[%c5_169, %c0_170] : memref<25x128xf32, #tpu.memory_space<vmem>>, vector<1x128xf32>
    %263 = vector.broadcast %262 : vector<1x128xf32> to vector<16x128xf32>
    %264 = arith.mulf %261, %263 : vector<16x128xf32>
    %265 = arith.addf %257, %264 : vector<16x128xf32>
    %266 = vector.extract_strided_slice %216 {offsets = [0, 119], sizes = [16, 128], strides = [1, 1]} : vector<16x256xbf16> to vector<16x128xbf16>
    %c6_171 = arith.constant 6 : index
    %c0_172 = arith.constant 0 : index
    %c0_173 = arith.constant 0 : index
    %267 = vector.load %arg6[%c6_171, %c0_172, %c0_173] : memref<25x16x16xbf16, #tpu.memory_space<vmem>>, vector<1x16x16xbf16>
    %268 = vector.shape_cast %267 : vector<1x16x16xbf16> to vector<16x16xbf16>
    %cst_174 = arith.constant dense<0.000000e+00> : vector<16x128xf32>
    %269 = tpu.matmul %268, %266, %cst_174 {dimension_numbers = #tpu.dot_dimension_numbers<[1], [0], [0], [1], [0, 0, 1, 1], [], []>} : vector<16x16xbf16>, vector<16x128xbf16>, vector<16x128xf32> -> vector<16x128xf32>
    %c6_175 = arith.constant 6 : index
    %c0_176 = arith.constant 0 : index
    %270 = vector.load %arg10[%c6_175, %c0_176] : memref<25x128xf32, #tpu.memory_space<vmem>>, vector<1x128xf32>
    %271 = vector.broadcast %270 : vector<1x128xf32> to vector<16x128xf32>
    %272 = arith.mulf %269, %271 : vector<16x128xf32>
    %273 = arith.addf %265, %272 : vector<16x128xf32>
    %274 = vector.extract_strided_slice %216 {offsets = [0, 120], sizes = [16, 128], strides = [1, 1]} : vector<16x256xbf16> to vector<16x128xbf16>
    %c7_177 = arith.constant 7 : index
    %c0_178 = arith.constant 0 : index
    %c0_179 = arith.constant 0 : index
    %275 = vector.load %arg6[%c7_177, %c0_178, %c0_179] : memref<25x16x16xbf16, #tpu.memory_space<vmem>>, vector<1x16x16xbf16>
    %276 = vector.shape_cast %275 : vector<1x16x16xbf16> to vector<16x16xbf16>
    %cst_180 = arith.constant dense<0.000000e+00> : vector<16x128xf32>
    %277 = tpu.matmul %276, %274, %cst_180 {dimension_numbers = #tpu.dot_dimension_numbers<[1], [0], [0], [1], [0, 0, 1, 1], [], []>} : vector<16x16xbf16>, vector<16x128xbf16>, vector<16x128xf32> -> vector<16x128xf32>
    %c7_181 = arith.constant 7 : index
    %c0_182 = arith.constant 0 : index
    %278 = vector.load %arg10[%c7_181, %c0_182] : memref<25x128xf32, #tpu.memory_space<vmem>>, vector<1x128xf32>
    %279 = vector.broadcast %278 : vector<1x128xf32> to vector<16x128xf32>
    %280 = arith.mulf %277, %279 : vector<16x128xf32>
    %281 = arith.addf %273, %280 : vector<16x128xf32>
    %282 = vector.extract_strided_slice %216 {offsets = [0, 121], sizes = [16, 128], strides = [1, 1]} : vector<16x256xbf16> to vector<16x128xbf16>
    %c8_183 = arith.constant 8 : index
    %c0_184 = arith.constant 0 : index
    %c0_185 = arith.constant 0 : index
    %283 = vector.load %arg6[%c8_183, %c0_184, %c0_185] : memref<25x16x16xbf16, #tpu.memory_space<vmem>>, vector<1x16x16xbf16>
    %284 = vector.shape_cast %283 : vector<1x16x16xbf16> to vector<16x16xbf16>
    %cst_186 = arith.constant dense<0.000000e+00> : vector<16x128xf32>
    %285 = tpu.matmul %284, %282, %cst_186 {dimension_numbers = #tpu.dot_dimension_numbers<[1], [0], [0], [1], [0, 0, 1, 1], [], []>} : vector<16x16xbf16>, vector<16x128xbf16>, vector<16x128xf32> -> vector<16x128xf32>
    %c8_187 = arith.constant 8 : index
    %c0_188 = arith.constant 0 : index
    %286 = vector.load %arg10[%c8_187, %c0_188] : memref<25x128xf32, #tpu.memory_space<vmem>>, vector<1x128xf32>
    %287 = vector.broadcast %286 : vector<1x128xf32> to vector<16x128xf32>
    %288 = arith.mulf %285, %287 : vector<16x128xf32>
    %289 = arith.addf %281, %288 : vector<16x128xf32>
    %290 = vector.extract_strided_slice %216 {offsets = [0, 122], sizes = [16, 128], strides = [1, 1]} : vector<16x256xbf16> to vector<16x128xbf16>
    %c9_189 = arith.constant 9 : index
    %c0_190 = arith.constant 0 : index
    %c0_191 = arith.constant 0 : index
    %291 = vector.load %arg6[%c9_189, %c0_190, %c0_191] : memref<25x16x16xbf16, #tpu.memory_space<vmem>>, vector<1x16x16xbf16>
    %292 = vector.shape_cast %291 : vector<1x16x16xbf16> to vector<16x16xbf16>
    %cst_192 = arith.constant dense<0.000000e+00> : vector<16x128xf32>
    %293 = tpu.matmul %292, %290, %cst_192 {dimension_numbers = #tpu.dot_dimension_numbers<[1], [0], [0], [1], [0, 0, 1, 1], [], []>} : vector<16x16xbf16>, vector<16x128xbf16>, vector<16x128xf32> -> vector<16x128xf32>
    %c9_193 = arith.constant 9 : index
    %c0_194 = arith.constant 0 : index
    %294 = vector.load %arg10[%c9_193, %c0_194] : memref<25x128xf32, #tpu.memory_space<vmem>>, vector<1x128xf32>
    %295 = vector.broadcast %294 : vector<1x128xf32> to vector<16x128xf32>
    %296 = arith.mulf %293, %295 : vector<16x128xf32>
    %297 = arith.addf %289, %296 : vector<16x128xf32>
    %298 = vector.extract_strided_slice %216 {offsets = [0, 126], sizes = [16, 128], strides = [1, 1]} : vector<16x256xbf16> to vector<16x128xbf16>
    %c10_195 = arith.constant 10 : index
    %c0_196 = arith.constant 0 : index
    %c0_197 = arith.constant 0 : index
    %299 = vector.load %arg6[%c10_195, %c0_196, %c0_197] : memref<25x16x16xbf16, #tpu.memory_space<vmem>>, vector<1x16x16xbf16>
    %300 = vector.shape_cast %299 : vector<1x16x16xbf16> to vector<16x16xbf16>
    %cst_198 = arith.constant dense<0.000000e+00> : vector<16x128xf32>
    %301 = tpu.matmul %300, %298, %cst_198 {dimension_numbers = #tpu.dot_dimension_numbers<[1], [0], [0], [1], [0, 0, 1, 1], [], []>} : vector<16x16xbf16>, vector<16x128xbf16>, vector<16x128xf32> -> vector<16x128xf32>
    %c10_199 = arith.constant 10 : index
    %c0_200 = arith.constant 0 : index
    %302 = vector.load %arg10[%c10_199, %c0_200] : memref<25x128xf32, #tpu.memory_space<vmem>>, vector<1x128xf32>
    %303 = vector.broadcast %302 : vector<1x128xf32> to vector<16x128xf32>
    %304 = arith.mulf %301, %303 : vector<16x128xf32>
    %305 = arith.addf %297, %304 : vector<16x128xf32>
    %306 = vector.extract_strided_slice %216 {offsets = [0, 127], sizes = [16, 128], strides = [1, 1]} : vector<16x256xbf16> to vector<16x128xbf16>
    %c11_201 = arith.constant 11 : index
    %c0_202 = arith.constant 0 : index
    %c0_203 = arith.constant 0 : index
    %307 = vector.load %arg6[%c11_201, %c0_202, %c0_203] : memref<25x16x16xbf16, #tpu.memory_space<vmem>>, vector<1x16x16xbf16>
    %308 = vector.shape_cast %307 : vector<1x16x16xbf16> to vector<16x16xbf16>
    %cst_204 = arith.constant dense<0.000000e+00> : vector<16x128xf32>
    %309 = tpu.matmul %308, %306, %cst_204 {dimension_numbers = #tpu.dot_dimension_numbers<[1], [0], [0], [1], [0, 0, 1, 1], [], []>} : vector<16x16xbf16>, vector<16x128xbf16>, vector<16x128xf32> -> vector<16x128xf32>
    %c11_205 = arith.constant 11 : index
    %c0_206 = arith.constant 0 : index
    %310 = vector.load %arg10[%c11_205, %c0_206] : memref<25x128xf32, #tpu.memory_space<vmem>>, vector<1x128xf32>
    %311 = vector.broadcast %310 : vector<1x128xf32> to vector<16x128xf32>
    %312 = arith.mulf %309, %311 : vector<16x128xf32>
    %313 = arith.addf %305, %312 : vector<16x128xf32>
    %314 = vector.extract_strided_slice %216 {offsets = [0, 0], sizes = [16, 128], strides = [1, 1]} : vector<16x256xbf16> to vector<16x128xbf16>
    %c12_207 = arith.constant 12 : index
    %c0_208 = arith.constant 0 : index
    %c0_209 = arith.constant 0 : index
    %315 = vector.load %arg6[%c12_207, %c0_208, %c0_209] : memref<25x16x16xbf16, #tpu.memory_space<vmem>>, vector<1x16x16xbf16>
    %316 = vector.shape_cast %315 : vector<1x16x16xbf16> to vector<16x16xbf16>
    %cst_210 = arith.constant dense<0.000000e+00> : vector<16x128xf32>
    %317 = tpu.matmul %316, %314, %cst_210 {dimension_numbers = #tpu.dot_dimension_numbers<[1], [0], [0], [1], [0, 0, 1, 1], [], []>} : vector<16x16xbf16>, vector<16x128xbf16>, vector<16x128xf32> -> vector<16x128xf32>
    %c12_211 = arith.constant 12 : index
    %c0_212 = arith.constant 0 : index
    %318 = vector.load %arg10[%c12_211, %c0_212] : memref<25x128xf32, #tpu.memory_space<vmem>>, vector<1x128xf32>
    %319 = vector.broadcast %318 : vector<1x128xf32> to vector<16x128xf32>
    %320 = arith.mulf %317, %319 : vector<16x128xf32>
    %321 = arith.addf %313, %320 : vector<16x128xf32>
    %322 = vector.extract_strided_slice %216 {offsets = [0, 1], sizes = [16, 128], strides = [1, 1]} : vector<16x256xbf16> to vector<16x128xbf16>
    %c13_213 = arith.constant 13 : index
    %c0_214 = arith.constant 0 : index
    %c0_215 = arith.constant 0 : index
    %323 = vector.load %arg6[%c13_213, %c0_214, %c0_215] : memref<25x16x16xbf16, #tpu.memory_space<vmem>>, vector<1x16x16xbf16>
    %324 = vector.shape_cast %323 : vector<1x16x16xbf16> to vector<16x16xbf16>
    %cst_216 = arith.constant dense<0.000000e+00> : vector<16x128xf32>
    %325 = tpu.matmul %324, %322, %cst_216 {dimension_numbers = #tpu.dot_dimension_numbers<[1], [0], [0], [1], [0, 0, 1, 1], [], []>} : vector<16x16xbf16>, vector<16x128xbf16>, vector<16x128xf32> -> vector<16x128xf32>
    %c13_217 = arith.constant 13 : index
    %c0_218 = arith.constant 0 : index
    %326 = vector.load %arg10[%c13_217, %c0_218] : memref<25x128xf32, #tpu.memory_space<vmem>>, vector<1x128xf32>
    %327 = vector.broadcast %326 : vector<1x128xf32> to vector<16x128xf32>
    %328 = arith.mulf %325, %327 : vector<16x128xf32>
    %329 = arith.addf %321, %328 : vector<16x128xf32>
    %330 = vector.extract_strided_slice %216 {offsets = [0, 2], sizes = [16, 128], strides = [1, 1]} : vector<16x256xbf16> to vector<16x128xbf16>
    %c14_219 = arith.constant 14 : index
    %c0_220 = arith.constant 0 : index
    %c0_221 = arith.constant 0 : index
    %331 = vector.load %arg6[%c14_219, %c0_220, %c0_221] : memref<25x16x16xbf16, #tpu.memory_space<vmem>>, vector<1x16x16xbf16>
    %332 = vector.shape_cast %331 : vector<1x16x16xbf16> to vector<16x16xbf16>
    %cst_222 = arith.constant dense<0.000000e+00> : vector<16x128xf32>
    %333 = tpu.matmul %332, %330, %cst_222 {dimension_numbers = #tpu.dot_dimension_numbers<[1], [0], [0], [1], [0, 0, 1, 1], [], []>} : vector<16x16xbf16>, vector<16x128xbf16>, vector<16x128xf32> -> vector<16x128xf32>
    %c14_223 = arith.constant 14 : index
    %c0_224 = arith.constant 0 : index
    %334 = vector.load %arg10[%c14_223, %c0_224] : memref<25x128xf32, #tpu.memory_space<vmem>>, vector<1x128xf32>
    %335 = vector.broadcast %334 : vector<1x128xf32> to vector<16x128xf32>
    %336 = arith.mulf %333, %335 : vector<16x128xf32>
    %337 = arith.addf %329, %336 : vector<16x128xf32>
    %338 = vector.extract_strided_slice %216 {offsets = [0, 6], sizes = [16, 128], strides = [1, 1]} : vector<16x256xbf16> to vector<16x128xbf16>
    %c15_225 = arith.constant 15 : index
    %c0_226 = arith.constant 0 : index
    %c0_227 = arith.constant 0 : index
    %339 = vector.load %arg6[%c15_225, %c0_226, %c0_227] : memref<25x16x16xbf16, #tpu.memory_space<vmem>>, vector<1x16x16xbf16>
    %340 = vector.shape_cast %339 : vector<1x16x16xbf16> to vector<16x16xbf16>
    %cst_228 = arith.constant dense<0.000000e+00> : vector<16x128xf32>
    %341 = tpu.matmul %340, %338, %cst_228 {dimension_numbers = #tpu.dot_dimension_numbers<[1], [0], [0], [1], [0, 0, 1, 1], [], []>} : vector<16x16xbf16>, vector<16x128xbf16>, vector<16x128xf32> -> vector<16x128xf32>
    %c15_229 = arith.constant 15 : index
    %c0_230 = arith.constant 0 : index
    %342 = vector.load %arg10[%c15_229, %c0_230] : memref<25x128xf32, #tpu.memory_space<vmem>>, vector<1x128xf32>
    %343 = vector.broadcast %342 : vector<1x128xf32> to vector<16x128xf32>
    %344 = arith.mulf %341, %343 : vector<16x128xf32>
    %345 = arith.addf %337, %344 : vector<16x128xf32>
    %346 = vector.extract_strided_slice %216 {offsets = [0, 7], sizes = [16, 128], strides = [1, 1]} : vector<16x256xbf16> to vector<16x128xbf16>
    %c16_231 = arith.constant 16 : index
    %c0_232 = arith.constant 0 : index
    %c0_233 = arith.constant 0 : index
    %347 = vector.load %arg6[%c16_231, %c0_232, %c0_233] : memref<25x16x16xbf16, #tpu.memory_space<vmem>>, vector<1x16x16xbf16>
    %348 = vector.shape_cast %347 : vector<1x16x16xbf16> to vector<16x16xbf16>
    %cst_234 = arith.constant dense<0.000000e+00> : vector<16x128xf32>
    %349 = tpu.matmul %348, %346, %cst_234 {dimension_numbers = #tpu.dot_dimension_numbers<[1], [0], [0], [1], [0, 0, 1, 1], [], []>} : vector<16x16xbf16>, vector<16x128xbf16>, vector<16x128xf32> -> vector<16x128xf32>
    %c16_235 = arith.constant 16 : index
    %c0_236 = arith.constant 0 : index
    %350 = vector.load %arg10[%c16_235, %c0_236] : memref<25x128xf32, #tpu.memory_space<vmem>>, vector<1x128xf32>
    %351 = vector.broadcast %350 : vector<1x128xf32> to vector<16x128xf32>
    %352 = arith.mulf %349, %351 : vector<16x128xf32>
    %353 = arith.addf %345, %352 : vector<16x128xf32>
    %354 = vector.extract_strided_slice %216 {offsets = [0, 8], sizes = [16, 128], strides = [1, 1]} : vector<16x256xbf16> to vector<16x128xbf16>
    %c17_237 = arith.constant 17 : index
    %c0_238 = arith.constant 0 : index
    %c0_239 = arith.constant 0 : index
    %355 = vector.load %arg6[%c17_237, %c0_238, %c0_239] : memref<25x16x16xbf16, #tpu.memory_space<vmem>>, vector<1x16x16xbf16>
    %356 = vector.shape_cast %355 : vector<1x16x16xbf16> to vector<16x16xbf16>
    %cst_240 = arith.constant dense<0.000000e+00> : vector<16x128xf32>
    %357 = tpu.matmul %356, %354, %cst_240 {dimension_numbers = #tpu.dot_dimension_numbers<[1], [0], [0], [1], [0, 0, 1, 1], [], []>} : vector<16x16xbf16>, vector<16x128xbf16>, vector<16x128xf32> -> vector<16x128xf32>
    %c17_241 = arith.constant 17 : index
    %c0_242 = arith.constant 0 : index
    %358 = vector.load %arg10[%c17_241, %c0_242] : memref<25x128xf32, #tpu.memory_space<vmem>>, vector<1x128xf32>
    %359 = vector.broadcast %358 : vector<1x128xf32> to vector<16x128xf32>
    %360 = arith.mulf %357, %359 : vector<16x128xf32>
    %361 = arith.addf %353, %360 : vector<16x128xf32>
    %362 = vector.extract_strided_slice %216 {offsets = [0, 9], sizes = [16, 128], strides = [1, 1]} : vector<16x256xbf16> to vector<16x128xbf16>
    %c18_243 = arith.constant 18 : index
    %c0_244 = arith.constant 0 : index
    %c0_245 = arith.constant 0 : index
    %363 = vector.load %arg6[%c18_243, %c0_244, %c0_245] : memref<25x16x16xbf16, #tpu.memory_space<vmem>>, vector<1x16x16xbf16>
    %364 = vector.shape_cast %363 : vector<1x16x16xbf16> to vector<16x16xbf16>
    %cst_246 = arith.constant dense<0.000000e+00> : vector<16x128xf32>
    %365 = tpu.matmul %364, %362, %cst_246 {dimension_numbers = #tpu.dot_dimension_numbers<[1], [0], [0], [1], [0, 0, 1, 1], [], []>} : vector<16x16xbf16>, vector<16x128xbf16>, vector<16x128xf32> -> vector<16x128xf32>
    %c18_247 = arith.constant 18 : index
    %c0_248 = arith.constant 0 : index
    %366 = vector.load %arg10[%c18_247, %c0_248] : memref<25x128xf32, #tpu.memory_space<vmem>>, vector<1x128xf32>
    %367 = vector.broadcast %366 : vector<1x128xf32> to vector<16x128xf32>
    %368 = arith.mulf %365, %367 : vector<16x128xf32>
    %369 = arith.addf %361, %368 : vector<16x128xf32>
    %370 = vector.extract_strided_slice %216 {offsets = [0, 10], sizes = [16, 128], strides = [1, 1]} : vector<16x256xbf16> to vector<16x128xbf16>
    %c19_249 = arith.constant 19 : index
    %c0_250 = arith.constant 0 : index
    %c0_251 = arith.constant 0 : index
    %371 = vector.load %arg6[%c19_249, %c0_250, %c0_251] : memref<25x16x16xbf16, #tpu.memory_space<vmem>>, vector<1x16x16xbf16>
    %372 = vector.shape_cast %371 : vector<1x16x16xbf16> to vector<16x16xbf16>
    %cst_252 = arith.constant dense<0.000000e+00> : vector<16x128xf32>
    %373 = tpu.matmul %372, %370, %cst_252 {dimension_numbers = #tpu.dot_dimension_numbers<[1], [0], [0], [1], [0, 0, 1, 1], [], []>} : vector<16x16xbf16>, vector<16x128xbf16>, vector<16x128xf32> -> vector<16x128xf32>
    %c19_253 = arith.constant 19 : index
    %c0_254 = arith.constant 0 : index
    %374 = vector.load %arg10[%c19_253, %c0_254] : memref<25x128xf32, #tpu.memory_space<vmem>>, vector<1x128xf32>
    %375 = vector.broadcast %374 : vector<1x128xf32> to vector<16x128xf32>
    %376 = arith.mulf %373, %375 : vector<16x128xf32>
    %377 = arith.addf %369, %376 : vector<16x128xf32>
    %378 = vector.extract_strided_slice %216 {offsets = [0, 14], sizes = [16, 128], strides = [1, 1]} : vector<16x256xbf16> to vector<16x128xbf16>
    %c20_255 = arith.constant 20 : index
    %c0_256 = arith.constant 0 : index
    %c0_257 = arith.constant 0 : index
    %379 = vector.load %arg6[%c20_255, %c0_256, %c0_257] : memref<25x16x16xbf16, #tpu.memory_space<vmem>>, vector<1x16x16xbf16>
    %380 = vector.shape_cast %379 : vector<1x16x16xbf16> to vector<16x16xbf16>
    %cst_258 = arith.constant dense<0.000000e+00> : vector<16x128xf32>
    %381 = tpu.matmul %380, %378, %cst_258 {dimension_numbers = #tpu.dot_dimension_numbers<[1], [0], [0], [1], [0, 0, 1, 1], [], []>} : vector<16x16xbf16>, vector<16x128xbf16>, vector<16x128xf32> -> vector<16x128xf32>
    %c20_259 = arith.constant 20 : index
    %c0_260 = arith.constant 0 : index
    %382 = vector.load %arg10[%c20_259, %c0_260] : memref<25x128xf32, #tpu.memory_space<vmem>>, vector<1x128xf32>
    %383 = vector.broadcast %382 : vector<1x128xf32> to vector<16x128xf32>
    %384 = arith.mulf %381, %383 : vector<16x128xf32>
    %385 = arith.addf %377, %384 : vector<16x128xf32>
    %386 = vector.extract_strided_slice %216 {offsets = [0, 15], sizes = [16, 128], strides = [1, 1]} : vector<16x256xbf16> to vector<16x128xbf16>
    %c21_261 = arith.constant 21 : index
    %c0_262 = arith.constant 0 : index
    %c0_263 = arith.constant 0 : index
    %387 = vector.load %arg6[%c21_261, %c0_262, %c0_263] : memref<25x16x16xbf16, #tpu.memory_space<vmem>>, vector<1x16x16xbf16>
    %388 = vector.shape_cast %387 : vector<1x16x16xbf16> to vector<16x16xbf16>
    %cst_264 = arith.constant dense<0.000000e+00> : vector<16x128xf32>
    %389 = tpu.matmul %388, %386, %cst_264 {dimension_numbers = #tpu.dot_dimension_numbers<[1], [0], [0], [1], [0, 0, 1, 1], [], []>} : vector<16x16xbf16>, vector<16x128xbf16>, vector<16x128xf32> -> vector<16x128xf32>
    %c21_265 = arith.constant 21 : index
    %c0_266 = arith.constant 0 : index
    %390 = vector.load %arg10[%c21_265, %c0_266] : memref<25x128xf32, #tpu.memory_space<vmem>>, vector<1x128xf32>
    %391 = vector.broadcast %390 : vector<1x128xf32> to vector<16x128xf32>
    %392 = arith.mulf %389, %391 : vector<16x128xf32>
    %393 = arith.addf %385, %392 : vector<16x128xf32>
    %394 = vector.extract_strided_slice %216 {offsets = [0, 16], sizes = [16, 128], strides = [1, 1]} : vector<16x256xbf16> to vector<16x128xbf16>
    %c22_267 = arith.constant 22 : index
    %c0_268 = arith.constant 0 : index
    %c0_269 = arith.constant 0 : index
    %395 = vector.load %arg6[%c22_267, %c0_268, %c0_269] : memref<25x16x16xbf16, #tpu.memory_space<vmem>>, vector<1x16x16xbf16>
    %396 = vector.shape_cast %395 : vector<1x16x16xbf16> to vector<16x16xbf16>
    %cst_270 = arith.constant dense<0.000000e+00> : vector<16x128xf32>
    %397 = tpu.matmul %396, %394, %cst_270 {dimension_numbers = #tpu.dot_dimension_numbers<[1], [0], [0], [1], [0, 0, 1, 1], [], []>} : vector<16x16xbf16>, vector<16x128xbf16>, vector<16x128xf32> -> vector<16x128xf32>
    %c22_271 = arith.constant 22 : index
    %c0_272 = arith.constant 0 : index
    %398 = vector.load %arg10[%c22_271, %c0_272] : memref<25x128xf32, #tpu.memory_space<vmem>>, vector<1x128xf32>
    %399 = vector.broadcast %398 : vector<1x128xf32> to vector<16x128xf32>
    %400 = arith.mulf %397, %399 : vector<16x128xf32>
    %401 = arith.addf %393, %400 : vector<16x128xf32>
    %402 = vector.extract_strided_slice %216 {offsets = [0, 17], sizes = [16, 128], strides = [1, 1]} : vector<16x256xbf16> to vector<16x128xbf16>
    %c23_273 = arith.constant 23 : index
    %c0_274 = arith.constant 0 : index
    %c0_275 = arith.constant 0 : index
    %403 = vector.load %arg6[%c23_273, %c0_274, %c0_275] : memref<25x16x16xbf16, #tpu.memory_space<vmem>>, vector<1x16x16xbf16>
    %404 = vector.shape_cast %403 : vector<1x16x16xbf16> to vector<16x16xbf16>
    %cst_276 = arith.constant dense<0.000000e+00> : vector<16x128xf32>
    %405 = tpu.matmul %404, %402, %cst_276 {dimension_numbers = #tpu.dot_dimension_numbers<[1], [0], [0], [1], [0, 0, 1, 1], [], []>} : vector<16x16xbf16>, vector<16x128xbf16>, vector<16x128xf32> -> vector<16x128xf32>
    %c23_277 = arith.constant 23 : index
    %c0_278 = arith.constant 0 : index
    %406 = vector.load %arg10[%c23_277, %c0_278] : memref<25x128xf32, #tpu.memory_space<vmem>>, vector<1x128xf32>
    %407 = vector.broadcast %406 : vector<1x128xf32> to vector<16x128xf32>
    %408 = arith.mulf %405, %407 : vector<16x128xf32>
    %409 = arith.addf %401, %408 : vector<16x128xf32>
    %410 = vector.extract_strided_slice %216 {offsets = [0, 18], sizes = [16, 128], strides = [1, 1]} : vector<16x256xbf16> to vector<16x128xbf16>
    %c24_279 = arith.constant 24 : index
    %c0_280 = arith.constant 0 : index
    %c0_281 = arith.constant 0 : index
    %411 = vector.load %arg6[%c24_279, %c0_280, %c0_281] : memref<25x16x16xbf16, #tpu.memory_space<vmem>>, vector<1x16x16xbf16>
    %412 = vector.shape_cast %411 : vector<1x16x16xbf16> to vector<16x16xbf16>
    %cst_282 = arith.constant dense<0.000000e+00> : vector<16x128xf32>
    %413 = tpu.matmul %412, %410, %cst_282 {dimension_numbers = #tpu.dot_dimension_numbers<[1], [0], [0], [1], [0, 0, 1, 1], [], []>} : vector<16x16xbf16>, vector<16x128xbf16>, vector<16x128xf32> -> vector<16x128xf32>
    %c24_283 = arith.constant 24 : index
    %c0_284 = arith.constant 0 : index
    %414 = vector.load %arg10[%c24_283, %c0_284] : memref<25x128xf32, #tpu.memory_space<vmem>>, vector<1x128xf32>
    %415 = vector.broadcast %414 : vector<1x128xf32> to vector<16x128xf32>
    %416 = arith.mulf %413, %415 : vector<16x128xf32>
    %417 = arith.addf %409, %416 : vector<16x128xf32>
    %c0_285 = arith.constant 0 : index
    %c0_286 = arith.constant 0 : index
    %418 = vector.load %arg7[%c0_285, %c0_286] : memref<16x1xf32, #tpu.memory_space<vmem>>, vector<16x1xf32>
    %419 = vector.broadcast %418 : vector<16x1xf32> to vector<16x128xf32>
    %420 = arith.addf %417, %419 : vector<16x128xf32>
    %cst_287 = arith.constant 0.000000e+00 : f32
    %421 = vector.broadcast %cst_287 : f32 to vector<16x128xf32>
    %422 = arith.cmpf ogt, %420, %421 : vector<16x128xf32>
    %cst_288 = arith.constant 0.00999999977 : f32
    %423 = vector.broadcast %cst_288 : f32 to vector<16x128xf32>
    %424 = arith.mulf %423, %420 : vector<16x128xf32>
    %425 = arith.select %422, %420, %424 : vector<16x128xi1>, vector<16x128xf32>
    %c0_289 = arith.constant 0 : index
    %c0_290 = arith.constant 0 : index
    %426 = vector.load %arg8[%c0_289, %c0_290] : memref<16x1xf32, #tpu.memory_space<vmem>>, vector<16x1xf32>
    %c0_291 = arith.constant 0 : index
    %c0_292 = arith.constant 0 : index
    %427 = vector.load %arg9[%c0_291, %c0_292] : memref<16x1xf32, #tpu.memory_space<vmem>>, vector<16x1xf32>
    %cst_293 = arith.constant dense<0.000000e+00> : vector<16xf32>
    %428 = vector.multi_reduction <add>, %425, %cst_293 [1] : vector<16x128xf32> to vector<16xf32>
    %429 = vector.shape_cast %428 : vector<16xf32> to vector<16x1xf32>
    %cst_294 = arith.constant 1.280000e+02 : f32
    %430 = vector.broadcast %cst_294 : f32 to vector<16x1xf32>
    %431 = arith.divf %429, %430 : vector<16x1xf32>
    %432 = vector.broadcast %431 : vector<16x1xf32> to vector<16x128xf32>
    %433 = arith.subf %425, %432 : vector<16x128xf32>
    %434 = arith.mulf %433, %433 : vector<16x128xf32>
    %cst_295 = arith.constant dense<0.000000e+00> : vector<16xf32>
    %435 = vector.multi_reduction <add>, %434, %cst_295 [1] : vector<16x128xf32> to vector<16xf32>
    %436 = vector.shape_cast %435 : vector<16xf32> to vector<16x1xf32>
    %cst_296 = arith.constant 1.280000e+02 : f32
    %437 = vector.broadcast %cst_296 : f32 to vector<16x1xf32>
    %438 = arith.divf %436, %437 : vector<16x1xf32>
    %439 = vector.broadcast %431 : vector<16x1xf32> to vector<16x128xf32>
    %440 = arith.subf %425, %439 : vector<16x128xf32>
    %cst_297 = arith.constant 9.99999974E-6 : f32
    %441 = vector.broadcast %cst_297 : f32 to vector<16x1xf32>
    %442 = arith.addf %438, %441 : vector<16x1xf32>
    %443 = math.rsqrt %442 : vector<16x1xf32>
    %444 = vector.broadcast %443 : vector<16x1xf32> to vector<16x128xf32>
    %445 = arith.mulf %440, %444 : vector<16x128xf32>
    %446 = vector.broadcast %426 : vector<16x1xf32> to vector<16x128xf32>
    %447 = arith.mulf %445, %446 : vector<16x128xf32>
    %448 = vector.broadcast %427 : vector<16x1xf32> to vector<16x128xf32>
    %449 = arith.addf %447, %448 : vector<16x128xf32>
    %450 = tpu.concatenate %449, %449 in 1 : vector<16x128xf32>, vector<16x128xf32> -> vector<16x256xf32>
    %451 = arith.truncf %450 : vector<16x256xf32> to vector<16x256xbf16>
    %cst_298 = arith.constant 0.000000e+00 : f32
    %452 = vector.broadcast %cst_298 : f32 to vector<16x128xf32>
    %453 = vector.extract_strided_slice %451 {offsets = [0, 119], sizes = [16, 128], strides = [1, 1]} : vector<16x256xbf16> to vector<16x128xbf16>
    %c0_299 = arith.constant 0 : index
    %c0_300 = arith.constant 0 : index
    %c0_301 = arith.constant 0 : index
    %454 = vector.load %arg11[%c0_299, %c0_300, %c0_301] : memref<9x16x16xbf16, #tpu.memory_space<vmem>>, vector<1x16x16xbf16>
    %455 = vector.shape_cast %454 : vector<1x16x16xbf16> to vector<16x16xbf16>
    %cst_302 = arith.constant dense<0.000000e+00> : vector<16x128xf32>
    %456 = tpu.matmul %455, %453, %cst_302 {dimension_numbers = #tpu.dot_dimension_numbers<[1], [0], [0], [1], [0, 0, 1, 1], [], []>} : vector<16x16xbf16>, vector<16x128xbf16>, vector<16x128xf32> -> vector<16x128xf32>
    %c0_303 = arith.constant 0 : index
    %c0_304 = arith.constant 0 : index
    %457 = vector.load %arg15[%c0_303, %c0_304] : memref<9x128xf32, #tpu.memory_space<vmem>>, vector<1x128xf32>
    %458 = vector.broadcast %457 : vector<1x128xf32> to vector<16x128xf32>
    %459 = arith.mulf %456, %458 : vector<16x128xf32>
    %460 = arith.addf %452, %459 : vector<16x128xf32>
    %461 = vector.extract_strided_slice %451 {offsets = [0, 120], sizes = [16, 128], strides = [1, 1]} : vector<16x256xbf16> to vector<16x128xbf16>
    %c1_305 = arith.constant 1 : index
    %c0_306 = arith.constant 0 : index
    %c0_307 = arith.constant 0 : index
    %462 = vector.load %arg11[%c1_305, %c0_306, %c0_307] : memref<9x16x16xbf16, #tpu.memory_space<vmem>>, vector<1x16x16xbf16>
    %463 = vector.shape_cast %462 : vector<1x16x16xbf16> to vector<16x16xbf16>
    %cst_308 = arith.constant dense<0.000000e+00> : vector<16x128xf32>
    %464 = tpu.matmul %463, %461, %cst_308 {dimension_numbers = #tpu.dot_dimension_numbers<[1], [0], [0], [1], [0, 0, 1, 1], [], []>} : vector<16x16xbf16>, vector<16x128xbf16>, vector<16x128xf32> -> vector<16x128xf32>
    %c1_309 = arith.constant 1 : index
    %c0_310 = arith.constant 0 : index
    %465 = vector.load %arg15[%c1_309, %c0_310] : memref<9x128xf32, #tpu.memory_space<vmem>>, vector<1x128xf32>
    %466 = vector.broadcast %465 : vector<1x128xf32> to vector<16x128xf32>
    %467 = arith.mulf %464, %466 : vector<16x128xf32>
    %468 = arith.addf %460, %467 : vector<16x128xf32>
    %469 = vector.extract_strided_slice %451 {offsets = [0, 121], sizes = [16, 128], strides = [1, 1]} : vector<16x256xbf16> to vector<16x128xbf16>
    %c2_311 = arith.constant 2 : index
    %c0_312 = arith.constant 0 : index
    %c0_313 = arith.constant 0 : index
    %470 = vector.load %arg11[%c2_311, %c0_312, %c0_313] : memref<9x16x16xbf16, #tpu.memory_space<vmem>>, vector<1x16x16xbf16>
    %471 = vector.shape_cast %470 : vector<1x16x16xbf16> to vector<16x16xbf16>
    %cst_314 = arith.constant dense<0.000000e+00> : vector<16x128xf32>
    %472 = tpu.matmul %471, %469, %cst_314 {dimension_numbers = #tpu.dot_dimension_numbers<[1], [0], [0], [1], [0, 0, 1, 1], [], []>} : vector<16x16xbf16>, vector<16x128xbf16>, vector<16x128xf32> -> vector<16x128xf32>
    %c2_315 = arith.constant 2 : index
    %c0_316 = arith.constant 0 : index
    %473 = vector.load %arg15[%c2_315, %c0_316] : memref<9x128xf32, #tpu.memory_space<vmem>>, vector<1x128xf32>
    %474 = vector.broadcast %473 : vector<1x128xf32> to vector<16x128xf32>
    %475 = arith.mulf %472, %474 : vector<16x128xf32>
    %476 = arith.addf %468, %475 : vector<16x128xf32>
    %477 = vector.extract_strided_slice %451 {offsets = [0, 127], sizes = [16, 128], strides = [1, 1]} : vector<16x256xbf16> to vector<16x128xbf16>
    %c3_317 = arith.constant 3 : index
    %c0_318 = arith.constant 0 : index
    %c0_319 = arith.constant 0 : index
    %478 = vector.load %arg11[%c3_317, %c0_318, %c0_319] : memref<9x16x16xbf16, #tpu.memory_space<vmem>>, vector<1x16x16xbf16>
    %479 = vector.shape_cast %478 : vector<1x16x16xbf16> to vector<16x16xbf16>
    %cst_320 = arith.constant dense<0.000000e+00> : vector<16x128xf32>
    %480 = tpu.matmul %479, %477, %cst_320 {dimension_numbers = #tpu.dot_dimension_numbers<[1], [0], [0], [1], [0, 0, 1, 1], [], []>} : vector<16x16xbf16>, vector<16x128xbf16>, vector<16x128xf32> -> vector<16x128xf32>
    %c3_321 = arith.constant 3 : index
    %c0_322 = arith.constant 0 : index
    %481 = vector.load %arg15[%c3_321, %c0_322] : memref<9x128xf32, #tpu.memory_space<vmem>>, vector<1x128xf32>
    %482 = vector.broadcast %481 : vector<1x128xf32> to vector<16x128xf32>
    %483 = arith.mulf %480, %482 : vector<16x128xf32>
    %484 = arith.addf %476, %483 : vector<16x128xf32>
    %485 = vector.extract_strided_slice %451 {offsets = [0, 0], sizes = [16, 128], strides = [1, 1]} : vector<16x256xbf16> to vector<16x128xbf16>
    %c4_323 = arith.constant 4 : index
    %c0_324 = arith.constant 0 : index
    %c0_325 = arith.constant 0 : index
    %486 = vector.load %arg11[%c4_323, %c0_324, %c0_325] : memref<9x16x16xbf16, #tpu.memory_space<vmem>>, vector<1x16x16xbf16>
    %487 = vector.shape_cast %486 : vector<1x16x16xbf16> to vector<16x16xbf16>
    %cst_326 = arith.constant dense<0.000000e+00> : vector<16x128xf32>
    %488 = tpu.matmul %487, %485, %cst_326 {dimension_numbers = #tpu.dot_dimension_numbers<[1], [0], [0], [1], [0, 0, 1, 1], [], []>} : vector<16x16xbf16>, vector<16x128xbf16>, vector<16x128xf32> -> vector<16x128xf32>
    %c4_327 = arith.constant 4 : index
    %c0_328 = arith.constant 0 : index
    %489 = vector.load %arg15[%c4_327, %c0_328] : memref<9x128xf32, #tpu.memory_space<vmem>>, vector<1x128xf32>
    %490 = vector.broadcast %489 : vector<1x128xf32> to vector<16x128xf32>
    %491 = arith.mulf %488, %490 : vector<16x128xf32>
    %492 = arith.addf %484, %491 : vector<16x128xf32>
    %493 = vector.extract_strided_slice %451 {offsets = [0, 1], sizes = [16, 128], strides = [1, 1]} : vector<16x256xbf16> to vector<16x128xbf16>
    %c5_329 = arith.constant 5 : index
    %c0_330 = arith.constant 0 : index
    %c0_331 = arith.constant 0 : index
    %494 = vector.load %arg11[%c5_329, %c0_330, %c0_331] : memref<9x16x16xbf16, #tpu.memory_space<vmem>>, vector<1x16x16xbf16>
    %495 = vector.shape_cast %494 : vector<1x16x16xbf16> to vector<16x16xbf16>
    %cst_332 = arith.constant dense<0.000000e+00> : vector<16x128xf32>
    %496 = tpu.matmul %495, %493, %cst_332 {dimension_numbers = #tpu.dot_dimension_numbers<[1], [0], [0], [1], [0, 0, 1, 1], [], []>} : vector<16x16xbf16>, vector<16x128xbf16>, vector<16x128xf32> -> vector<16x128xf32>
    %c5_333 = arith.constant 5 : index
    %c0_334 = arith.constant 0 : index
    %497 = vector.load %arg15[%c5_333, %c0_334] : memref<9x128xf32, #tpu.memory_space<vmem>>, vector<1x128xf32>
    %498 = vector.broadcast %497 : vector<1x128xf32> to vector<16x128xf32>
    %499 = arith.mulf %496, %498 : vector<16x128xf32>
    %500 = arith.addf %492, %499 : vector<16x128xf32>
    %501 = vector.extract_strided_slice %451 {offsets = [0, 7], sizes = [16, 128], strides = [1, 1]} : vector<16x256xbf16> to vector<16x128xbf16>
    %c6_335 = arith.constant 6 : index
    %c0_336 = arith.constant 0 : index
    %c0_337 = arith.constant 0 : index
    %502 = vector.load %arg11[%c6_335, %c0_336, %c0_337] : memref<9x16x16xbf16, #tpu.memory_space<vmem>>, vector<1x16x16xbf16>
    %503 = vector.shape_cast %502 : vector<1x16x16xbf16> to vector<16x16xbf16>
    %cst_338 = arith.constant dense<0.000000e+00> : vector<16x128xf32>
    %504 = tpu.matmul %503, %501, %cst_338 {dimension_numbers = #tpu.dot_dimension_numbers<[1], [0], [0], [1], [0, 0, 1, 1], [], []>} : vector<16x16xbf16>, vector<16x128xbf16>, vector<16x128xf32> -> vector<16x128xf32>
    %c6_339 = arith.constant 6 : index
    %c0_340 = arith.constant 0 : index
    %505 = vector.load %arg15[%c6_339, %c0_340] : memref<9x128xf32, #tpu.memory_space<vmem>>, vector<1x128xf32>
    %506 = vector.broadcast %505 : vector<1x128xf32> to vector<16x128xf32>
    %507 = arith.mulf %504, %506 : vector<16x128xf32>
    %508 = arith.addf %500, %507 : vector<16x128xf32>
    %509 = vector.extract_strided_slice %451 {offsets = [0, 8], sizes = [16, 128], strides = [1, 1]} : vector<16x256xbf16> to vector<16x128xbf16>
    %c7_341 = arith.constant 7 : index
    %c0_342 = arith.constant 0 : index
    %c0_343 = arith.constant 0 : index
    %510 = vector.load %arg11[%c7_341, %c0_342, %c0_343] : memref<9x16x16xbf16, #tpu.memory_space<vmem>>, vector<1x16x16xbf16>
    %511 = vector.shape_cast %510 : vector<1x16x16xbf16> to vector<16x16xbf16>
    %cst_344 = arith.constant dense<0.000000e+00> : vector<16x128xf32>
    %512 = tpu.matmul %511, %509, %cst_344 {dimension_numbers = #tpu.dot_dimension_numbers<[1], [0], [0], [1], [0, 0, 1, 1], [], []>} : vector<16x16xbf16>, vector<16x128xbf16>, vector<16x128xf32> -> vector<16x128xf32>
    %c7_345 = arith.constant 7 : index
    %c0_346 = arith.constant 0 : index
    %513 = vector.load %arg15[%c7_345, %c0_346] : memref<9x128xf32, #tpu.memory_space<vmem>>, vector<1x128xf32>
    %514 = vector.broadcast %513 : vector<1x128xf32> to vector<16x128xf32>
    %515 = arith.mulf %512, %514 : vector<16x128xf32>
    %516 = arith.addf %508, %515 : vector<16x128xf32>
    %517 = vector.extract_strided_slice %451 {offsets = [0, 9], sizes = [16, 128], strides = [1, 1]} : vector<16x256xbf16> to vector<16x128xbf16>
    %c8_347 = arith.constant 8 : index
    %c0_348 = arith.constant 0 : index
    %c0_349 = arith.constant 0 : index
    %518 = vector.load %arg11[%c8_347, %c0_348, %c0_349] : memref<9x16x16xbf16, #tpu.memory_space<vmem>>, vector<1x16x16xbf16>
    %519 = vector.shape_cast %518 : vector<1x16x16xbf16> to vector<16x16xbf16>
    %cst_350 = arith.constant dense<0.000000e+00> : vector<16x128xf32>
    %520 = tpu.matmul %519, %517, %cst_350 {dimension_numbers = #tpu.dot_dimension_numbers<[1], [0], [0], [1], [0, 0, 1, 1], [], []>} : vector<16x16xbf16>, vector<16x128xbf16>, vector<16x128xf32> -> vector<16x128xf32>
    %c8_351 = arith.constant 8 : index
    %c0_352 = arith.constant 0 : index
    %521 = vector.load %arg15[%c8_351, %c0_352] : memref<9x128xf32, #tpu.memory_space<vmem>>, vector<1x128xf32>
    %522 = vector.broadcast %521 : vector<1x128xf32> to vector<16x128xf32>
    %523 = arith.mulf %520, %522 : vector<16x128xf32>
    %524 = arith.addf %516, %523 : vector<16x128xf32>
    %525 = arith.truncf %524 : vector<16x128xf32> to vector<16x128xbf16>
    %c0_353 = arith.constant 0 : index
    %c0_354 = arith.constant 0 : index
    %526 = vector.load %arg16[%c0_353, %c0_354] : memref<128x128xbf16, #tpu.memory_space<vmem>>, vector<128x128xbf16>
    %cst_355 = arith.constant dense<0.000000e+00> : vector<16x128xf32>
    %527 = tpu.matmul %525, %526, %cst_355 {dimension_numbers = #tpu.dot_dimension_numbers<[1], [0], [0], [1], [0, 0, 1, 1], [], []>} : vector<16x128xbf16>, vector<128x128xbf16>, vector<16x128xf32> -> vector<16x128xf32>
    %c0_356 = arith.constant 0 : index
    %c0_357 = arith.constant 0 : index
    %528 = vector.load %arg12[%c0_356, %c0_357] : memref<16x1xf32, #tpu.memory_space<vmem>>, vector<16x1xf32>
    %529 = vector.broadcast %528 : vector<16x1xf32> to vector<16x128xf32>
    %530 = arith.addf %527, %529 : vector<16x128xf32>
    %cst_358 = arith.constant 0.000000e+00 : f32
    %531 = vector.broadcast %cst_358 : f32 to vector<16x128xf32>
    %532 = arith.cmpf ogt, %530, %531 : vector<16x128xf32>
    %cst_359 = arith.constant 0.00999999977 : f32
    %533 = vector.broadcast %cst_359 : f32 to vector<16x128xf32>
    %534 = arith.mulf %533, %530 : vector<16x128xf32>
    %535 = arith.select %532, %530, %534 : vector<16x128xi1>, vector<16x128xf32>
    %c0_360 = arith.constant 0 : index
    %c0_361 = arith.constant 0 : index
    %536 = vector.load %arg13[%c0_360, %c0_361] : memref<16x1xf32, #tpu.memory_space<vmem>>, vector<16x1xf32>
    %c0_362 = arith.constant 0 : index
    %c0_363 = arith.constant 0 : index
    %537 = vector.load %arg14[%c0_362, %c0_363] : memref<16x1xf32, #tpu.memory_space<vmem>>, vector<16x1xf32>
    %538 = tpu.iota {dimensions = array<i32: 1>} : vector<1x128xi32>
    %c32_i32 = arith.constant 32 : i32
    %539 = vector.broadcast %c32_i32 : i32 to vector<1x128xi32>
    %540 = arith.cmpi slt, %538, %539 : vector<1x128xi32>
    %541 = arith.extui %540 : vector<1x128xi1> to vector<1x128xi32>
    %542 = arith.sitofp %541 : vector<1x128xi32> to vector<1x128xf32>
    %543 = vector.broadcast %542 : vector<1x128xf32> to vector<16x128xf32>
    %544 = arith.mulf %535, %543 : vector<16x128xf32>
    %cst_364 = arith.constant dense<0.000000e+00> : vector<16xf32>
    %545 = vector.multi_reduction <add>, %544, %cst_364 [1] : vector<16x128xf32> to vector<16xf32>
    %546 = vector.shape_cast %545 : vector<16xf32> to vector<16x1xf32>
    %cst_365 = arith.constant 3.200000e+01 : f32
    %547 = vector.broadcast %cst_365 : f32 to vector<16x1xf32>
    %548 = arith.divf %546, %547 : vector<16x1xf32>
    %549 = vector.broadcast %548 : vector<16x1xf32> to vector<16x128xf32>
    %550 = arith.subf %535, %549 : vector<16x128xf32>
    %551 = vector.broadcast %542 : vector<1x128xf32> to vector<16x128xf32>
    %552 = arith.mulf %550, %551 : vector<16x128xf32>
    %553 = arith.mulf %552, %552 : vector<16x128xf32>
    %cst_366 = arith.constant dense<0.000000e+00> : vector<16xf32>
    %554 = vector.multi_reduction <add>, %553, %cst_366 [1] : vector<16x128xf32> to vector<16xf32>
    %555 = vector.shape_cast %554 : vector<16xf32> to vector<16x1xf32>
    %cst_367 = arith.constant 3.200000e+01 : f32
    %556 = vector.broadcast %cst_367 : f32 to vector<16x1xf32>
    %557 = arith.divf %555, %556 : vector<16x1xf32>
    %558 = vector.broadcast %548 : vector<16x1xf32> to vector<16x128xf32>
    %559 = arith.subf %535, %558 : vector<16x128xf32>
    %cst_368 = arith.constant 9.99999974E-6 : f32
    %560 = vector.broadcast %cst_368 : f32 to vector<16x1xf32>
    %561 = arith.addf %557, %560 : vector<16x1xf32>
    %562 = math.rsqrt %561 : vector<16x1xf32>
    %563 = vector.broadcast %562 : vector<16x1xf32> to vector<16x128xf32>
    %564 = arith.mulf %559, %563 : vector<16x128xf32>
    %565 = vector.broadcast %536 : vector<16x1xf32> to vector<16x128xf32>
    %566 = arith.mulf %564, %565 : vector<16x128xf32>
    %567 = vector.broadcast %537 : vector<16x1xf32> to vector<16x128xf32>
    %568 = arith.addf %566, %567 : vector<16x128xf32>
    %569 = tpu.concatenate %568, %568 in 1 : vector<16x128xf32>, vector<16x128xf32> -> vector<16x256xf32>
    %570 = arith.truncf %569 : vector<16x256xf32> to vector<16x256xbf16>
    %cst_369 = arith.constant 0.000000e+00 : f32
    %571 = vector.broadcast %cst_369 : f32 to vector<16x128xf32>
    %572 = vector.extract_strided_slice %570 {offsets = [0, 123], sizes = [16, 128], strides = [1, 1]} : vector<16x256xbf16> to vector<16x128xbf16>
    %c0_370 = arith.constant 0 : index
    %c0_371 = arith.constant 0 : index
    %c0_372 = arith.constant 0 : index
    %573 = vector.load %arg17[%c0_370, %c0_371, %c0_372] : memref<9x16x16xbf16, #tpu.memory_space<vmem>>, vector<1x16x16xbf16>
    %574 = vector.shape_cast %573 : vector<1x16x16xbf16> to vector<16x16xbf16>
    %cst_373 = arith.constant dense<0.000000e+00> : vector<16x128xf32>
    %575 = tpu.matmul %574, %572, %cst_373 {dimension_numbers = #tpu.dot_dimension_numbers<[1], [0], [0], [1], [0, 0, 1, 1], [], []>} : vector<16x16xbf16>, vector<16x128xbf16>, vector<16x128xf32> -> vector<16x128xf32>
    %c0_374 = arith.constant 0 : index
    %c0_375 = arith.constant 0 : index
    %576 = vector.load %arg19[%c0_374, %c0_375] : memref<9x128xf32, #tpu.memory_space<vmem>>, vector<1x128xf32>
    %577 = vector.broadcast %576 : vector<1x128xf32> to vector<16x128xf32>
    %578 = arith.mulf %575, %577 : vector<16x128xf32>
    %579 = arith.addf %571, %578 : vector<16x128xf32>
    %580 = vector.extract_strided_slice %570 {offsets = [0, 124], sizes = [16, 128], strides = [1, 1]} : vector<16x256xbf16> to vector<16x128xbf16>
    %c1_376 = arith.constant 1 : index
    %c0_377 = arith.constant 0 : index
    %c0_378 = arith.constant 0 : index
    %581 = vector.load %arg17[%c1_376, %c0_377, %c0_378] : memref<9x16x16xbf16, #tpu.memory_space<vmem>>, vector<1x16x16xbf16>
    %582 = vector.shape_cast %581 : vector<1x16x16xbf16> to vector<16x16xbf16>
    %cst_379 = arith.constant dense<0.000000e+00> : vector<16x128xf32>
    %583 = tpu.matmul %582, %580, %cst_379 {dimension_numbers = #tpu.dot_dimension_numbers<[1], [0], [0], [1], [0, 0, 1, 1], [], []>} : vector<16x16xbf16>, vector<16x128xbf16>, vector<16x128xf32> -> vector<16x128xf32>
    %c1_380 = arith.constant 1 : index
    %c0_381 = arith.constant 0 : index
    %584 = vector.load %arg19[%c1_380, %c0_381] : memref<9x128xf32, #tpu.memory_space<vmem>>, vector<1x128xf32>
    %585 = vector.broadcast %584 : vector<1x128xf32> to vector<16x128xf32>
    %586 = arith.mulf %583, %585 : vector<16x128xf32>
    %587 = arith.addf %579, %586 : vector<16x128xf32>
    %588 = vector.extract_strided_slice %570 {offsets = [0, 125], sizes = [16, 128], strides = [1, 1]} : vector<16x256xbf16> to vector<16x128xbf16>
    %c2_382 = arith.constant 2 : index
    %c0_383 = arith.constant 0 : index
    %c0_384 = arith.constant 0 : index
    %589 = vector.load %arg17[%c2_382, %c0_383, %c0_384] : memref<9x16x16xbf16, #tpu.memory_space<vmem>>, vector<1x16x16xbf16>
    %590 = vector.shape_cast %589 : vector<1x16x16xbf16> to vector<16x16xbf16>
    %cst_385 = arith.constant dense<0.000000e+00> : vector<16x128xf32>
    %591 = tpu.matmul %590, %588, %cst_385 {dimension_numbers = #tpu.dot_dimension_numbers<[1], [0], [0], [1], [0, 0, 1, 1], [], []>} : vector<16x16xbf16>, vector<16x128xbf16>, vector<16x128xf32> -> vector<16x128xf32>
    %c2_386 = arith.constant 2 : index
    %c0_387 = arith.constant 0 : index
    %592 = vector.load %arg19[%c2_386, %c0_387] : memref<9x128xf32, #tpu.memory_space<vmem>>, vector<1x128xf32>
    %593 = vector.broadcast %592 : vector<1x128xf32> to vector<16x128xf32>
    %594 = arith.mulf %591, %593 : vector<16x128xf32>
    %595 = arith.addf %587, %594 : vector<16x128xf32>
    %596 = vector.extract_strided_slice %570 {offsets = [0, 127], sizes = [16, 128], strides = [1, 1]} : vector<16x256xbf16> to vector<16x128xbf16>
    %c3_388 = arith.constant 3 : index
    %c0_389 = arith.constant 0 : index
    %c0_390 = arith.constant 0 : index
    %597 = vector.load %arg17[%c3_388, %c0_389, %c0_390] : memref<9x16x16xbf16, #tpu.memory_space<vmem>>, vector<1x16x16xbf16>
    %598 = vector.shape_cast %597 : vector<1x16x16xbf16> to vector<16x16xbf16>
    %cst_391 = arith.constant dense<0.000000e+00> : vector<16x128xf32>
    %599 = tpu.matmul %598, %596, %cst_391 {dimension_numbers = #tpu.dot_dimension_numbers<[1], [0], [0], [1], [0, 0, 1, 1], [], []>} : vector<16x16xbf16>, vector<16x128xbf16>, vector<16x128xf32> -> vector<16x128xf32>
    %c3_392 = arith.constant 3 : index
    %c0_393 = arith.constant 0 : index
    %600 = vector.load %arg19[%c3_392, %c0_393] : memref<9x128xf32, #tpu.memory_space<vmem>>, vector<1x128xf32>
    %601 = vector.broadcast %600 : vector<1x128xf32> to vector<16x128xf32>
    %602 = arith.mulf %599, %601 : vector<16x128xf32>
    %603 = arith.addf %595, %602 : vector<16x128xf32>
    %604 = vector.extract_strided_slice %570 {offsets = [0, 0], sizes = [16, 128], strides = [1, 1]} : vector<16x256xbf16> to vector<16x128xbf16>
    %c4_394 = arith.constant 4 : index
    %c0_395 = arith.constant 0 : index
    %c0_396 = arith.constant 0 : index
    %605 = vector.load %arg17[%c4_394, %c0_395, %c0_396] : memref<9x16x16xbf16, #tpu.memory_space<vmem>>, vector<1x16x16xbf16>
    %606 = vector.shape_cast %605 : vector<1x16x16xbf16> to vector<16x16xbf16>
    %cst_397 = arith.constant dense<0.000000e+00> : vector<16x128xf32>
    %607 = tpu.matmul %606, %604, %cst_397 {dimension_numbers = #tpu.dot_dimension_numbers<[1], [0], [0], [1], [0, 0, 1, 1], [], []>} : vector<16x16xbf16>, vector<16x128xbf16>, vector<16x128xf32> -> vector<16x128xf32>
    %c4_398 = arith.constant 4 : index
    %c0_399 = arith.constant 0 : index
    %608 = vector.load %arg19[%c4_398, %c0_399] : memref<9x128xf32, #tpu.memory_space<vmem>>, vector<1x128xf32>
    %609 = vector.broadcast %608 : vector<1x128xf32> to vector<16x128xf32>
    %610 = arith.mulf %607, %609 : vector<16x128xf32>
    %611 = arith.addf %603, %610 : vector<16x128xf32>
    %612 = vector.extract_strided_slice %570 {offsets = [0, 1], sizes = [16, 128], strides = [1, 1]} : vector<16x256xbf16> to vector<16x128xbf16>
    %c5_400 = arith.constant 5 : index
    %c0_401 = arith.constant 0 : index
    %c0_402 = arith.constant 0 : index
    %613 = vector.load %arg17[%c5_400, %c0_401, %c0_402] : memref<9x16x16xbf16, #tpu.memory_space<vmem>>, vector<1x16x16xbf16>
    %614 = vector.shape_cast %613 : vector<1x16x16xbf16> to vector<16x16xbf16>
    %cst_403 = arith.constant dense<0.000000e+00> : vector<16x128xf32>
    %615 = tpu.matmul %614, %612, %cst_403 {dimension_numbers = #tpu.dot_dimension_numbers<[1], [0], [0], [1], [0, 0, 1, 1], [], []>} : vector<16x16xbf16>, vector<16x128xbf16>, vector<16x128xf32> -> vector<16x128xf32>
    %c5_404 = arith.constant 5 : index
    %c0_405 = arith.constant 0 : index
    %616 = vector.load %arg19[%c5_404, %c0_405] : memref<9x128xf32, #tpu.memory_space<vmem>>, vector<1x128xf32>
    %617 = vector.broadcast %616 : vector<1x128xf32> to vector<16x128xf32>
    %618 = arith.mulf %615, %617 : vector<16x128xf32>
    %619 = arith.addf %611, %618 : vector<16x128xf32>
    %620 = vector.extract_strided_slice %570 {offsets = [0, 3], sizes = [16, 128], strides = [1, 1]} : vector<16x256xbf16> to vector<16x128xbf16>
    %c6_406 = arith.constant 6 : index
    %c0_407 = arith.constant 0 : index
    %c0_408 = arith.constant 0 : index
    %621 = vector.load %arg17[%c6_406, %c0_407, %c0_408] : memref<9x16x16xbf16, #tpu.memory_space<vmem>>, vector<1x16x16xbf16>
    %622 = vector.shape_cast %621 : vector<1x16x16xbf16> to vector<16x16xbf16>
    %cst_409 = arith.constant dense<0.000000e+00> : vector<16x128xf32>
    %623 = tpu.matmul %622, %620, %cst_409 {dimension_numbers = #tpu.dot_dimension_numbers<[1], [0], [0], [1], [0, 0, 1, 1], [], []>} : vector<16x16xbf16>, vector<16x128xbf16>, vector<16x128xf32> -> vector<16x128xf32>
    %c6_410 = arith.constant 6 : index
    %c0_411 = arith.constant 0 : index
    %624 = vector.load %arg19[%c6_410, %c0_411] : memref<9x128xf32, #tpu.memory_space<vmem>>, vector<1x128xf32>
    %625 = vector.broadcast %624 : vector<1x128xf32> to vector<16x128xf32>
    %626 = arith.mulf %623, %625 : vector<16x128xf32>
    %627 = arith.addf %619, %626 : vector<16x128xf32>
    %628 = vector.extract_strided_slice %570 {offsets = [0, 4], sizes = [16, 128], strides = [1, 1]} : vector<16x256xbf16> to vector<16x128xbf16>
    %c7_412 = arith.constant 7 : index
    %c0_413 = arith.constant 0 : index
    %c0_414 = arith.constant 0 : index
    %629 = vector.load %arg17[%c7_412, %c0_413, %c0_414] : memref<9x16x16xbf16, #tpu.memory_space<vmem>>, vector<1x16x16xbf16>
    %630 = vector.shape_cast %629 : vector<1x16x16xbf16> to vector<16x16xbf16>
    %cst_415 = arith.constant dense<0.000000e+00> : vector<16x128xf32>
    %631 = tpu.matmul %630, %628, %cst_415 {dimension_numbers = #tpu.dot_dimension_numbers<[1], [0], [0], [1], [0, 0, 1, 1], [], []>} : vector<16x16xbf16>, vector<16x128xbf16>, vector<16x128xf32> -> vector<16x128xf32>
    %c7_416 = arith.constant 7 : index
    %c0_417 = arith.constant 0 : index
    %632 = vector.load %arg19[%c7_416, %c0_417] : memref<9x128xf32, #tpu.memory_space<vmem>>, vector<1x128xf32>
    %633 = vector.broadcast %632 : vector<1x128xf32> to vector<16x128xf32>
    %634 = arith.mulf %631, %633 : vector<16x128xf32>
    %635 = arith.addf %627, %634 : vector<16x128xf32>
    %636 = vector.extract_strided_slice %570 {offsets = [0, 5], sizes = [16, 128], strides = [1, 1]} : vector<16x256xbf16> to vector<16x128xbf16>
    %c8_418 = arith.constant 8 : index
    %c0_419 = arith.constant 0 : index
    %c0_420 = arith.constant 0 : index
    %637 = vector.load %arg17[%c8_418, %c0_419, %c0_420] : memref<9x16x16xbf16, #tpu.memory_space<vmem>>, vector<1x16x16xbf16>
    %638 = vector.shape_cast %637 : vector<1x16x16xbf16> to vector<16x16xbf16>
    %cst_421 = arith.constant dense<0.000000e+00> : vector<16x128xf32>
    %639 = tpu.matmul %638, %636, %cst_421 {dimension_numbers = #tpu.dot_dimension_numbers<[1], [0], [0], [1], [0, 0, 1, 1], [], []>} : vector<16x16xbf16>, vector<16x128xbf16>, vector<16x128xf32> -> vector<16x128xf32>
    %c8_422 = arith.constant 8 : index
    %c0_423 = arith.constant 0 : index
    %640 = vector.load %arg19[%c8_422, %c0_423] : memref<9x128xf32, #tpu.memory_space<vmem>>, vector<1x128xf32>
    %641 = vector.broadcast %640 : vector<1x128xf32> to vector<16x128xf32>
    %642 = arith.mulf %639, %641 : vector<16x128xf32>
    %643 = arith.addf %635, %642 : vector<16x128xf32>
    %c0_424 = arith.constant 0 : index
    %c0_425 = arith.constant 0 : index
    %644 = vector.load %arg18[%c0_424, %c0_425] : memref<16x1xf32, #tpu.memory_space<vmem>>, vector<16x1xf32>
    %645 = vector.broadcast %644 : vector<16x1xf32> to vector<16x128xf32>
    %646 = arith.addf %643, %645 : vector<16x128xf32>
    %c0_426 = arith.constant 0 : index
    %c0_427 = arith.constant 0 : index
    %647 = vector.load %arg20[%c0_426, %c0_427] : memref<16x128xf32, #tpu.memory_space<vmem>>, vector<16x128xf32>
    tpu.vector_store %arg20[%c0_426, %c0_427], %646 {strides = array<i32>} : memref<16x128xf32, #tpu.memory_space<vmem>>, vector<16x128xf32>,
    return
  }
  func.func @transform_0(%arg0: i32) -> (i32, i32) {
    %c0_i32 = arith.constant 0 : i32
    %c0_i32_0 = arith.constant 0 : i32
    %c0_i32_1 = arith.constant 0 : i32
    return %c0_i32, %c0_i32_0 : i32, i32
  }
  func.func @transform_1(%arg0: i32) -> (i32, i32, i32) {
    %c0_i32 = arith.constant 0 : i32
    %c0_i32_0 = arith.constant 0 : i32
    %c0_i32_1 = arith.constant 0 : i32
    %c0_i32_2 = arith.constant 0 : i32
    return %c0_i32, %c0_i32_0, %c0_i32_1 : i32, i32, i32
  }
  func.func @transform_2(%arg0: i32) -> (i32, i32) {
    %c0_i32 = arith.constant 0 : i32
    %c0_i32_0 = arith.constant 0 : i32
    %c0_i32_1 = arith.constant 0 : i32
    return %c0_i32, %c0_i32_0 : i32, i32
  }
  func.func @transform_3(%arg0: i32) -> (i32, i32) {
    %c0_i32 = arith.constant 0 : i32
    %c0_i32_0 = arith.constant 0 : i32
    %c0_i32_1 = arith.constant 0 : i32
    return %c0_i32, %c0_i32_0 : i32, i32
  }
  func.func @transform_4(%arg0: i32) -> (i32, i32) {
    %c0_i32 = arith.constant 0 : i32
    %c0_i32_0 = arith.constant 0 : i32
    %c0_i32_1 = arith.constant 0 : i32
    return %c0_i32, %c0_i32_0 : i32, i32
  }
  func.func @transform_5(%arg0: i32) -> (i32, i32, i32) {
    %c0_i32 = arith.constant 0 : i32
    %c0_i32_0 = arith.constant 0 : i32
    %c0_i32_1 = arith.constant 0 : i32
    %c0_i32_2 = arith.constant 0 : i32
    return %c0_i32, %c0_i32_0, %c0_i32_1 : i32, i32, i32
  }
  func.func @transform_6(%arg0: i32) -> (i32, i32) {
    %c0_i32 = arith.constant 0 : i32
    %c0_i32_0 = arith.constant 0 : i32
    %c0_i32_1 = arith.constant 0 : i32
    return %c0_i32, %c0_i32_0 : i32, i32
  }
  func.func @transform_7(%arg0: i32) -> (i32, i32) {
    %c0_i32 = arith.constant 0 : i32
    %c0_i32_0 = arith.constant 0 : i32
    %c0_i32_1 = arith.constant 0 : i32
    return %c0_i32, %c0_i32_0 : i32, i32
  }
  func.func @transform_8(%arg0: i32) -> (i32, i32) {
    %c0_i32 = arith.constant 0 : i32
    %c0_i32_0 = arith.constant 0 : i32
    %c0_i32_1 = arith.constant 0 : i32
    return %c0_i32, %c0_i32_0 : i32, i32
  }
  func.func @transform_9(%arg0: i32) -> (i32, i32) {
    %c0_i32 = arith.constant 0 : i32
    %c0_i32_0 = arith.constant 0 : i32
    %c0_i32_1 = arith.constant 0 : i32
    return %c0_i32, %c0_i32_0 : i32, i32
  }
  func.func @transform_10(%arg0: i32) -> (i32, i32, i32) {
    %c0_i32 = arith.constant 0 : i32
    %c0_i32_0 = arith.constant 0 : i32
    %c0_i32_1 = arith.constant 0 : i32
    %c0_i32_2 = arith.constant 0 : i32
    return %c0_i32, %c0_i32_0, %c0_i32_1 : i32, i32, i32
  }
  func.func @transform_11(%arg0: i32) -> (i32, i32) {
    %c0_i32 = arith.constant 0 : i32
    %c0_i32_0 = arith.constant 0 : i32
    %c0_i32_1 = arith.constant 0 : i32
    return %c0_i32, %c0_i32_0 : i32, i32
  }
  func.func @transform_12(%arg0: i32) -> (i32, i32) {
    %c0_i32 = arith.constant 0 : i32
    %c0_i32_0 = arith.constant 0 : i32
    %c0_i32_1 = arith.constant 0 : i32
    return %c0_i32, %c0_i32_0 : i32, i32
  }
  func.func @transform_13(%arg0: i32) -> (i32, i32) {
    %c0_i32 = arith.constant 0 : i32
    %c0_i32_0 = arith.constant 0 : i32
    %c0_i32_1 = arith.constant 0 : i32
    return %c0_i32, %c0_i32_0 : i32, i32
  }
  func.func @transform_14(%arg0: i32) -> (i32, i32) {
    %c0_i32 = arith.constant 0 : i32
    %c0_i32_0 = arith.constant 0 : i32
    %c0_i32_1 = arith.constant 0 : i32
    return %c0_i32, %c0_i32_0 : i32, i32
  }
  func.func @transform_15(%arg0: i32) -> (i32, i32) {
    %c0_i32 = arith.constant 0 : i32
    %c0_i32_0 = arith.constant 0 : i32
    %c0_i32_1 = arith.constant 0 : i32
    return %c0_i32, %c0_i32_0 : i32, i32
  }
  func.func @transform_16(%arg0: i32) -> (i32, i32, i32) {
    %c0_i32 = arith.constant 0 : i32
    %c0_i32_0 = arith.constant 0 : i32
    %c0_i32_1 = arith.constant 0 : i32
    %c0_i32_2 = arith.constant 0 : i32
    return %c0_i32, %c0_i32_0, %c0_i32_1 : i32, i32, i32
  }
  func.func @transform_17(%arg0: i32) -> (i32, i32) {
    %c0_i32 = arith.constant 0 : i32
    %c0_i32_0 = arith.constant 0 : i32
    %c0_i32_1 = arith.constant 0 : i32
    return %c0_i32, %c0_i32_0 : i32, i32
  }
  func.func @transform_18(%arg0: i32) -> (i32, i32) {
    %c0_i32 = arith.constant 0 : i32
    %c0_i32_0 = arith.constant 0 : i32
    %c0_i32_1 = arith.constant 0 : i32
    return %c0_i32, %c0_i32_0 : i32, i32
  }
  func.func @transform_19(%arg0: i32) -> (i32, i32) {
    %c0_i32 = arith.constant 0 : i32
    %c0_i32_0 = arith.constant 0 : i32
    %c0_i32_1 = arith.constant 0 : i32
    return %c0_i32, %c0_i32_0 : i32, i32
  }
}

</mosaic_0001>

<bundles_post_ra>
// kernel: _forward.1
= control target key start
LH: loop header
LB: loop body
LE: loop exit
PB: predicated region body
PF: predicated region fallthrough
CT: control target
= control target key end

     0   :  { %v8242_v3 = vmov 0   ;;  %s8243_s21 = smov 34   ;;  %s8246_s22 = smov 31   ;;  %vm94_vm0 = vcmask 277504   ;;  %vm103_vm1 = vcmask 130048   ;;  %vm247_vm2 = vcmask 269312   ;;  %s9691_s0 = inlined_call_operand.vmem [shape: f32[16,512], index: 0, kind: input, shape index: {}]   ;;  %s9692_s1 = inlined_call_operand.vmem [shape: bf16[25,16,16], index: 1, kind: input, shape index: {}]   ;;  %s9693_s3 = inlined_call_operand.vmem [shape: f32[25,512], index: 3, kind: input, shape index: {}]   ;;  %s9694_s4 = inlined_call_operand.vmem [shape: bf16[512,128], index: 4, kind: input, shape index: {}]   ;;  %s9695_s2 = inlined_call_operand.vmem [shape: f32[16,1], index: 2, kind: input, shape index: {}]   ;;  %s9696_s5 = inlined_call_operand.vmem [shape: bf16[25,16,16], index: 5, kind: input, shape index: {}]   ;;  %s9697_s6 = inlined_call_operand.vmem [shape: f32[16,1], index: 6, kind: input, shape index: {}]   ;;  %s9698_s9 = inlined_call_operand.vmem [shape: f32[25,128], index: 9, kind: input, shape index: {}]   ;;  %s9699_s7 = inlined_call_operand.vmem [shape: f32[16,1], index: 7, kind: input, shape index: {}]   ;;  %s9700_s8 = inlined_call_operand.vmem [shape: f32[16,1], index: 8, kind: input, shape index: {}]   ;;  %s9701_s10 = inlined_call_operand.vmem [shape: bf16[9,16,16], index: 10, kind: input, shape index: {}]   ;;  %s9702_s11 = inlined_call_operand.vmem [shape: f32[16,1], index: 11, kind: input, shape index: {}]   ;;  %s9703_s15 = inlined_call_operand.vmem [shape: bf16[128,128], index: 15, kind: input, shape index: {}]   ;;  %s9704_s14 = inlined_call_operand.vmem [shape: f32[9,128], index: 14, kind: input, shape index: {}]   ;;  %s9705_s12 = inlined_call_operand.vmem [shape: f32[16,1], index: 12, kind: input, shape index: {}]   ;;  %s9706_s13 = inlined_call_operand.vmem [shape: f32[16,1], index: 13, kind: input, shape index: {}]   ;;  %s9707_s16 = inlined_call_operand.vmem [shape: bf16[9,16,16], index: 16, kind: input, shape index: {}]   ;;  %s9708_s17 = inlined_call_operand.vmem [shape: f32[16,1], index: 17, kind: input, shape index: {}]   ;;  %s9709_s18 = inlined_call_operand.vmem [shape: f32[9,128], index: 18, kind: input, shape index: {}]   ;;  %s9710_s19 = inlined_call_operand.vmem [shape: f32[16,128], index: 19, kind: output, shape index: {}]  }
   0x1   :  { %9729 = sst [smem:[#allocation2_spill]] %s9691_s0  ;;  %139 = vmatprep.mubr.bf16.mxu0 %v8242_v3  ;;  %182 = vmatprep.mubr.bf16.mxu1 %v8242_v3  ;;  %s8248_s23 = smov 18   ;;  %vm400_vm3 = vcmask 261120   ;;  %vm553_vm4 = vcmask 252928   ;;  %vm706_vm5 = vcmask 244736   ;;  %vm859_vm6 = vcmask 146432  }
   0x2   :  { %9730 = sst [smem:[#allocation3_spill]] %s9692_s1  ;;  %s9733_s20 = sld [smem:[#allocation2_spill]]  ;;  %8124 = vset.pattern.permute.xlu0 %v8242_v3  ;;  %8125 = vset.pattern.permute.xlu1 %v8242_v3  ;;  %vm1012_vm7 = vcmask 138240   ;;  %vm1318_vm8 = vcmask 121856   ;;  %vm1471_vm9 = vcmask 113664   ;;  %vm1624_vm10 = vcmask 15360  }
   0x3   :  { %9731 = sst [smem:[#allocation4_spill]] %s9693_s3  ;;  %s8244_s1 = smov 33   ;;  %vm1777_vm11 = vcmask 7168   ;;  %vm2066_vm12 = vcmask 1039360   ;;  %vm2219_vm13 = vcmask 1031168   ;;  %vm2372_vm14 = vcmask 932864  }
   0x4   :  { %9732 = sst [smem:[#allocation5_spill]] %s9694_s4  ;;  %s8247_s3 = smov 30   ;;  %vm2525_vm15 = vcmask 924672  }
   0x5   :  { %s8249_s24 = smov 17   ;;  %s9727_s25 = smov 16  }
   0x6   :  { %s8251_s4 = smov 15   ;;  %s9726_s26 = smov 14  }
   0x7   :  { %s9723_s27 = smov 2   ;;  %s9724_s28 = smov 1  }
   0x8   :  { %v66_v0 = vld [vmem:[%s9733_s20 + $0x18] sm:$0xff]  ;;  %v63_v2 = vld [vmem:[%s9733_s20] sm:$0xff]  ;;  %v65_v6 = vld [vmem:[%s9733_s20 + $0x10] sm:$0xff]  ;;  %s9720_s29 = smov 127   ;;  %s9722_s0 = smov 126  }
   0x9   :  { %v70_v1 = vld [vmem:[%s9733_s20 + $0x38] sm:$0xff]  ;;  %v67_v5 = vld [vmem:[%s9733_s20 + $0x20] sm:$0xff]  ;;  %v69_v7 = vld [vmem:[%s9733_s20 + $0x30] sm:$0xff]  ;;  %s9719_s30 = smov 114  }
   0xa   :  { %v8396_v4 = vpack.c.bf16 %v70_v1, %v66_v0  ;;  %v8409_v8 = vpack.c.bf16 %v67_v5, %v63_v2  ;;  %v64_v9 = vld [vmem:[%s9733_s20 + $0x8] sm:$0xff]  ;;  %v8418_v11 = vpack.c.bf16 %v69_v7, %v65_v6 }
   0xb   :  { %v68_v10 = vld [vmem:[%s9733_s20 + $0x28] sm:$0xff]  ;;  %s8245_s20 = smov 32  }
   0xc   :  { %86 = vrot.lane.b32.xlu1 %v8396_v4, %s8243_s21  ;;  %88 = vrot.lane.b32.xlu0 %v8409_v8, %s8243_s21  ;;  %v8421_v12 = vpack.c.bf16 %v68_v10, %v64_v9 }
  0x10   :  { %92 = vrot.lane.b32.xlu1 %v8418_v11, %s8243_s21  ;;  %90 = vrot.lane.b32.xlu0 %v8421_v12, %s8243_s21  ;;  %s9717_s21 = smov 111  }
  0x14   :  { %243 = vrot.lane.b32.xlu1 %v8421_v12, %s8244_s1  ;;  %241 = vrot.lane.b32.xlu0 %v8409_v8, %s8244_s1 }
  0x18   :  { %245 = vrot.lane.b32.xlu1 %v8418_v11, %s8244_s1  ;;  %239 = vrot.lane.b32.xlu0 %v8396_v4, %s8244_s1  ;;  %s9743_s1 = smov 114  }
  0x1c   :  { %396 = vrot.lane.b32.xlu1 %v8421_v12, %s8245_s20  ;;  %394 = vrot.lane.b32.xlu0 %v8409_v8, %s8245_s20 }
  0x20   :  { %398 = vrot.lane.b32.xlu1 %v8418_v11, %s8245_s20  ;;  %392 = vrot.lane.b32.xlu0 %v8396_v4, %s8245_s20  ;;  %s9734_s20 = sld [smem:[#allocation3_spill]] }
  0x24   :  { %549 = vrot.lane.b32.xlu1 %v8421_v12, %s8246_s22  ;;  %547 = vrot.lane.b32.xlu0 %v8409_v8, %s8246_s22 }
  0x26   :  { %v8126_v20 = vld [vmem:[%s9734_s20] sm:$0xff]   ;;  %v8127_v30 = vld [vmem:[%s9734_s20 + $0x8] sm:$0xff]   ;;  %v8128_v39 = vld [vmem:[%s9734_s20 + $0x10] sm:$0xff]  }
  0x27   :  { %v8129_v48 = vld [vmem:[%s9734_s20 + $0x18] sm:$0xff]   ;;  %v8130_v57 = vld [vmem:[%s9734_s20 + $0x20] sm:$0xff]   ;;  %v8131_v2 = vld [vmem:[%s9734_s20 + $0x28] sm:$0xff]  }
  0x28   :  { %551 = vrot.lane.b32.xlu1 %v8418_v11, %s8246_s22  ;;  %545 = vrot.lane.b32.xlu0 %v8396_v4, %s8246_s22  ;;  %s9715_s22 = smov 113  }
  0x2c   :  { %702 = vrot.lane.b32.xlu1 %v8421_v12, %s8247_s3  ;;  %700 = vrot.lane.b32.xlu0 %v8409_v8, %s8247_s3 }
  0x30   :  { %704 = vrot.lane.b32.xlu1 %v8418_v11, %s8247_s3  ;;  %698 = vrot.lane.b32.xlu0 %v8396_v4, %s8247_s3  ;;  %s9716_s3 = smov 112  }
  0x34   :  { %855 = vrot.lane.b32.xlu1 %v8421_v12, %s8248_s23  ;;  %853 = vrot.lane.b32.xlu0 %v8409_v8, %s8248_s23 }
  0x38   :  { %857 = vrot.lane.b32.xlu1 %v8418_v11, %s8248_s23  ;;  %851 = vrot.lane.b32.xlu0 %v8396_v4, %s8248_s23 }
  0x3c   :  { %1008 = vrot.lane.b32.xlu1 %v8421_v12, %s8249_s24  ;;  %1006 = vrot.lane.b32.xlu0 %v8409_v8, %s8249_s24 }
  0x40   :  { %1010 = vrot.lane.b32.xlu1 %v8418_v11, %s8249_s24  ;;  %1004 = vrot.lane.b32.xlu0 %v8396_v4, %s8249_s24 }
  0x44   :  { %1161 = vrot.lane.b32.xlu1 %v8421_v12, %s9727_s25  ;;  %1159 = vrot.lane.b32.xlu0 %v8409_v8, %s9727_s25 }
  0x48   :  { %1163 = vrot.lane.b32.xlu1 %v8418_v11, %s9727_s25  ;;  %1157 = vrot.lane.b32.xlu0 %v8396_v4, %s9727_s25  ;;  %s8269_s25 = smov 10  }
  0x4c   :  { %1314 = vrot.lane.b32.xlu1 %v8421_v12, %s8251_s4  ;;  %1312 = vrot.lane.b32.xlu0 %v8409_v8, %s8251_s4 }
  0x50   :  { %1316 = vrot.lane.b32.xlu1 %v8418_v11, %s8251_s4  ;;  %1310 = vrot.lane.b32.xlu0 %v8396_v4, %s8251_s4 }
  0x54   :  { %1467 = vrot.lane.b32.xlu1 %v8421_v12, %s9726_s26  ;;  %1465 = vrot.lane.b32.xlu0 %v8409_v8, %s9726_s26 }
  0x58   :  { %1469 = vrot.lane.b32.xlu1 %v8418_v11, %s9726_s26  ;;  %1463 = vrot.lane.b32.xlu0 %v8396_v4, %s9726_s26  ;;  %s9738_s26 = smov 14  }
  0x5c   :  { %1620 = vrot.lane.b32.xlu1 %v8421_v12, %s9723_s27  ;;  %1618 = vrot.lane.b32.xlu0 %v8409_v8, %s9723_s27 }
  0x60   :  { %1622 = vrot.lane.b32.xlu1 %v8418_v11, %s9723_s27  ;;  %1616 = vrot.lane.b32.xlu0 %v8396_v4, %s9723_s27  ;;  %s8270_s27 = smov 8  }
  0x64   :  { %1773 = vrot.lane.b32.xlu1 %v8421_v12, %s9724_s28  ;;  %1771 = vrot.lane.b32.xlu0 %v8409_v8, %s9724_s28 }
  0x68   :  { %1775 = vrot.lane.b32.xlu1 %v8418_v11, %s9724_s28  ;;  %1769 = vrot.lane.b32.xlu0 %v8396_v4, %s9724_s28  ;;  %s9739_s28 = smov 1  }
  0x6c   :  { %2062 = vrot.lane.b32.xlu1 %v8418_v11, %s9720_s29  ;;  %2060 = vrot.lane.b32.xlu0 %v8421_v12, %s9720_s29 }
  0x70   :  { %2064 = vrot.lane.b32.xlu1 %v8396_v4, %s9720_s29  ;;  %2058 = vrot.lane.b32.xlu0 %v8409_v8, %s9720_s29  ;;  %s9742_s29 = smov 127  }
  0x74   :  { %2215 = vrot.lane.b32.xlu1 %v8418_v11, %s9722_s0  ;;  %2213 = vrot.lane.b32.xlu0 %v8421_v12, %s9722_s0 }
  0x78   :  { %2217 = vrot.lane.b32.xlu1 %v8396_v4, %s9722_s0  ;;  %2211 = vrot.lane.b32.xlu0 %v8409_v8, %s9722_s0  ;;  %s8274_s0 = smov 121  }
  0x7c   :  { %2368 = vrot.lane.b32.xlu1 %v8418_v11, %s9719_s30  ;;  %2366 = vrot.lane.b32.xlu0 %v8421_v12, %s9719_s30 }
  0x7e   :  { %v87_v13 = vpop.permute.xlu1 %86  ;;  %v89_v14 = vpop.permute.xlu0 %88 }
  0x7f   :  { %v95_v21 = vsel %vm94_vm0, %v87_v13, %v89_v14 }
  0x80   :  { %2370 = vrot.lane.b32.xlu1 %v8396_v4, %s9719_s30  ;;  %2364 = vrot.lane.b32.xlu0 %v8409_v8, %s9719_s30  ;;  %s9736_s30 = sld [smem:[#allocation5_spill]] }
  0x82   :  { %v93_v15 = vpop.permute.xlu1 %92  ;;  %v91_v16 = vpop.permute.xlu0 %90 }
  0x83   :  { %v98_v17 = vsel %vm94_vm0, %v93_v15, %v87_v13  ;;  %v96_v18 = vsel %vm94_vm0, %v89_v14, %v91_v16  ;;  %v97_v19 = vsel %vm94_vm0, %v91_v16, %v93_v15  ;;  %v8132_v16 = vld [vmem:[%s9734_s20 + $0x30] sm:$0xff]   ;;  %vm2678_vm0 = vcmask 916480  }
  0x84   :  { %150 = vmatprep.subr.bf16.mxu1 %v98_v17  ;;  %2521 = vrot.lane.b32.xlu1 %v8418_v11, %s9715_s22 }
  0x85   :  { %107 = vmatprep.subr.bf16.mxu0 %v96_v18  ;;  %151 = vmatpush1.bf16.msra.mxu1 %v97_v19 }
  0x86   :  { %108 = vmatpush1.bf16.msra.mxu0 %v95_v21  ;;  %v244_v22 = vpop.permute.xlu1 %243  ;;  %2519 = vrot.lane.b32.xlu0 %v8421_v12, %s9715_s22  ;;  %v242_v23 = vpop.permute.xlu0 %241 }
  0x87   :  { %v249_v24 = vsel %vm247_vm2, %v242_v23, %v244_v22 }
  0x88   :  { %7269 = vmatmul.mubr.msk.bf16.vlgmr.msra.gmra.mrb[0].mxu1 %vm103_vm1, %v8126_v20  ;;  %2523 = vrot.lane.b32.xlu1 %v8396_v4, %s9715_s22 }
  0x89   :  { %7268 = vmatmul.mubr.msk.bf16.vlgmr.msra.gmra.mrb[0].mxu0 %vm103_vm1, %v8126_v20  ;;  %259 = vmatprep.subr.bf16.mxu0 %v249_v24 }
  0x8a   :  { %v246_v25 = vpop.permute.xlu1 %245  ;;  %2517 = vrot.lane.b32.xlu0 %v8409_v8, %s9715_s22  ;;  %291 = vmatprep.mubr.bf16.mxu0 %v8242_v3  ;;  %v240_v26 = vpop.permute.xlu0 %239  ;;  %s9718_s22 = smov 110  }
  0x8b   :  { %v250_v27 = vsel %vm247_vm2, %v244_v22, %v246_v25  ;;  %334 = vmatprep.mubr.bf16.mxu1 %v8242_v3  ;;  %v248_v28 = vsel %vm247_vm2, %v240_v26, %v242_v23  ;;  %v251_v29 = vsel %vm247_vm2, %v246_v25, %v240_v26  ;;  %v8133_v25 = vld [vmem:[%s9734_s20 + $0x38] sm:$0xff]   ;;  %vm2831_vm2 = vcmask 908288  }
  0x8c   :  { %2674 = vrot.lane.b32.xlu1 %v8418_v11, %s9716_s3  ;;  %260 = vmatpush1.bf16.msra.mxu0 %v248_v28 }
  0x8d   :  { %302 = vmatprep.subr.bf16.mxu1 %v251_v29 }
  0x8e   :  { %303 = vmatpush1.bf16.msra.mxu1 %v250_v27  ;;  %v397_v31 = vpop.permute.xlu1 %396  ;;  %2672 = vrot.lane.b32.xlu0 %v8421_v12, %s9716_s3  ;;  %v395_v32 = vpop.permute.xlu0 %394 }
  0x8f   :  { %v402_v33 = vsel %vm400_vm3, %v395_v32, %v397_v31 }
  0x90   :  { %2676 = vrot.lane.b32.xlu1 %v8396_v4, %s9716_s3  ;;  %412 = vmatprep.subr.bf16.mxu0 %v402_v33 }
  0x91   :  { %7273 = vmatmul.mubr.msk.bf16.vlgmr.msra.gmra.mrb[4].mxu0 %vm103_vm1, %v8127_v30  ;;  %7274 = vmatmul.mubr.msk.bf16.vlgmr.msra.gmra.mrb[4].mxu1 %vm103_vm1, %v8127_v30 }
  0x92   :  { %v399_v34 = vpop.permute.xlu1 %398  ;;  %2670 = vrot.lane.b32.xlu0 %v8409_v8, %s9716_s3  ;;  %v393_v35 = vpop.permute.xlu0 %392  ;;  %444 = vmatprep.mubr.bf16.mxu0 %v8242_v3  ;;  %s8262_s3 = smov 98  }
  0x93   :  { %v403_v36 = vsel %vm400_vm3, %v397_v31, %v399_v34  ;;  %487 = vmatprep.mubr.bf16.mxu1 %v8242_v3  ;;  %v401_v37 = vsel %vm400_vm3, %v393_v35, %v395_v32  ;;  %v404_v38 = vsel %vm400_vm3, %v399_v34, %v393_v35  ;;  %v8134_v34 = vld [vmem:[%s9734_s20 + $0x40] sm:$0xff]   ;;  %vm2984_vm3 = vcmask 900096  }
  0x94   :  { %2827 = vrot.lane.b32.xlu1 %v8418_v11, %s9717_s21  ;;  %413 = vmatpush1.bf16.msra.mxu0 %v401_v37 }
  0x95   :  { %455 = vmatprep.subr.bf16.mxu1 %v404_v38 }
  0x96   :  { %456 = vmatpush1.bf16.msra.mxu1 %v403_v36  ;;  %v550_v40 = vpop.permute.xlu1 %549  ;;  %2825 = vrot.lane.b32.xlu0 %v8421_v12, %s9717_s21  ;;  %v548_v41 = vpop.permute.xlu0 %547 }
  0x97   :  { %v555_v42 = vsel %vm553_vm4, %v548_v41, %v550_v40 }
  0x98   :  { %2829 = vrot.lane.b32.xlu1 %v8396_v4, %s9717_s21  ;;  %565 = vmatprep.subr.bf16.mxu0 %v555_v42 }
  0x99   :  { %7279 = vmatmul.mubr.msk.bf16.vlgmr.msra.gmra.mrb[8].mxu0 %vm103_vm1, %v8128_v39  ;;  %7280 = vmatmul.mubr.msk.bf16.vlgmr.msra.gmra.mrb[8].mxu1 %vm103_vm1, %v8128_v39 }
  0x9a   :  { %v552_v43 = vpop.permute.xlu1 %551  ;;  %2823 = vrot.lane.b32.xlu0 %v8409_v8, %s9717_s21  ;;  %v546_v44 = vpop.permute.xlu0 %545  ;;  %597 = vmatprep.mubr.bf16.mxu0 %v8242_v3  ;;  %s8263_s21 = smov 97  }
  0x9b   :  { %v556_v45 = vsel %vm553_vm4, %v550_v40, %v552_v43  ;;  %640 = vmatprep.mubr.bf16.mxu1 %v8242_v3  ;;  %v554_v46 = vsel %vm553_vm4, %v546_v44, %v548_v41  ;;  %v557_v47 = vsel %vm553_vm4, %v552_v43, %v546_v44  ;;  %v8135_v43 = vld [vmem:[%s9734_s20 + $0x48] sm:$0xff]   ;;  %vm3137_vm4 = vcmask 801792  }
  0x9c   :  { %2980 = vrot.lane.b32.xlu1 %v8418_v11, %s9718_s22  ;;  %566 = vmatpush1.bf16.msra.mxu0 %v554_v46 }
  0x9d   :  { %608 = vmatprep.subr.bf16.mxu1 %v557_v47 }
  0x9e   :  { %609 = vmatpush1.bf16.msra.mxu1 %v556_v45  ;;  %v703_v49 = vpop.permute.xlu1 %702  ;;  %2978 = vrot.lane.b32.xlu0 %v8421_v12, %s9718_s22  ;;  %v701_v50 = vpop.permute.xlu0 %700 }
  0x9f   :  { %v708_v51 = vsel %vm706_vm5, %v701_v50, %v703_v49 }
  0xa0   :  { %2982 = vrot.lane.b32.xlu1 %v8396_v4, %s9718_s22  ;;  %718 = vmatprep.subr.bf16.mxu0 %v708_v51 }
  0xa1   :  { %7285 = vmatmul.mubr.msk.bf16.vlgmr.msra.gmra.mrb[12].mxu0 %vm103_vm1, %v8129_v48  ;;  %7286 = vmatmul.mubr.msk.bf16.vlgmr.msra.gmra.mrb[12].mxu1 %vm103_vm1, %v8129_v48 }
  0xa2   :  { %v705_v52 = vpop.permute.xlu1 %704  ;;  %2976 = vrot.lane.b32.xlu0 %v8409_v8, %s9718_s22  ;;  %v699_v53 = vpop.permute.xlu0 %698  ;;  %750 = vmatprep.mubr.bf16.mxu0 %v8242_v3  ;;  %s8264_s22 = smov 96  }
  0xa3   :  { %v709_v54 = vsel %vm706_vm5, %v703_v49, %v705_v52  ;;  %793 = vmatprep.mubr.bf16.mxu1 %v8242_v3  ;;  %v707_v55 = vsel %vm706_vm5, %v699_v53, %v701_v50  ;;  %v710_v56 = vsel %vm706_vm5, %v705_v52, %v699_v53  ;;  %v8136_v52 = vld [vmem:[%s9734_s20 + $0x50] sm:$0xff]   ;;  %vm3290_vm5 = vcmask 793600  }
  0xa4   :  { %3133 = vrot.lane.b32.xlu1 %v8418_v11, %s8262_s3  ;;  %719 = vmatpush1.bf16.msra.mxu0 %v707_v55 }
  0xa5   :  { %761 = vmatprep.subr.bf16.mxu1 %v710_v56 }
  0xa6   :  { %762 = vmatpush1.bf16.msra.mxu1 %v709_v54  ;;  %v856_v58 = vpop.permute.xlu1 %855  ;;  %3131 = vrot.lane.b32.xlu0 %v8421_v12, %s8262_s3  ;;  %v854_v59 = vpop.permute.xlu0 %853 }
  0xa7   :  { %v861_v60 = vsel %vm859_vm6, %v854_v59, %v856_v58 }
  0xa8   :  { %3135 = vrot.lane.b32.xlu1 %v8396_v4, %s8262_s3  ;;  %871 = vmatprep.subr.bf16.mxu0 %v861_v60 }
  0xa9   :  { %7291 = vmatmul.mubr.msk.bf16.vlgmr.msra.gmra.mrb[16].mxu0 %vm103_vm1, %v8130_v57  ;;  %7292 = vmatmul.mubr.msk.bf16.vlgmr.msra.gmra.mrb[16].mxu1 %vm103_vm1, %v8130_v57 }
  0xaa   :  { %v858_v61 = vpop.permute.xlu1 %857  ;;  %3129 = vrot.lane.b32.xlu0 %v8409_v8, %s8262_s3  ;;  %v852_v62 = vpop.permute.xlu0 %851  ;;  %903 = vmatprep.mubr.bf16.mxu0 %v8242_v3  ;;  %s9735_s3 = sld [smem:[#allocation4_spill]] }
  0xab   :  { %v862_v63 = vsel %vm859_vm6, %v856_v58, %v858_v61  ;;  %946 = vmatprep.mubr.bf16.mxu1 %v8242_v3  ;;  %v860_v0 = vsel %vm859_vm6, %v852_v62, %v854_v59  ;;  %v863_v1 = vsel %vm859_vm6, %v858_v61, %v852_v62  ;;  %v8137_v61 = vld [vmem:[%s9734_s20 + $0x58] sm:$0xff]   ;;  %vm3443_vm6 = vcmask 785408  }
  0xac   :  { %3286 = vrot.lane.b32.xlu1 %v8418_v11, %s8263_s21  ;;  %872 = vmatpush1.bf16.msra.mxu0 %v860_v0 }
  0xad   :  { %914 = vmatprep.subr.bf16.mxu1 %v863_v1 }
  0xae   :  { %915 = vmatpush1.bf16.msra.mxu1 %v862_v63  ;;  %v1009_v5 = vpop.permute.xlu1 %1008  ;;  %3284 = vrot.lane.b32.xlu0 %v8421_v12, %s8263_s21  ;;  %v1007_v6 = vpop.permute.xlu0 %1006 }
  0xaf   :  { %v1014_v7 = vsel %vm1012_vm7, %v1007_v6, %v1009_v5 }
  0xb0   :  { %3288 = vrot.lane.b32.xlu1 %v8396_v4, %s8263_s21  ;;  %1024 = vmatprep.subr.bf16.mxu0 %v1014_v7 }
  0xb1   :  { %7297 = vmatmul.mubr.msk.bf16.vlgmr.msra.gmra.mrb[20].mxu0 %vm103_vm1, %v8131_v2  ;;  %7298 = vmatmul.mubr.msk.bf16.vlgmr.msra.gmra.mrb[20].mxu1 %vm103_vm1, %v8131_v2 }
  0xb2   :  { %v1011_v9 = vpop.permute.xlu1 %1010  ;;  %3282 = vrot.lane.b32.xlu0 %v8409_v8, %s8263_s21  ;;  %v1005_v10 = vpop.permute.xlu0 %1004  ;;  %1056 = vmatprep.mubr.bf16.mxu0 %v8242_v3  ;;  %s8265_s21 = smov 95  }
  0xb3   :  { %v1015_v13 = vsel %vm1012_vm7, %v1009_v5, %v1011_v9  ;;  %1099 = vmatprep.mubr.bf16.mxu1 %v8242_v3  ;;  %v1013_v14 = vsel %vm1012_vm7, %v1005_v10, %v1007_v6  ;;  %v1016_v15 = vsel %vm1012_vm7, %v1011_v9, %v1005_v10  ;;  %vm3596_vm7 = vcmask 777216  }
  0xb4   :  { %3439 = vrot.lane.b32.xlu1 %v8418_v11, %s8264_s22  ;;  %1025 = vmatpush1.bf16.msra.mxu0 %v1013_v14  ;;  %v8139_v14 = vld [vmem:[%s9734_s20 + $0x68] sm:$0xff]  }
  0xb5   :  { %1067 = vmatprep.subr.bf16.mxu1 %v1016_v15 }
  0xb6   :  { %1068 = vmatpush1.bf16.msra.mxu1 %v1015_v13  ;;  %v1162_v17 = vpop.permute.xlu1 %1161  ;;  %3437 = vrot.lane.b32.xlu0 %v8421_v12, %s8264_s22  ;;  %v1160_v18 = vpop.permute.xlu0 %1159 }
  0xb7   :  { %v1167_v19 = vsel %vm103_vm1, %v1160_v18, %v1162_v17 }
  0xb8   :  { %3441 = vrot.lane.b32.xlu1 %v8396_v4, %s8264_s22  ;;  %1177 = vmatprep.subr.bf16.mxu0 %v1167_v19 }
  0xb9   :  { %7303 = vmatmul.mubr.msk.bf16.vlgmr.msra.gmra.mrb[24].mxu0 %vm103_vm1, %v8132_v16  ;;  %7304 = vmatmul.mubr.msk.bf16.vlgmr.msra.gmra.mrb[24].mxu1 %vm103_vm1, %v8132_v16 }
  0xba   :  { %v1164_v20 = vpop.permute.xlu1 %1163  ;;  %3435 = vrot.lane.b32.xlu0 %v8409_v8, %s8264_s22  ;;  %v1158_v21 = vpop.permute.xlu0 %1157  ;;  %1209 = vmatprep.mubr.bf16.mxu0 %v8242_v3  ;;  %s8266_s22 = smov 94  }
  0xbb   :  { %v1168_v22 = vsel %vm103_vm1, %v1162_v17, %v1164_v20  ;;  %1252 = vmatprep.mubr.bf16.mxu1 %v8242_v3  ;;  %v1166_v23 = vsel %vm103_vm1, %v1158_v21, %v1160_v18  ;;  %v1169_v24 = vsel %vm103_vm1, %v1164_v20, %v1158_v21 }
  0xbc   :  { %3592 = vrot.lane.b32.xlu1 %v8418_v11, %s8265_s21  ;;  %1178 = vmatpush1.bf16.msra.mxu0 %v1166_v23  ;;  %v8140_v23 = vld [vmem:[%s9734_s20 + $0x70] sm:$0xff]  }
  0xbd   :  { %1220 = vmatprep.subr.bf16.mxu1 %v1169_v24 }
  0xbe   :  { %1221 = vmatpush1.bf16.msra.mxu1 %v1168_v22  ;;  %v1315_v26 = vpop.permute.xlu1 %1314  ;;  %3590 = vrot.lane.b32.xlu0 %v8421_v12, %s8265_s21  ;;  %v1313_v27 = vpop.permute.xlu0 %1312 }
  0xbf   :  { %v1320_v28 = vsel %vm1318_vm8, %v1313_v27, %v1315_v26 }
  0xc0   :  { %3594 = vrot.lane.b32.xlu1 %v8396_v4, %s8265_s21  ;;  %1330 = vmatprep.subr.bf16.mxu0 %v1320_v28 }
  0xc1   :  { %7309 = vmatmul.mubr.msk.bf16.vlgmr.msra.gmra.mrb[28].mxu0 %vm103_vm1, %v8133_v25  ;;  %7310 = vmatmul.mubr.msk.bf16.vlgmr.msra.gmra.mrb[28].mxu1 %vm103_vm1, %v8133_v25 }
  0xc2   :  { %v1317_v29 = vpop.permute.xlu1 %1316  ;;  %3588 = vrot.lane.b32.xlu0 %v8409_v8, %s8265_s21  ;;  %v1311_v30 = vpop.permute.xlu0 %1310  ;;  %1362 = vmatprep.mubr.bf16.mxu0 %v8242_v3  ;;  %s9740_s21 = smov 2  }
  0xc3   :  { %v1321_v31 = vsel %vm1318_vm8, %v1315_v26, %v1317_v29  ;;  %1405 = vmatprep.mubr.bf16.mxu1 %v8242_v3  ;;  %v1319_v32 = vsel %vm1318_vm8, %v1311_v30, %v1313_v27  ;;  %v1322_v33 = vsel %vm1318_vm8, %v1317_v29, %v1311_v30  ;;  %vm3749_vm8 = vcmask 769024  }
  0xc4   :  { %3745 = vrot.lane.b32.xlu1 %v8418_v11, %s8266_s22  ;;  %1331 = vmatpush1.bf16.msra.mxu0 %v1319_v32 }
  0xc5   :  { %1373 = vmatprep.subr.bf16.mxu1 %v1322_v33 }
  0xc6   :  { %1374 = vmatpush1.bf16.msra.mxu1 %v1321_v31  ;;  %v1468_v35 = vpop.permute.xlu1 %1467  ;;  %3743 = vrot.lane.b32.xlu0 %v8421_v12, %s8266_s22  ;;  %v1466_v36 = vpop.permute.xlu0 %1465  ;;  %v8141_v31 = vld [vmem:[%s9734_s20 + $0x78] sm:$0xff]  }
  0xc7   :  { %v1473_v37 = vsel %vm1471_vm9, %v1466_v36, %v1468_v35 }
  0xc8   :  { %3747 = vrot.lane.b32.xlu1 %v8396_v4, %s8266_s22  ;;  %1483 = vmatprep.subr.bf16.mxu0 %v1473_v37 }
  0xc9   :  { %7315 = vmatmul.mubr.msk.bf16.vlgmr.msra.gmra.mrb[32].mxu0 %vm103_vm1, %v8134_v34  ;;  %7316 = vmatmul.mubr.msk.bf16.vlgmr.msra.gmra.mrb[32].mxu1 %vm103_vm1, %v8134_v34 }
  0xca   :  { %v1470_v38 = vpop.permute.xlu1 %1469  ;;  %3741 = vrot.lane.b32.xlu0 %v8409_v8, %s8266_s22  ;;  %v1464_v39 = vpop.permute.xlu0 %1463  ;;  %1515 = vmatprep.mubr.bf16.mxu0 %v8242_v3  ;;  %s8276_s22 = smov 119  }
  0xcb   :  { %v1474_v40 = vsel %vm1471_vm9, %v1468_v35, %v1470_v38  ;;  %1558 = vmatprep.mubr.bf16.mxu1 %v8242_v3  ;;  %v1472_v41 = vsel %vm1471_vm9, %v1464_v39, %v1466_v36  ;;  %v1475_v42 = vsel %vm1471_vm9, %v1470_v38, %v1464_v39  ;;  %vm8268_vm9 = vmmov 0  }
  0xcc   :  { %1484 = vmatpush1.bf16.msra.mxu0 %v1472_v41  ;;  %1526 = vmatprep.subr.bf16.mxu1 %v1475_v42 }
  0xcd   :  { %1527 = vmatpush1.bf16.msra.mxu1 %v1474_v40  ;;  %v8142_v40 = vld [vmem:[%s9734_s20 + $0x80] sm:$0xff]  }
  0xce   :  { %v1621_v44 = vpop.permute.xlu1 %1620  ;;  %v1619_v45 = vpop.permute.xlu0 %1618 }
  0xcf   :  { %v1626_v46 = vsel %vm1624_vm10, %v1619_v45, %v1621_v44 }
  0xd0   :  { %1636 = vmatprep.subr.bf16.mxu0 %v1626_v46 }
  0xd1   :  { %7321 = vmatmul.mubr.msk.bf16.vlgmr.msra.gmra.mrb[36].mxu0 %vm103_vm1, %v8135_v43  ;;  %7322 = vmatmul.mubr.msk.bf16.vlgmr.msra.gmra.mrb[36].mxu1 %vm103_vm1, %v8135_v43 }
  0xd2   :  { %v1623_v47 = vpop.permute.xlu1 %1622  ;;  %1668 = vmatprep.mubr.bf16.mxu0 %v8242_v3  ;;  %v1617_v48 = vpop.permute.xlu0 %1616  ;;  %1711 = vmatprep.mubr.bf16.mxu1 %v8242_v3 }
  0xd3   :  { %v1627_v49 = vsel %vm1624_vm10, %v1621_v44, %v1623_v47  ;;  %v1625_v50 = vsel %vm1624_vm10, %v1617_v48, %v1619_v45  ;;  %v1628_v51 = vsel %vm1624_vm10, %v1623_v47, %v1617_v48 }
  0xd4   :  { %1637 = vmatpush1.bf16.msra.mxu0 %v1625_v50  ;;  %1679 = vmatprep.subr.bf16.mxu1 %v1628_v51 }
  0xd5   :  { %1680 = vmatpush1.bf16.msra.mxu1 %v1627_v49  ;;  %v8143_v49 = vld [vmem:[%s9734_s20 + $0x88] sm:$0xff]  }
  0xd6   :  { %v1774_v53 = vpop.permute.xlu1 %1773  ;;  %v1772_v54 = vpop.permute.xlu0 %1771 }
  0xd7   :  { %v1779_v55 = vsel %vm1777_vm11, %v1772_v54, %v1774_v53 }
  0xd8   :  { %1789 = vmatprep.subr.bf16.mxu0 %v1779_v55 }
  0xd9   :  { %7327 = vmatmul.mubr.msk.bf16.vlgmr.msra.gmra.mrb[40].mxu0 %vm103_vm1, %v8136_v52  ;;  %7328 = vmatmul.mubr.msk.bf16.vlgmr.msra.gmra.mrb[40].mxu1 %vm103_vm1, %v8136_v52 }
  0xda   :  { %v1776_v56 = vpop.permute.xlu1 %1775  ;;  %1821 = vmatprep.mubr.bf16.mxu0 %v8242_v3  ;;  %v1770_v57 = vpop.permute.xlu0 %1769  ;;  %1864 = vmatprep.mubr.bf16.mxu1 %v8242_v3 }
  0xdb   :  { %v1780_v58 = vsel %vm1777_vm11, %v1774_v53, %v1776_v56  ;;  %v1778_v59 = vsel %vm1777_vm11, %v1770_v57, %v1772_v54  ;;  %v1781_v60 = vsel %vm1777_vm11, %v1776_v56, %v1770_v57 }
  0xdc   :  { %1790 = vmatpush1.bf16.msra.mxu0 %v1778_v59  ;;  %1832 = vmatprep.subr.bf16.mxu1 %v1781_v60 }
  0xdd   :  { %1833 = vmatpush1.bf16.msra.mxu1 %v1780_v58  ;;  %1925 = vmatprep.subr.bf16.mxu0 %v8421_v12  ;;  %v8144_v58 = vld [vmem:[%s9734_s20 + $0x90] sm:$0xff]  }
  0xde   :  { %v2063_v62 = vpop.permute.xlu1 %2062  ;;  %v2061_v63 = vpop.permute.xlu0 %2060  ;;  %1968 = vmatprep.subr.bf16.mxu1 %v8396_v4  ;;  %v8138_v4 = vld [vmem:[%s9734_s20 + $0x60] sm:$0xff]  }
  0xdf   :  { %v2068_v0 = vsel %vm2066_vm12, %v2061_v63, %v2063_v62 }
  0xe1   :  { %7333 = vmatmul.mubr.msk.bf16.vlgmr.msra.gmra.mrb[44].mxu0 %vm103_vm1, %v8137_v61  ;;  %7334 = vmatmul.mubr.msk.bf16.vlgmr.msra.gmra.mrb[44].mxu1 %vm103_vm1, %v8137_v61 }
  0xe2   :  { %1926 = vmatpush1.bf16.msra.mxu0 %v8409_v8  ;;  %1969 = vmatpush1.bf16.msra.mxu1 %v8418_v11  ;;  %v2065_v1 = vpop.permute.xlu1 %2064  ;;  %v2059_v12 = vpop.permute.xlu0 %2058 }
  0xe3   :  { %1957 = vmatprep.mubr.bf16.mxu0 %v8242_v3  ;;  %2000 = vmatprep.mubr.bf16.mxu1 %v8242_v3  ;;  %v2070_v2 = vsel %vm2066_vm12, %v2065_v1, %v2059_v12  ;;  %v2067_v8 = vsel %vm2066_vm12, %v2059_v12, %v2061_v63  ;;  %v2069_v11 = vsel %vm2066_vm12, %v2063_v62, %v2065_v1 }
  0xe4   :  { %2078 = vmatprep.subr.bf16.mxu0 %v2068_v0  ;;  %2121 = vmatprep.subr.bf16.mxu1 %v2070_v2  ;;  %v8145_v2 = vld [vmem:[%s9734_s20 + $0x98] sm:$0xff]  }
  0xe6   :  { %v2216_v5 = vpop.permute.xlu1 %2215  ;;  %v2214_v6 = vpop.permute.xlu0 %2213 }
  0xe7   :  { %v2221_v7 = vsel %vm2219_vm13, %v2214_v6, %v2216_v5 }
  0xe9   :  { %7339 = vmatmul.mubr.msk.bf16.vlgmr.msra.gmra.mrb[48].mxu0 %vm103_vm1, %v8138_v4  ;;  %7340 = vmatmul.mubr.msk.bf16.vlgmr.msra.gmra.mrb[48].mxu1 %vm103_vm1, %v8138_v4 }
  0xea   :  { %2079 = vmatpush1.bf16.msra.mxu0 %v2067_v8  ;;  %2122 = vmatpush1.bf16.msra.mxu1 %v2069_v11  ;;  %v2218_v9 = vpop.permute.xlu1 %2217  ;;  %v2212_v10 = vpop.permute.xlu0 %2211 }
  0xeb   :  { %2110 = vmatprep.mubr.bf16.mxu0 %v8242_v3  ;;  %2153 = vmatprep.mubr.bf16.mxu1 %v8242_v3  ;;  %v2223_v13 = vsel %vm2219_vm13, %v2218_v9, %v2212_v10  ;;  %v2220_v16 = vsel %vm2219_vm13, %v2212_v10, %v2214_v6  ;;  %v2222_v17 = vsel %vm2219_vm13, %v2216_v5, %v2218_v9 }
  0xec   :  { %2231 = vmatprep.subr.bf16.mxu0 %v2221_v7  ;;  %2274 = vmatprep.subr.bf16.mxu1 %v2223_v13  ;;  %v8146_v13 = vld [vmem:[%s9734_s20 + $0xa0] sm:$0xff]  }
  0xee   :  { %v2369_v15 = vpop.permute.xlu1 %2368  ;;  %v2367_v18 = vpop.permute.xlu0 %2366 }
  0xef   :  { %v2374_v19 = vsel %vm2372_vm14, %v2367_v18, %v2369_v15 }
  0xf1   :  { %7345 = vmatmul.mubr.msk.bf16.vlgmr.msra.gmra.mrb[52].mxu0 %vm103_vm1, %v8139_v14  ;;  %7346 = vmatmul.mubr.msk.bf16.vlgmr.msra.gmra.mrb[52].mxu1 %vm103_vm1, %v8139_v14 }
  0xf2   :  { %2232 = vmatpush1.bf16.msra.mxu0 %v2220_v16  ;;  %2275 = vmatpush1.bf16.msra.mxu1 %v2222_v17  ;;  %v2371_v20 = vpop.permute.xlu1 %2370  ;;  %v2365_v21 = vpop.permute.xlu0 %2364 }
  0xf3   :  { %2263 = vmatprep.mubr.bf16.mxu0 %v8242_v3  ;;  %2306 = vmatprep.mubr.bf16.mxu1 %v8242_v3  ;;  %v2376_v22 = vsel %vm2372_vm14, %v2371_v20, %v2365_v21  ;;  %v2373_v25 = vsel %vm2372_vm14, %v2365_v21, %v2367_v18  ;;  %v2375_v26 = vsel %vm2372_vm14, %v2369_v15, %v2371_v20 }
  0xf4   :  { %2384 = vmatprep.subr.bf16.mxu0 %v2374_v19  ;;  %2427 = vmatprep.subr.bf16.mxu1 %v2376_v22  ;;  %v8147_v22 = vld [vmem:[%s9734_s20 + $0xa8] sm:$0xff]  }
  0xf6   :  { %v2522_v24 = vpop.permute.xlu1 %2521 }
  0xf8   :  { %v2520_v27 = vpop.permute.xlu0 %2519 }
  0xf9   :  { %7351 = vmatmul.mubr.msk.bf16.vlgmr.msra.gmra.mrb[56].mxu0 %vm103_vm1, %v8140_v23  ;;  %7352 = vmatmul.mubr.msk.bf16.vlgmr.msra.gmra.mrb[56].mxu1 %vm103_vm1, %v8140_v23  ;;  %v2527_v28 = vsel %vm2525_vm15, %v2520_v27, %v2522_v24 }
  0xfa   :  { %2385 = vmatpush1.bf16.msra.mxu0 %v2373_v25  ;;  %2428 = vmatpush1.bf16.msra.mxu1 %v2375_v26  ;;  %v2524_v29 = vpop.permute.xlu1 %2523 }
  0xfb   :  { %2416 = vmatprep.mubr.bf16.mxu0 %v8242_v3  ;;  %2459 = vmatprep.mubr.bf16.mxu1 %v8242_v3  ;;  %v2528_v34 = vsel %vm2525_vm15, %v2522_v24, %v2524_v29 }
  0xfc   :  { %v2518_v30 = vpop.permute.xlu0 %2517  ;;  %2537 = vmatprep.subr.bf16.mxu0 %v2527_v28 }
  0xfd   :  { %v2529_v32 = vsel %vm2525_vm15, %v2524_v29, %v2518_v30  ;;  %v2526_v35 = vsel %vm2525_vm15, %v2518_v30, %v2520_v27 }
  0xfe   :  { %2580 = vmatprep.subr.bf16.mxu1 %v2529_v32  ;;  %v2675_v33 = vpop.permute.xlu1 %2674 }
 0x100   :  { %v2673_v36 = vpop.permute.xlu0 %2672 }
 0x101   :  { %7357 = vmatmul.mubr.msk.bf16.vlgmr.msra.gmra.mrb[60].mxu0 %vm103_vm1, %v8141_v31  ;;  %7358 = vmatmul.mubr.msk.bf16.vlgmr.msra.gmra.mrb[60].mxu1 %vm103_vm1, %v8141_v31  ;;  %v2680_v37 = vsel %vm2678_vm0, %v2673_v36, %v2675_v33  ;;  %v8148_v31 = vld [vmem:[%s9734_s20 + $0xb0] sm:$0xff]  }
 0x102   :  { %2538 = vmatpush1.bf16.msra.mxu0 %v2526_v35  ;;  %2581 = vmatpush1.bf16.msra.mxu1 %v2528_v34  ;;  %v2677_v38 = vpop.permute.xlu1 %2676 }
 0x103   :  { %2569 = vmatprep.mubr.bf16.mxu0 %v8242_v3  ;;  %2612 = vmatprep.mubr.bf16.mxu1 %v8242_v3  ;;  %v2681_v43 = vsel %vm2678_vm0, %v2675_v33, %v2677_v38 }
 0x104   :  { %v2671_v39 = vpop.permute.xlu0 %2670  ;;  %2690 = vmatprep.subr.bf16.mxu0 %v2680_v37 }
 0x105   :  { %v2682_v41 = vsel %vm2678_vm0, %v2677_v38, %v2671_v39  ;;  %v2679_v44 = vsel %vm2678_vm0, %v2671_v39, %v2673_v36 }
 0x106   :  { %2733 = vmatprep.subr.bf16.mxu1 %v2682_v41  ;;  %v2828_v42 = vpop.permute.xlu1 %2827 }
 0x108   :  { %v2826_v45 = vpop.permute.xlu0 %2825 }
 0x109   :  { %7363 = vmatmul.mubr.msk.bf16.vlgmr.msra.gmra.mrb[64].mxu0 %vm103_vm1, %v8142_v40  ;;  %7364 = vmatmul.mubr.msk.bf16.vlgmr.msra.gmra.mrb[64].mxu1 %vm103_vm1, %v8142_v40  ;;  %v2833_v46 = vsel %vm2831_vm2, %v2826_v45, %v2828_v42  ;;  %v8149_v40 = vld [vmem:[%s9734_s20 + $0xb8] sm:$0xff]  }
 0x10a   :  { %2691 = vmatpush1.bf16.msra.mxu0 %v2679_v44  ;;  %2734 = vmatpush1.bf16.msra.mxu1 %v2681_v43  ;;  %v2830_v47 = vpop.permute.xlu1 %2829  ;;  %v8150_v44 = vld [vmem:[%s9734_s20 + $0xc0] sm:$0xff]   ;;  %s9741_s20 = smov 126  }
 0x10b   :  { %2722 = vmatprep.mubr.bf16.mxu0 %v8242_v3  ;;  %2765 = vmatprep.mubr.bf16.mxu1 %v8242_v3  ;;  %v2834_v52 = vsel %vm2831_vm2, %v2828_v42, %v2830_v47 }
 0x10c   :  { %v2824_v48 = vpop.permute.xlu0 %2823  ;;  %2843 = vmatprep.subr.bf16.mxu0 %v2833_v46 }
 0x10d   :  { %v2835_v50 = vsel %vm2831_vm2, %v2830_v47, %v2824_v48  ;;  %v2832_v53 = vsel %vm2831_vm2, %v2824_v48, %v2826_v45  ;;  %v195_v45 = vlaneseq }
 0x10e   :  { %2886 = vmatprep.subr.bf16.mxu1 %v2835_v50  ;;  %v2981_v51 = vpop.permute.xlu1 %2980 }
 0x10f   :  { %v196_v46 = vshrl.u32 %v195_v45, 7 }
 0x110   :  { %v2979_v54 = vpop.permute.xlu0 %2978 }
 0x111   :  { %7369 = vmatmul.mubr.msk.bf16.vlgmr.msra.gmra.mrb[68].mxu0 %vm103_vm1, %v8143_v49  ;;  %7370 = vmatmul.mubr.msk.bf16.vlgmr.msra.gmra.mrb[68].mxu1 %vm103_vm1, %v8143_v49  ;;  %v2986_v55 = vsel %vm2984_vm3, %v2979_v54, %v2981_v51  ;;  %v8835_v49 = vsub.s32 0, %v196_v46  ;;  %v8837_v50 = vsub.s32 2, %v196_v46 }
 0x112   :  { %2844 = vmatpush1.bf16.msra.mxu0 %v2832_v53  ;;  %2887 = vmatpush1.bf16.msra.mxu1 %v2834_v52  ;;  %v2983_v56 = vpop.permute.xlu1 %2982  ;;  %v8841_v52 = vsub.s32 3, %v196_v46  ;;  %v193_v53 = vld [vmem:[%s9735_s3] ss:$8 sm:$0xf] }
 0x113   :  { %2875 = vmatprep.mubr.bf16.mxu0 %v8242_v3  ;;  %2918 = vmatprep.mubr.bf16.mxu1 %v8242_v3  ;;  %v2987_v61 = vsel %vm2984_vm3, %v2981_v51, %v2983_v56  ;;  %v8839_v51 = vsub.s32 1, %v196_v46 }
 0x114   :  { %v2977_v57 = vpop.permute.xlu0 %2976  ;;  %2996 = vmatprep.subr.bf16.mxu0 %v2986_v55 }
 0x115   :  { %v2988_v59 = vsel %vm2984_vm3, %v2983_v56, %v2977_v57  ;;  %v2985_v62 = vsel %vm2984_vm3, %v2977_v57, %v2979_v54 }
 0x116   :  { %3039 = vmatprep.subr.bf16.mxu1 %v2988_v59  ;;  %v3134_v60 = vpop.permute.xlu1 %3133 }
 0x118   :  { %v3132_v63 = vpop.permute.xlu0 %3131 }
 0x119   :  { %7375 = vmatmul.mubr.msk.bf16.vlgmr.msra.gmra.mrb[72].mxu0 %vm103_vm1, %v8144_v58  ;;  %7376 = vmatmul.mubr.msk.bf16.vlgmr.msra.gmra.mrb[72].mxu1 %vm103_vm1, %v8144_v58  ;;  %v3139_v0 = vsel %vm3137_vm4, %v3132_v63, %v3134_v60  ;;  %v7275_v58 = vld [vmem:[%s9735_s3 + $0x1] ss:$8 sm:$0xf] }
 0x11a   :  { %2997 = vmatpush1.bf16.msra.mxu0 %v2985_v62  ;;  %3040 = vmatpush1.bf16.msra.mxu1 %v2987_v61  ;;  %v3136_v1 = vpop.permute.xlu1 %3135  ;;  %v206_v61 = vrot.slane %v193_v53, %v8837_v50  ;;  %v202_v62 = vrot.slane %v193_v53, %v8839_v51 }
 0x11b   :  { %3028 = vmatprep.mubr.bf16.mxu0 %v8242_v3  ;;  %3071 = vmatprep.mubr.bf16.mxu1 %v8242_v3  ;;  %v3140_v8 = vsel %vm3137_vm4, %v3134_v60, %v3136_v1  ;;  %v198_v60 = vrot.slane %v193_v53, %v8835_v49 }
 0x11c   :  { %v3130_v12 = vpop.permute.xlu0 %3129  ;;  %3149 = vmatprep.subr.bf16.mxu0 %v3139_v0  ;;  %v351_v0 = vrot.slane %v7275_v58, %v8835_v49 }
 0x11d   :  { %v3141_v4 = vsel %vm3137_vm4, %v3136_v1, %v3130_v12  ;;  %v3138_v11 = vsel %vm3137_vm4, %v3130_v12, %v3132_v63  ;;  %v210_v63 = vrot.slane %v193_v53, %v8841_v52  ;;  %v359_v1 = vrot.slane %v7275_v58, %v8837_v50 }
 0x11e   :  { %3192 = vmatprep.subr.bf16.mxu1 %v3141_v4  ;;  %v3287_v5 = vpop.permute.xlu1 %3286  ;;  %v355_v12 = vrot.slane %v7275_v58, %v8839_v51 }
 0x120   :  { %v3285_v6 = vpop.permute.xlu0 %3284 }
 0x121   :  { %7381 = vmatmul.mubr.msk.bf16.vlgmr.msra.gmra.mrb[76].mxu0 %vm103_vm1, %v8145_v2  ;;  %7382 = vmatmul.mubr.msk.bf16.vlgmr.msra.gmra.mrb[76].mxu1 %vm103_vm1, %v8145_v2  ;;  %v3292_v7 = vsel %vm3290_vm5, %v3285_v6, %v3287_v5  ;;  %v363_v2 = vrot.slane %v7275_v58, %v8841_v52 }
 0x122   :  { %3150 = vmatpush1.bf16.msra.mxu0 %v3138_v11  ;;  %3193 = vmatpush1.bf16.msra.mxu1 %v3140_v8  ;;  %v3289_v9 = vpop.permute.xlu1 %3288 }
 0x123   :  { %3181 = vmatprep.mubr.bf16.mxu0 %v8242_v3  ;;  %3224 = vmatprep.mubr.bf16.mxu1 %v8242_v3  ;;  %v3293_v16 = vsel %vm3290_vm5, %v3287_v5, %v3289_v9 }
 0x124   :  { %v3283_v10 = vpop.permute.xlu0 %3282  ;;  %3302 = vmatprep.subr.bf16.mxu0 %v3292_v7 }
 0x125   :  { %v3294_v14 = vsel %vm3290_vm5, %v3289_v9, %v3283_v10  ;;  %v3291_v17 = vsel %vm3290_vm5, %v3283_v10, %v3285_v6 }
 0x126   :  { %3345 = vmatprep.subr.bf16.mxu1 %v3294_v14  ;;  %v3440_v15 = vpop.permute.xlu1 %3439 }
 0x128   :  { %v3438_v18 = vpop.permute.xlu0 %3437 }
 0x129   :  { %7387 = vmatmul.mubr.msk.bf16.vlgmr.msra.gmra.mrb[80].mxu0 %vm103_vm1, %v8146_v13  ;;  %7388 = vmatmul.mubr.msk.bf16.vlgmr.msra.gmra.mrb[80].mxu1 %vm103_vm1, %v8146_v13  ;;  %v3445_v19 = vsel %vm3443_vm6, %v3438_v18, %v3440_v15 }
 0x12a   :  { %3303 = vmatpush1.bf16.msra.mxu0 %v3291_v17  ;;  %3346 = vmatpush1.bf16.msra.mxu1 %v3293_v16  ;;  %v3442_v20 = vpop.permute.xlu1 %3441 }
 0x12b   :  { %3334 = vmatprep.mubr.bf16.mxu0 %v8242_v3  ;;  %3377 = vmatprep.mubr.bf16.mxu1 %v8242_v3  ;;  %v3446_v25 = vsel %vm3443_vm6, %v3440_v15, %v3442_v20 }
 0x12c   :  { %v3436_v21 = vpop.permute.xlu0 %3435  ;;  %3455 = vmatprep.subr.bf16.mxu0 %v3445_v19 }
 0x12d   :  { %v3447_v23 = vsel %vm3443_vm6, %v3442_v20, %v3436_v21  ;;  %v3444_v26 = vsel %vm3443_vm6, %v3436_v21, %v3438_v18 }
 0x12e   :  { %3498 = vmatprep.subr.bf16.mxu1 %v3447_v23  ;;  %v3593_v24 = vpop.permute.xlu1 %3592  ;;  %v7281_v23 = vld [vmem:[%s9735_s3 + $0x2] ss:$8 sm:$0xf] }
 0x130   :  { %v3591_v27 = vpop.permute.xlu0 %3590 }
 0x131   :  { %7393 = vmatmul.mubr.msk.bf16.vlgmr.msra.gmra.mrb[84].mxu0 %vm103_vm1, %v8147_v22  ;;  %7394 = vmatmul.mubr.msk.bf16.vlgmr.msra.gmra.mrb[84].mxu1 %vm103_vm1, %v8147_v22  ;;  %v3598_v28 = vsel %vm3596_vm7, %v3591_v27, %v3593_v24 }
 0x132   :  { %3456 = vmatpush1.bf16.msra.mxu0 %v3444_v26  ;;  %3499 = vmatpush1.bf16.msra.mxu1 %v3446_v25  ;;  %v3595_v29 = vpop.permute.xlu1 %3594 }
 0x133   :  { %3487 = vmatprep.mubr.bf16.mxu0 %v8242_v3  ;;  %3530 = vmatprep.mubr.bf16.mxu1 %v8242_v3  ;;  %v3599_v34 = vsel %vm3596_vm7, %v3593_v24, %v3595_v29 }
 0x134   :  { %v3589_v30 = vpop.permute.xlu0 %3588  ;;  %3608 = vmatprep.subr.bf16.mxu0 %v3598_v28 }
 0x135   :  { %v3600_v32 = vsel %vm3596_vm7, %v3595_v29, %v3589_v30  ;;  %v3597_v35 = vsel %vm3596_vm7, %v3589_v30, %v3591_v27 }
 0x136   :  { %3651 = vmatprep.subr.bf16.mxu1 %v3600_v32  ;;  %v3746_v33 = vpop.permute.xlu1 %3745 }
 0x138   :  { %v3744_v36 = vpop.permute.xlu0 %3743 }
 0x139   :  { %7399 = vmatmul.mubr.msk.bf16.vlgmr.msra.gmra.mrb[88].mxu0 %vm103_vm1, %v8148_v31  ;;  %7400 = vmatmul.mubr.msk.bf16.vlgmr.msra.gmra.mrb[88].mxu1 %vm103_vm1, %v8148_v31  ;;  %v3751_v37 = vsel %vm3749_vm8, %v3744_v36, %v3746_v33 }
 0x13a   :  { %3609 = vmatpush1.bf16.msra.mxu0 %v3597_v35  ;;  %3652 = vmatpush1.bf16.msra.mxu1 %v3599_v34  ;;  %v3748_v38 = vpop.permute.xlu1 %3747 }
 0x13b   :  { %3640 = vmatprep.mubr.bf16.mxu0 %v8242_v3  ;;  %3683 = vmatprep.mubr.bf16.mxu1 %v8242_v3  ;;  %v3752_v42 = vsel %vm3749_vm8, %v3746_v33, %v3748_v38 }
 0x13c   :  { %v3742_v39 = vpop.permute.xlu0 %3741  ;;  %3761 = vmatprep.subr.bf16.mxu0 %v3751_v37  ;;  %v512_v37 = vrot.slane %v7281_v23, %v8837_v50 }
 0x13d   :  { %v3753_v41 = vsel %vm3749_vm8, %v3748_v38, %v3742_v39  ;;  %v3750_v43 = vsel %vm3749_vm8, %v3742_v39, %v3744_v36  ;;  %v504_v36 = vrot.slane %v7281_v23, %v8835_v49 }
 0x13e   :  { %3804 = vmatprep.subr.bf16.mxu1 %v3753_v41  ;;  %v516_v41 = vrot.slane %v7281_v23, %v8841_v52 }
 0x141   :  { %7405 = vmatmul.mubr.msk.bf16.vlgmr.msra.gmra.mrb[92].mxu0 %vm103_vm1, %v8149_v40  ;;  %7406 = vmatmul.mubr.msk.bf16.vlgmr.msra.gmra.mrb[92].mxu1 %vm103_vm1, %v8149_v40  ;;  %v508_v40 = vrot.slane %v7281_v23, %v8839_v51 }
 0x142   :  { %3762 = vmatpush1.bf16.msra.mxu0 %v3750_v43  ;;  %3805 = vmatpush1.bf16.msra.mxu1 %v3752_v42 }
 0x143   :  { %3793 = vmatprep.mubr.bf16.mxu0 %v8242_v3  ;;  %3836 = vmatprep.mubr.bf16.mxu1 %v8242_v3 }
 0x149   :  { %7411 = vmatmul.mubr.msk.bf16.vlgmr.msra.gmra.mrb[96].mxu0 %vm103_vm1, %v8150_v44  ;;  %7412 = vmatmul.mubr.msk.bf16.vlgmr.msra.gmra.mrb[96].mxu1 %vm103_vm1, %v8150_v44 }
 0x15b   :  { %v184_v47 = vpop.f32.mrb[0].mxu1 }
 0x15c   :  { %v141_v48 = vpop.f32.mrb[0].mxu0  ;;  %v186_v3 = vpop.f32.mrb[1].mxu1  ;;  %v217_v5 = vmul.f32 %v206_v61, %v184_v47 }
 0x15d   :  { %v143_v54 = vpop.f32.mrb[1].mxu0  ;;  %v188_v55 = vpop.f32.mrb[2].mxu1  ;;  %v215_v4 = vmul.f32 %v198_v60, %v141_v48  ;;  %v218_v11 = vmul.f32 %v210_v63, %v186_v3 }
 0x15e   :  { %v145_v56 = vpop.f32.mrb[2].mxu0  ;;  %v190_v57 = vpop.f32.mrb[3].mxu1  ;;  %v216_v8 = vmul.f32 %v202_v62, %v143_v54  ;;  %v221_v10 = vmul.f32 %v206_v61, %v188_v55 }
 0x15f   :  { %v147_v59 = vpop.f32.mrb[3].mxu0  ;;  %v219_v9 = vmul.f32 %v198_v60, %v145_v56  ;;  %v222_v18 = vmul.f32 %v210_v63, %v190_v57  ;;  %v7287_v56 = vld [vmem:[%s9735_s3 + $0x3] ss:$8 sm:$0xf] }
 0x160   :  { %v220_v17 = vmul.f32 %v202_v62, %v147_v59 }
 0x164   :  { %v293_v6 = vpop.f32.mrb[4].mxu0  ;;  %v336_v7 = vpop.f32.mrb[4].mxu1 }
 0x165   :  { %v368_v13 = vmul.f32 %v351_v0, %v293_v6  ;;  %v370_v14 = vmul.f32 %v359_v1, %v336_v7  ;;  %v295_v15 = vpop.f32.mrb[5].mxu0  ;;  %v338_v16 = vpop.f32.mrb[5].mxu1  ;;  %v661_v7 = vrot.slane %v7287_v56, %v8839_v51 }
 0x166   :  { %v369_v19 = vmul.f32 %v355_v12, %v295_v15  ;;  %v371_v20 = vmul.f32 %v363_v2, %v338_v16  ;;  %v297_v21 = vpop.f32.mrb[6].mxu0  ;;  %v340_v22 = vpop.f32.mrb[6].mxu1 }
 0x167   :  { %v376_v24 = vadd.f32 %v368_v13, %v215_v4  ;;  %v378_v25 = vadd.f32 %v370_v14, %v217_v5  ;;  %v372_v26 = vmul.f32 %v351_v0, %v297_v21  ;;  %v374_v27 = vmul.f32 %v359_v1, %v340_v22  ;;  %v299_v28 = vpop.f32.mrb[7].mxu0  ;;  %v342_v29 = vpop.f32.mrb[7].mxu1  ;;  %v7293_v22 = vld [vmem:[%s9735_s3 + $0x4] ss:$8 sm:$0xf] }
 0x168   :  { %v377_v30 = vadd.f32 %v369_v19, %v216_v8  ;;  %v379_v31 = vadd.f32 %v371_v20, %v218_v11  ;;  %v373_v32 = vmul.f32 %v355_v12, %v299_v28  ;;  %v375_v33 = vmul.f32 %v363_v2, %v342_v29 }
 0x169   :  { %v380_v34 = vadd.f32 %v372_v26, %v219_v9  ;;  %v382_v35 = vadd.f32 %v374_v27, %v221_v10  ;;  %v657_v5 = vrot.slane %v7287_v56, %v8835_v49  ;;  %v665_v8 = vrot.slane %v7287_v56, %v8837_v50 }
 0x16a   :  { %v381_v38 = vadd.f32 %v373_v32, %v220_v17  ;;  %v383_v39 = vadd.f32 %v375_v33, %v222_v18  ;;  %v669_v9 = vrot.slane %v7287_v56, %v8841_v52 }
 0x16c   :  { %v446_v42 = vpop.f32.mrb[8].mxu0  ;;  %v489_v43 = vpop.f32.mrb[8].mxu1 }
 0x16d   :  { %v521_v44 = vmul.f32 %v504_v36, %v446_v42  ;;  %v523_v46 = vmul.f32 %v512_v37, %v489_v43  ;;  %v448_v47 = vpop.f32.mrb[9].mxu0  ;;  %v491_v48 = vpop.f32.mrb[9].mxu1 }
 0x16e   :  { %v522_v3 = vmul.f32 %v508_v40, %v448_v47  ;;  %v524_v53 = vmul.f32 %v516_v41, %v491_v48  ;;  %v450_v54 = vpop.f32.mrb[10].mxu0  ;;  %v493_v55 = vpop.f32.mrb[10].mxu1 }
 0x16f   :  { %v529_v57 = vadd.f32 %v521_v44, %v376_v24  ;;  %v531_v58 = vadd.f32 %v523_v46, %v378_v25  ;;  %v525_v59 = vmul.f32 %v504_v36, %v450_v54  ;;  %v527_v60 = vmul.f32 %v512_v37, %v493_v55  ;;  %v452_v61 = vpop.f32.mrb[11].mxu0  ;;  %v495_v62 = vpop.f32.mrb[11].mxu1  ;;  %v7299_v55 = vld [vmem:[%s9735_s3 + $0x5] ss:$8 sm:$0xf] }
 0x170   :  { %v530_v63 = vadd.f32 %v522_v3, %v377_v30  ;;  %v532_v0 = vadd.f32 %v524_v53, %v379_v31  ;;  %v526_v1 = vmul.f32 %v508_v40, %v452_v61  ;;  %v528_v12 = vmul.f32 %v516_v41, %v495_v62 }
 0x171   :  { %v533_v2 = vadd.f32 %v525_v59, %v380_v34  ;;  %v535_v4 = vadd.f32 %v527_v60, %v382_v35  ;;  %v810_v35 = vrot.slane %v7293_v22, %v8835_v49  ;;  %v818_v36 = vrot.slane %v7293_v22, %v8837_v50 }
 0x172   :  { %v534_v11 = vadd.f32 %v526_v1, %v381_v38  ;;  %v536_v6 = vadd.f32 %v528_v12, %v383_v39  ;;  %v814_v39 = vrot.slane %v7293_v22, %v8839_v51  ;;  %v822_v40 = vrot.slane %v7293_v22, %v8841_v52  ;;  %v8151_v22 = vld [vmem:[%s9736_s30 + $0x40] sm:$0xff]  }
 0x173   :  { %7664 = vmatprep.subr.bf16.mxu0 %v8151_v22  ;;  %v8163_v22 = vld [vmem:[%s9736_s30 + $0x58] sm:$0xff]  }
 0x174   :  { %v599_v10 = vpop.f32.mrb[12].mxu0  ;;  %v642_v13 = vpop.f32.mrb[12].mxu1 }
 0x175   :  { %v674_v14 = vmul.f32 %v657_v5, %v599_v10  ;;  %v676_v15 = vmul.f32 %v665_v8, %v642_v13  ;;  %v601_v16 = vpop.f32.mrb[13].mxu0  ;;  %v644_v17 = vpop.f32.mrb[13].mxu1  ;;  %v7305_v13 = vld [vmem:[%s9735_s3 + $0x6] ss:$8 sm:$0xf] }
 0x176   :  { %v675_v18 = vmul.f32 %v661_v7, %v601_v16  ;;  %v677_v19 = vmul.f32 %v669_v9, %v644_v17  ;;  %v603_v20 = vpop.f32.mrb[14].mxu0  ;;  %v646_v21 = vpop.f32.mrb[14].mxu1 }
 0x177   :  { %v682_v23 = vadd.f32 %v674_v14, %v529_v57  ;;  %v684_v24 = vadd.f32 %v676_v15, %v531_v58  ;;  %v678_v25 = vmul.f32 %v657_v5, %v603_v20  ;;  %v680_v26 = vmul.f32 %v665_v8, %v646_v21  ;;  %v605_v27 = vpop.f32.mrb[15].mxu0  ;;  %v648_v28 = vpop.f32.mrb[15].mxu1 }
 0x178   :  { %v683_v29 = vadd.f32 %v675_v18, %v530_v63  ;;  %v685_v30 = vadd.f32 %v677_v19, %v532_v0  ;;  %v679_v31 = vmul.f32 %v661_v7, %v605_v27  ;;  %v681_v32 = vmul.f32 %v669_v9, %v648_v28 }
 0x179   :  { %v686_v33 = vadd.f32 %v678_v25, %v533_v2  ;;  %v688_v34 = vadd.f32 %v680_v26, %v535_v4  ;;  %v963_v4 = vrot.slane %v7299_v55, %v8835_v49  ;;  %v971_v5 = vrot.slane %v7299_v55, %v8837_v50 }
 0x17a   :  { %v687_v37 = vadd.f32 %v679_v31, %v534_v11  ;;  %v689_v38 = vadd.f32 %v681_v32, %v536_v6  ;;  %v967_v6 = vrot.slane %v7299_v55, %v8839_v51  ;;  %v975_v7 = vrot.slane %v7299_v55, %v8841_v52 }
 0x17c   :  { %v752_v41 = vpop.f32.mrb[16].mxu0  ;;  %v795_v42 = vpop.f32.mrb[16].mxu1 }
 0x17d   :  { %v827_v43 = vmul.f32 %v810_v35, %v752_v41  ;;  %v829_v44 = vmul.f32 %v818_v36, %v795_v42  ;;  %v754_v46 = vpop.f32.mrb[17].mxu0  ;;  %v797_v47 = vpop.f32.mrb[17].mxu1  ;;  %v1120_v42 = vrot.slane %v7305_v13, %v8839_v51 }
 0x17e   :  { %v828_v48 = vmul.f32 %v814_v39, %v754_v46  ;;  %v830_v3 = vmul.f32 %v822_v40, %v797_v47  ;;  %v756_v53 = vpop.f32.mrb[18].mxu0  ;;  %v799_v54 = vpop.f32.mrb[18].mxu1  ;;  %v7311_v46 = vld [vmem:[%s9735_s3 + $0x7] ss:$8 sm:$0xf] }
 0x17f   :  { %v835_v56 = vadd.f32 %v827_v43, %v682_v23  ;;  %v837_v57 = vadd.f32 %v829_v44, %v684_v24  ;;  %v831_v58 = vmul.f32 %v810_v35, %v756_v53  ;;  %v833_v59 = vmul.f32 %v818_v36, %v799_v54  ;;  %v758_v60 = vpop.f32.mrb[19].mxu0  ;;  %v801_v61 = vpop.f32.mrb[19].mxu1  ;;  %v8152_v23 = vld [vmem:[%s9736_s30 + $0xc0] sm:$0xff]   ;;  %v8155_v44 = vld [vmem:[%s9736_s30 + $0x48] sm:$0xff]  }
 0x180   :  { %v836_v62 = vadd.f32 %v828_v48, %v683_v29  ;;  %v838_v63 = vadd.f32 %v830_v3, %v685_v30  ;;  %v832_v0 = vmul.f32 %v814_v39, %v758_v60  ;;  %v834_v1 = vmul.f32 %v822_v40, %v801_v61  ;;  %7686 = vmatprep.subr.bf16.mxu1 %v8152_v23  ;;  %v8154_v39 = vld [vmem:[%s9736_s30 + $0x80] sm:$0xff]   ;;  %v8156_v47 = vld [vmem:[%s9736_s30 + $0xc8] sm:$0xff]  }
 0x181   :  { %v839_v12 = vadd.f32 %v831_v58, %v686_v33  ;;  %v841_v2 = vadd.f32 %v833_v59, %v688_v34  ;;  %v8153_v34 = vld [vmem:[%s9736_s30] sm:$0xff]   ;;  %v1128_v43 = vrot.slane %v7305_v13, %v8841_v52  ;;  %7687 = vmatpush3.bf16.msra.mxu1 %v8154_v39  ;;  %v8158_v58 = vld [vmem:[%s9736_s30 + $0x88] sm:$0xff]  }
 0x182   :  { %v840_v8 = vadd.f32 %v832_v0, %v687_v37  ;;  %v842_v11 = vadd.f32 %v834_v1, %v689_v38  ;;  %v1116_v37 = vrot.slane %v7305_v13, %v8835_v49  ;;  %v1124_v38 = vrot.slane %v7305_v13, %v8837_v50  ;;  %7665 = vmatpush3.bf16.msra.mxu0 %v8153_v34 }
 0x183   :  { %7666 = vmatprep.subr.bf16.mxu0 %v8155_v44  ;;  %7688 = vmatprep.subr.bf16.mxu1 %v8156_v47 }
 0x184   :  { %v905_v9 = vpop.f32.mrb[20].mxu0  ;;  %v948_v10 = vpop.f32.mrb[20].mxu1 }
 0x185   :  { %v980_v14 = vmul.f32 %v963_v4, %v905_v9  ;;  %v982_v15 = vmul.f32 %v971_v5, %v948_v10  ;;  %v907_v16 = vpop.f32.mrb[21].mxu0  ;;  %v950_v17 = vpop.f32.mrb[21].mxu1  ;;  %7689 = vmatpush3.bf16.msra.mxu1 %v8158_v58 }
 0x186   :  { %v981_v18 = vmul.f32 %v967_v6, %v907_v16  ;;  %v983_v19 = vmul.f32 %v975_v7, %v950_v17  ;;  %v909_v20 = vpop.f32.mrb[22].mxu0  ;;  %v952_v21 = vpop.f32.mrb[22].mxu1  ;;  %v8161_v16 = vld [vmem:[%s9736_s30 + $0x10] sm:$0xff]  }
 0x187   :  { %v988_v24 = vadd.f32 %v980_v14, %v835_v56  ;;  %v990_v25 = vadd.f32 %v982_v15, %v837_v57  ;;  %v984_v26 = vmul.f32 %v963_v4, %v909_v20  ;;  %v986_v27 = vmul.f32 %v971_v5, %v952_v21  ;;  %v911_v28 = vpop.f32.mrb[23].mxu0  ;;  %v954_v29 = vpop.f32.mrb[23].mxu1  ;;  %v8157_v57 = vld [vmem:[%s9736_s30 + $0x8] sm:$0xff]   ;;  %v8162_v21 = vld [vmem:[%s9736_s30 + $0x90] sm:$0xff]  }
 0x188   :  { %v989_v30 = vadd.f32 %v981_v18, %v836_v62  ;;  %v991_v31 = vadd.f32 %v983_v19, %v838_v63  ;;  %v985_v32 = vmul.f32 %v967_v6, %v911_v28  ;;  %v987_v33 = vmul.f32 %v975_v7, %v954_v29  ;;  %7667 = vmatpush3.bf16.msra.mxu0 %v8157_v57 }
 0x189   :  { %v992_v35 = vadd.f32 %v984_v26, %v839_v12  ;;  %v994_v36 = vadd.f32 %v986_v27, %v841_v2  ;;  %v1269_v63 = vrot.slane %v7311_v46, %v8835_v49  ;;  %v1277_v15 = vrot.slane %v7311_v46, %v8837_v50  ;;  %v8165_v26 = vld [vmem:[%s9736_s30 + $0x18] sm:$0xff]  }
 0x18a   :  { %v993_v40 = vadd.f32 %v985_v32, %v840_v8  ;;  %v995_v41 = vadd.f32 %v987_v33, %v842_v11  ;;  %v8159_v8 = vld [vmem:[%s9736_s30 + $0x50] sm:$0xff]   ;;  %v1273_v19 = vrot.slane %v7311_v46, %v8839_v51  ;;  %v1281_v20 = vrot.slane %v7311_v46, %v8841_v52  ;;  %v8166_v32 = vld [vmem:[%s9736_s30 + $0x98] sm:$0xff]  }
 0x18b   :  { %v8160_v11 = vld [vmem:[%s9736_s30 + $0xd0] sm:$0xff]   ;;  %7668 = vmatprep.subr.bf16.mxu0 %v8159_v8  ;;  %v8171_v8 = vld [vmem:[%s9736_s30 + $0x68] sm:$0xff]  }
 0x18c   :  { %v1058_v48 = vpop.f32.mrb[24].mxu0  ;;  %v1101_v3 = vpop.f32.mrb[24].mxu1  ;;  %7690 = vmatprep.subr.bf16.mxu1 %v8160_v11  ;;  %7669 = vmatpush3.bf16.msra.mxu0 %v8161_v16  ;;  %v8172_v11 = vld [vmem:[%s9736_s30 + $0xe8] sm:$0xff]  }
 0x18d   :  { %v1133_v53 = vmul.f32 %v1116_v37, %v1058_v48  ;;  %v1135_v54 = vmul.f32 %v1124_v38, %v1101_v3  ;;  %v1060_v55 = vpop.f32.mrb[25].mxu0  ;;  %v1103_v56 = vpop.f32.mrb[25].mxu1  ;;  %7691 = vmatpush3.bf16.msra.mxu1 %v8162_v21  ;;  %7670 = vmatprep.subr.bf16.mxu0 %v8163_v22  ;;  %v8167_v48 = vld [vmem:[%s9736_s30 + $0x60] sm:$0xff]  }
 0x18e   :  { %v1134_v59 = vmul.f32 %v1120_v42, %v1060_v55  ;;  %v1136_v60 = vmul.f32 %v1128_v43, %v1103_v56  ;;  %v1062_v61 = vpop.f32.mrb[26].mxu0  ;;  %v1105_v62 = vpop.f32.mrb[26].mxu1  ;;  %v8168_v56 = vld [vmem:[%s9736_s30 + $0xe0] sm:$0xff]  }
 0x18f   :  { %v1141_v0 = vadd.f32 %v1133_v53, %v988_v24  ;;  %v1143_v1 = vadd.f32 %v1135_v54, %v990_v25  ;;  %v1137_v12 = vmul.f32 %v1116_v37, %v1062_v61  ;;  %v1139_v2 = vmul.f32 %v1124_v38, %v1105_v62  ;;  %v1064_v4 = vpop.f32.mrb[27].mxu0  ;;  %v1107_v5 = vpop.f32.mrb[27].mxu1  ;;  %v8164_v25 = vld [vmem:[%s9736_s30 + $0xd8] sm:$0xff]   ;;  %v8169_v61 = vld [vmem:[%s9736_s30 + $0x20] sm:$0xff]  }
 0x190   :  { %v1142_v6 = vadd.f32 %v1134_v59, %v989_v30  ;;  %v1144_v7 = vadd.f32 %v1136_v60, %v991_v31  ;;  %v1138_v9 = vmul.f32 %v1120_v42, %v1064_v4  ;;  %v1140_v10 = vmul.f32 %v1128_v43, %v1107_v5  ;;  %v7317_v31 = vld [vmem:[%s9735_s3 + $0x20] ss:$8 sm:$0xf]  ;;  %7692 = vmatprep.subr.bf16.mxu1 %v8164_v25 }
 0x191   :  { %v1145_v13 = vadd.f32 %v1137_v12, %v992_v35  ;;  %v1147_v14 = vadd.f32 %v1139_v2, %v994_v36  ;;  %7671 = vmatpush3.bf16.msra.mxu0 %v8165_v26  ;;  %7693 = vmatpush3.bf16.msra.mxu1 %v8166_v32  ;;  %v1422_v54 = vrot.slane %v7317_v31, %v8835_v49  ;;  %v8170_v62 = vld [vmem:[%s9736_s30 + $0xa0] sm:$0xff]  }
 0x192   :  { %v1146_v17 = vadd.f32 %v1138_v9, %v993_v40  ;;  %v1148_v18 = vadd.f32 %v1140_v10, %v995_v41  ;;  %v1430_v55 = vrot.slane %v7317_v31, %v8837_v50  ;;  %v1426_v59 = vrot.slane %v7317_v31, %v8839_v51  ;;  %7672 = vmatprep.subr.bf16.mxu0 %v8167_v48 }
 0x193   :  { %v1434_v60 = vrot.slane %v7317_v31, %v8841_v52  ;;  %7694 = vmatprep.subr.bf16.mxu1 %v8168_v56 }
 0x194   :  { %v1211_v23 = vpop.f32.mrb[28].mxu0  ;;  %v1254_v24 = vpop.f32.mrb[28].mxu1 }
 0x195   :  { %v1286_v27 = vmul.f32 %v1269_v63, %v1211_v23  ;;  %v1288_v28 = vmul.f32 %v1277_v15, %v1254_v24  ;;  %v1213_v29 = vpop.f32.mrb[29].mxu0  ;;  %v1256_v30 = vpop.f32.mrb[29].mxu1  ;;  %7673 = vmatpush3.bf16.msra.mxu0 %v8169_v61  ;;  %7695 = vmatpush3.bf16.msra.mxu1 %v8170_v62 }
 0x196   :  { %v1287_v33 = vmul.f32 %v1273_v19, %v1213_v29  ;;  %v1289_v34 = vmul.f32 %v1281_v20, %v1256_v30  ;;  %v1215_v35 = vpop.f32.mrb[30].mxu0  ;;  %v1258_v36 = vpop.f32.mrb[30].mxu1  ;;  %7674 = vmatprep.subr.bf16.mxu0 %v8171_v8  ;;  %7696 = vmatprep.subr.bf16.mxu1 %v8172_v11 }
 0x197   :  { %v1294_v37 = vadd.f32 %v1286_v27, %v1141_v0  ;;  %v1296_v38 = vadd.f32 %v1288_v28, %v1143_v1  ;;  %v1290_v39 = vmul.f32 %v1269_v63, %v1215_v35  ;;  %v1292_v40 = vmul.f32 %v1277_v15, %v1258_v36  ;;  %v1217_v41 = vpop.f32.mrb[31].mxu0  ;;  %v1260_v42 = vpop.f32.mrb[31].mxu1  ;;  %v7323_v1 = vld [vmem:[%s9735_s3 + $0x21] ss:$8 sm:$0xf] }
 0x198   :  { %v1295_v43 = vadd.f32 %v1287_v33, %v1142_v6  ;;  %v1297_v44 = vadd.f32 %v1289_v34, %v1144_v7  ;;  %v1291_v46 = vmul.f32 %v1273_v19, %v1217_v41  ;;  %v1293_v47 = vmul.f32 %v1281_v20, %v1260_v42  ;;  %v8173_v19 = vld [vmem:[%s9736_s30 + $0x28] sm:$0xff]   ;;  %v8175_v33 = vld [vmem:[%s9736_s30 + $0x70] sm:$0xff]  }
 0x199   :  { %v1298_v3 = vadd.f32 %v1290_v39, %v1145_v13  ;;  %v1300_v53 = vadd.f32 %v1292_v40, %v1147_v14  ;;  %v1575_v26 = vrot.slane %v7323_v1, %v8835_v49  ;;  %v1583_v27 = vrot.slane %v7323_v1, %v8837_v50  ;;  %7675 = vmatpush3.bf16.msra.mxu0 %v8173_v19  ;;  %v8174_v28 = vld [vmem:[%s9736_s30 + $0xa8] sm:$0xff]   ;;  %v8176_v34 = vld [vmem:[%s9736_s30 + $0xf0] sm:$0xff]  }
 0x19a   :  { %v1299_v57 = vadd.f32 %v1291_v46, %v1146_v17  ;;  %v1301_v58 = vadd.f32 %v1293_v47, %v1148_v18  ;;  %v1579_v31 = vrot.slane %v7323_v1, %v8839_v51  ;;  %v1587_v32 = vrot.slane %v7323_v1, %v8841_v52  ;;  %7697 = vmatpush3.bf16.msra.mxu1 %v8174_v28  ;;  %v8178_v39 = vld [vmem:[%s9736_s30 + $0xb0] sm:$0xff]  }
 0x19b   :  { %7676 = vmatprep.subr.bf16.mxu0 %v8175_v33  ;;  %7698 = vmatprep.subr.bf16.mxu1 %v8176_v34 }
 0x19c   :  { %v1364_v63 = vpop.f32.mrb[32].mxu0  ;;  %v1407_v0 = vpop.f32.mrb[32].mxu1 }
 0x19d   :  { %v1439_v12 = vmul.f32 %v1422_v54, %v1364_v63  ;;  %v1441_v2 = vmul.f32 %v1430_v55, %v1407_v0  ;;  %v1366_v4 = vpop.f32.mrb[33].mxu0  ;;  %v1409_v5 = vpop.f32.mrb[33].mxu1  ;;  %v8181_v0 = vld [vmem:[%s9736_s30 + $0x38] sm:$0xff]  }
 0x19e   :  { %v1440_v6 = vmul.f32 %v1426_v59, %v1366_v4  ;;  %v1442_v7 = vmul.f32 %v1434_v60, %v1409_v5  ;;  %v1368_v9 = vpop.f32.mrb[34].mxu0  ;;  %v1411_v10 = vpop.f32.mrb[34].mxu1  ;;  %7699 = vmatpush3.bf16.msra.mxu1 %v8178_v39  ;;  %v8182_v5 = vld [vmem:[%s9736_s30 + $0xb8] sm:$0xff]  }
 0x19f   :  { %v1447_v13 = vadd.f32 %v1439_v12, %v1294_v37  ;;  %v1449_v14 = vadd.f32 %v1441_v2, %v1296_v38  ;;  %v1443_v15 = vmul.f32 %v1422_v54, %v1368_v9  ;;  %v1445_v16 = vmul.f32 %v1430_v55, %v1411_v10  ;;  %v1370_v17 = vpop.f32.mrb[35].mxu0  ;;  %v1413_v18 = vpop.f32.mrb[35].mxu1  ;;  %v7329_v37 = vld [vmem:[%s9735_s3 + $0x22] ss:$8 sm:$0xf] }
 0x1a0   :  { %v1448_v20 = vadd.f32 %v1440_v6, %v1295_v43  ;;  %v1450_v21 = vadd.f32 %v1442_v7, %v1297_v44  ;;  %v1444_v22 = vmul.f32 %v1426_v59, %v1370_v17  ;;  %v1446_v23 = vmul.f32 %v1434_v60, %v1413_v18  ;;  %v8177_v38 = vld [vmem:[%s9736_s30 + $0x30] sm:$0xff]   ;;  %v3954_v9 = vld [vmem:[%s9695_s2] sm:$0xff]  ;;  %v3955_v10 = vld [vmem:[%s9695_s2 + $0x8] sm:$0xff]  ;;  %s9728_s2 = smov 120  }
 0x1a1   :  { %v1451_v24 = vadd.f32 %v1443_v15, %v1298_v3  ;;  %v1453_v25 = vadd.f32 %v1445_v16, %v1300_v53  ;;  %7677 = vmatpush3.bf16.msra.mxu0 %v8177_v38  ;;  %v8179_v3 = vld [vmem:[%s9736_s30 + $0x78] sm:$0xff]   ;;  %v1728_v2 = vrot.slane %v7329_v37, %v8835_v49  ;;  %v1736_v4 = vrot.slane %v7329_v37, %v8837_v50 }
 0x1a2   :  { %v1452_v29 = vadd.f32 %v1444_v22, %v1299_v57  ;;  %v1454_v30 = vadd.f32 %v1446_v23, %v1301_v58  ;;  %v8180_v53 = vld [vmem:[%s9736_s30 + $0xf8] sm:$0xff]   ;;  %7678 = vmatprep.subr.bf16.mxu0 %v8179_v3  ;;  %v1732_v6 = vrot.slane %v7329_v37, %v8839_v51  ;;  %v1740_v7 = vrot.slane %v7329_v37, %v8841_v52  ;;  %s8275_s30 = smov 122  }
 0x1a3   :  { %7700 = vmatprep.subr.bf16.mxu1 %v8180_v53  ;;  %3958 = vperm.xlu0 %8124, %v3954_v9   ;;  %v7335_v23 = vld [vmem:[%s9735_s3 + $0x23] ss:$8 sm:$0xf] }
 0x1a4   :  { %v1517_v35 = vpop.f32.mrb[36].mxu0  ;;  %v1560_v36 = vpop.f32.mrb[36].mxu1  ;;  %7701 = vmatpush3.bf16.msra.mxu1 %v8182_v5  ;;  %3963 = vperm.xlu1 %8125, %v3955_v10   ;;  %v1889_v37 = vrot.slane %v7335_v23, %v8837_v50 }
 0x1a5   :  { %v1592_v40 = vmul.f32 %v1575_v26, %v1517_v35  ;;  %v1594_v41 = vmul.f32 %v1583_v27, %v1560_v36  ;;  %v1519_v42 = vpop.f32.mrb[37].mxu0  ;;  %v1562_v43 = vpop.f32.mrb[37].mxu1  ;;  %7679 = vmatpush3.bf16.msra.mxu0 %v8181_v0  ;;  %v1881_v36 = vrot.slane %v7335_v23, %v8835_v49 }
 0x1a6   :  { %v1593_v44 = vmul.f32 %v1579_v31, %v1519_v42  ;;  %v1595_v46 = vmul.f32 %v1587_v32, %v1562_v43  ;;  %v1521_v47 = vpop.f32.mrb[38].mxu0  ;;  %v1564_v48 = vpop.f32.mrb[38].mxu1 }
 0x1a7   :  { %v1600_v54 = vadd.f32 %v1592_v40, %v1447_v13  ;;  %v1602_v55 = vadd.f32 %v1594_v41, %v1449_v14  ;;  %v1596_v56 = vmul.f32 %v1575_v26, %v1521_v47  ;;  %v1598_v57 = vmul.f32 %v1583_v27, %v1564_v48  ;;  %v1523_v58 = vpop.f32.mrb[39].mxu0  ;;  %v1566_v59 = vpop.f32.mrb[39].mxu1 }
 0x1a8   :  { %v1601_v60 = vadd.f32 %v1593_v44, %v1448_v20  ;;  %v1603_v61 = vadd.f32 %v1595_v46, %v1450_v21  ;;  %v1597_v62 = vmul.f32 %v1579_v31, %v1523_v58  ;;  %v1599_v63 = vmul.f32 %v1587_v32, %v1566_v59 }
 0x1a9   :  { %v1604_v1 = vadd.f32 %v1596_v56, %v1451_v24  ;;  %v1606_v12 = vadd.f32 %v1598_v57, %v1453_v25  ;;  %v1885_v40 = vrot.slane %v7335_v23, %v8839_v51  ;;  %v1893_v41 = vrot.slane %v7335_v23, %v8841_v52  ;;  %v7341_v56 = vld [vmem:[%s9735_s3 + $0x24] ss:$8 sm:$0xf] }
 0x1aa   :  { %v1605_v8 = vadd.f32 %v1597_v62, %v1452_v29  ;;  %v1607_v11 = vadd.f32 %v1599_v63, %v1454_v30  ;;  %v2017_v5 = vrot.slane %v7341_v56, %v8835_v49  ;;  %v2029_v9 = vrot.slane %v7341_v56, %v8841_v52 }
 0x1ac   :  { %v1670_v13 = vpop.f32.mrb[40].mxu0  ;;  %v1713_v14 = vpop.f32.mrb[40].mxu1 }
 0x1ad   :  { %v1745_v15 = vmul.f32 %v1728_v2, %v1670_v13  ;;  %v1747_v16 = vmul.f32 %v1736_v4, %v1713_v14  ;;  %v1672_v17 = vpop.f32.mrb[41].mxu0  ;;  %v1715_v18 = vpop.f32.mrb[41].mxu1 }
 0x1ae   :  { %v1746_v19 = vmul.f32 %v1732_v6, %v1672_v17  ;;  %v1748_v20 = vmul.f32 %v1740_v7, %v1715_v18  ;;  %v1674_v21 = vpop.f32.mrb[42].mxu0  ;;  %v1717_v22 = vpop.f32.mrb[42].mxu1 }
 0x1af   :  { %v1753_v24 = vadd.f32 %v1745_v15, %v1600_v54  ;;  %v1755_v25 = vadd.f32 %v1747_v16, %v1602_v55  ;;  %v1749_v26 = vmul.f32 %v1728_v2, %v1674_v21  ;;  %v1751_v27 = vmul.f32 %v1736_v4, %v1717_v22  ;;  %v1676_v28 = vpop.f32.mrb[43].mxu0  ;;  %v1719_v29 = vpop.f32.mrb[43].mxu1  ;;  %v7347_v22 = vld [vmem:[%s9735_s3 + $0x25] ss:$8 sm:$0xf] }
 0x1b0   :  { %v1754_v30 = vadd.f32 %v1746_v19, %v1601_v60  ;;  %v1756_v31 = vadd.f32 %v1748_v20, %v1603_v61  ;;  %v1750_v32 = vmul.f32 %v1732_v6, %v1676_v28  ;;  %v1752_v33 = vmul.f32 %v1740_v7, %v1719_v29 }
 0x1b1   :  { %v1757_v34 = vadd.f32 %v1749_v26, %v1604_v1  ;;  %v1759_v35 = vadd.f32 %v1751_v27, %v1606_v12  ;;  %v2021_v7 = vrot.slane %v7341_v56, %v8839_v51 }
 0x1b2   :  { %v1758_v38 = vadd.f32 %v1750_v32, %v1605_v8  ;;  %v1760_v39 = vadd.f32 %v1752_v33, %v1607_v11  ;;  %v2025_v8 = vrot.slane %v7341_v56, %v8837_v50 }
 0x1b4   :  { %v1823_v42 = vpop.f32.mrb[44].mxu0  ;;  %v1866_v43 = vpop.f32.mrb[44].mxu1 }
 0x1b5   :  { %v1898_v44 = vmul.f32 %v1881_v36, %v1823_v42  ;;  %v1900_v46 = vmul.f32 %v1889_v37, %v1866_v43  ;;  %v1825_v47 = vpop.f32.mrb[45].mxu0  ;;  %v1868_v48 = vpop.f32.mrb[45].mxu1 }
 0x1b6   :  { %v1899_v3 = vmul.f32 %v1885_v40, %v1825_v47  ;;  %v1901_v53 = vmul.f32 %v1893_v41, %v1868_v48  ;;  %v1827_v54 = vpop.f32.mrb[46].mxu0  ;;  %v1870_v55 = vpop.f32.mrb[46].mxu1 }
 0x1b7   :  { %v1906_v57 = vadd.f32 %v1898_v44, %v1753_v24  ;;  %v1908_v58 = vadd.f32 %v1900_v46, %v1755_v25  ;;  %v1902_v59 = vmul.f32 %v1881_v36, %v1827_v54  ;;  %v1904_v60 = vmul.f32 %v1889_v37, %v1870_v55  ;;  %v1829_v61 = vpop.f32.mrb[47].mxu0  ;;  %v1872_v62 = vpop.f32.mrb[47].mxu1  ;;  %v7353_v55 = vld [vmem:[%s9735_s3 + $0x26] ss:$8 sm:$0xf] }
 0x1b8   :  { %v1907_v63 = vadd.f32 %v1899_v3, %v1754_v30  ;;  %v1909_v0 = vadd.f32 %v1901_v53, %v1756_v31  ;;  %v1903_v1 = vmul.f32 %v1885_v40, %v1829_v61  ;;  %v1905_v12 = vmul.f32 %v1893_v41, %v1872_v62 }
 0x1b9   :  { %v1910_v2 = vadd.f32 %v1902_v59, %v1757_v34  ;;  %v1912_v4 = vadd.f32 %v1904_v60, %v1759_v35  ;;  %v2170_v35 = vrot.slane %v7347_v22, %v8835_v49  ;;  %v2178_v36 = vrot.slane %v7347_v22, %v8837_v50 }
 0x1ba   :  { %v1911_v11 = vadd.f32 %v1903_v1, %v1758_v38  ;;  %v1913_v6 = vadd.f32 %v1905_v12, %v1760_v39  ;;  %v2174_v39 = vrot.slane %v7347_v22, %v8839_v51  ;;  %v2182_v40 = vrot.slane %v7347_v22, %v8841_v52 }
 0x1bc   :  { %v1959_v10 = vpop.f32.mrb[48].mxu0  ;;  %v2002_v13 = vpop.f32.mrb[48].mxu1 }
 0x1bd   :  { %v2034_v14 = vmul.f32 %v2017_v5, %v1959_v10  ;;  %v2036_v15 = vmul.f32 %v2025_v8, %v2002_v13  ;;  %v1961_v16 = vpop.f32.mrb[49].mxu0  ;;  %v2004_v17 = vpop.f32.mrb[49].mxu1 }
 0x1be   :  { %v2035_v18 = vmul.f32 %v2021_v7, %v1961_v16  ;;  %v2037_v19 = vmul.f32 %v2029_v9, %v2004_v17  ;;  %v1963_v20 = vpop.f32.mrb[50].mxu0  ;;  %v2006_v21 = vpop.f32.mrb[50].mxu1 }
 0x1bf   :  { %v2042_v23 = vadd.f32 %v2034_v14, %v1906_v57  ;;  %v2044_v24 = vadd.f32 %v2036_v15, %v1908_v58  ;;  %v2038_v25 = vmul.f32 %v2017_v5, %v1963_v20  ;;  %v2040_v26 = vmul.f32 %v2025_v8, %v2006_v21  ;;  %v1965_v27 = vpop.f32.mrb[51].mxu0  ;;  %v2008_v28 = vpop.f32.mrb[51].mxu1  ;;  %v7359_v21 = vld [vmem:[%s9735_s3 + $0x27] ss:$8 sm:$0xf] }
 0x1c0   :  { %v2043_v29 = vadd.f32 %v2035_v18, %v1907_v63  ;;  %v2045_v30 = vadd.f32 %v2037_v19, %v1909_v0  ;;  %v2039_v31 = vmul.f32 %v2021_v7, %v1965_v27  ;;  %v2041_v32 = vmul.f32 %v2029_v9, %v2008_v28 }
 0x1c1   :  { %v2046_v33 = vadd.f32 %v2038_v25, %v1910_v2  ;;  %v2048_v34 = vadd.f32 %v2040_v26, %v1912_v4  ;;  %v2323_v4 = vrot.slane %v7353_v55, %v8835_v49  ;;  %v2331_v5 = vrot.slane %v7353_v55, %v8837_v50 }
 0x1c2   :  { %v2047_v37 = vadd.f32 %v2039_v31, %v1911_v11  ;;  %v2049_v38 = vadd.f32 %v2041_v32, %v1913_v6  ;;  %v2327_v6 = vrot.slane %v7353_v55, %v8839_v51  ;;  %v2335_v7 = vrot.slane %v7353_v55, %v8841_v52 }
 0x1c4   :  { %v2112_v41 = vpop.f32.mrb[52].mxu0  ;;  %v2155_v42 = vpop.f32.mrb[52].mxu1 }
 0x1c5   :  { %v2187_v43 = vmul.f32 %v2170_v35, %v2112_v41  ;;  %v2189_v44 = vmul.f32 %v2178_v36, %v2155_v42  ;;  %v2114_v46 = vpop.f32.mrb[53].mxu0  ;;  %v2157_v47 = vpop.f32.mrb[53].mxu1 }
 0x1c6   :  { %v2188_v48 = vmul.f32 %v2174_v39, %v2114_v46  ;;  %v2190_v3 = vmul.f32 %v2182_v40, %v2157_v47  ;;  %v2116_v53 = vpop.f32.mrb[54].mxu0  ;;  %v2159_v54 = vpop.f32.mrb[54].mxu1 }
 0x1c7   :  { %v2195_v56 = vadd.f32 %v2187_v43, %v2042_v23  ;;  %v2197_v57 = vadd.f32 %v2189_v44, %v2044_v24  ;;  %v2191_v58 = vmul.f32 %v2170_v35, %v2116_v53  ;;  %v2193_v59 = vmul.f32 %v2178_v36, %v2159_v54  ;;  %v2118_v60 = vpop.f32.mrb[55].mxu0  ;;  %v2161_v61 = vpop.f32.mrb[55].mxu1  ;;  %v7365_v54 = vld [vmem:[%s9735_s3 + $0x40] ss:$8 sm:$0xf] }
 0x1c8   :  { %v2196_v62 = vadd.f32 %v2188_v48, %v2043_v29  ;;  %v2198_v63 = vadd.f32 %v2190_v3, %v2045_v30  ;;  %v2192_v0 = vmul.f32 %v2174_v39, %v2118_v60  ;;  %v2194_v1 = vmul.f32 %v2182_v40, %v2161_v61 }
 0x1c9   :  { %v2199_v12 = vadd.f32 %v2191_v58, %v2046_v33  ;;  %v2201_v2 = vadd.f32 %v2193_v59, %v2048_v34  ;;  %v2476_v34 = vrot.slane %v7359_v21, %v8835_v49  ;;  %v2484_v35 = vrot.slane %v7359_v21, %v8837_v50 }
 0x1ca   :  { %v2200_v8 = vadd.f32 %v2192_v0, %v2047_v37  ;;  %v2202_v11 = vadd.f32 %v2194_v1, %v2049_v38  ;;  %v2480_v38 = vrot.slane %v7359_v21, %v8839_v51  ;;  %v2488_v39 = vrot.slane %v7359_v21, %v8841_v52 }
 0x1cc   :  { %v2265_v9 = vpop.f32.mrb[56].mxu0  ;;  %v2308_v10 = vpop.f32.mrb[56].mxu1 }
 0x1cd   :  { %v2340_v13 = vmul.f32 %v2323_v4, %v2265_v9  ;;  %v2342_v14 = vmul.f32 %v2331_v5, %v2308_v10  ;;  %v2267_v15 = vpop.f32.mrb[57].mxu0  ;;  %v2310_v16 = vpop.f32.mrb[57].mxu1 }
 0x1ce   :  { %v2341_v17 = vmul.f32 %v2327_v6, %v2267_v15  ;;  %v2343_v18 = vmul.f32 %v2335_v7, %v2310_v16  ;;  %v2269_v19 = vpop.f32.mrb[58].mxu0  ;;  %v2312_v20 = vpop.f32.mrb[58].mxu1 }
 0x1cf   :  { %v2348_v22 = vadd.f32 %v2340_v13, %v2195_v56  ;;  %v2350_v23 = vadd.f32 %v2342_v14, %v2197_v57  ;;  %v2344_v24 = vmul.f32 %v2323_v4, %v2269_v19  ;;  %v2346_v25 = vmul.f32 %v2331_v5, %v2312_v20  ;;  %v2271_v26 = vpop.f32.mrb[59].mxu0  ;;  %v2314_v27 = vpop.f32.mrb[59].mxu1  ;;  %v7371_v20 = vld [vmem:[%s9735_s3 + $0x41] ss:$8 sm:$0xf] }
 0x1d0   :  { %v2349_v28 = vadd.f32 %v2341_v17, %v2196_v62  ;;  %v2351_v29 = vadd.f32 %v2343_v18, %v2198_v63  ;;  %v2345_v30 = vmul.f32 %v2327_v6, %v2271_v26  ;;  %v2347_v31 = vmul.f32 %v2335_v7, %v2314_v27 }
 0x1d1   :  { %v2352_v32 = vadd.f32 %v2344_v24, %v2199_v12  ;;  %v2354_v33 = vadd.f32 %v2346_v25, %v2201_v2  ;;  %v2629_v2 = vrot.slane %v7365_v54, %v8835_v49  ;;  %v2637_v4 = vrot.slane %v7365_v54, %v8837_v50 }
 0x1d2   :  { %v2353_v36 = vadd.f32 %v2345_v30, %v2200_v8  ;;  %v2355_v37 = vadd.f32 %v2347_v31, %v2202_v11  ;;  %v2633_v11 = vrot.slane %v7365_v54, %v8839_v51  ;;  %v2641_v6 = vrot.slane %v7365_v54, %v8841_v52 }
 0x1d4   :  { %v2418_v40 = vpop.f32.mrb[60].mxu0  ;;  %v2461_v41 = vpop.f32.mrb[60].mxu1 }
 0x1d5   :  { %v2493_v42 = vmul.f32 %v2476_v34, %v2418_v40  ;;  %v2495_v43 = vmul.f32 %v2484_v35, %v2461_v41  ;;  %v2420_v44 = vpop.f32.mrb[61].mxu0  ;;  %v2463_v46 = vpop.f32.mrb[61].mxu1 }
 0x1d6   :  { %v2494_v47 = vmul.f32 %v2480_v38, %v2420_v44  ;;  %v2496_v48 = vmul.f32 %v2488_v39, %v2463_v46  ;;  %v2422_v3 = vpop.f32.mrb[62].mxu0  ;;  %v2465_v53 = vpop.f32.mrb[62].mxu1 }
 0x1d7   :  { %v2501_v55 = vadd.f32 %v2493_v42, %v2348_v22  ;;  %v2503_v56 = vadd.f32 %v2495_v43, %v2350_v23  ;;  %v2497_v57 = vmul.f32 %v2476_v34, %v2422_v3  ;;  %v2499_v58 = vmul.f32 %v2484_v35, %v2465_v53  ;;  %v2424_v59 = vpop.f32.mrb[63].mxu0  ;;  %v2467_v60 = vpop.f32.mrb[63].mxu1  ;;  %v7377_v53 = vld [vmem:[%s9735_s3 + $0x42] ss:$8 sm:$0xf] }
 0x1d8   :  { %v2502_v61 = vadd.f32 %v2494_v47, %v2349_v28  ;;  %v2504_v62 = vadd.f32 %v2496_v48, %v2351_v29  ;;  %v2498_v63 = vmul.f32 %v2480_v38, %v2424_v59  ;;  %v2500_v0 = vmul.f32 %v2488_v39, %v2467_v60 }
 0x1d9   :  { %v2505_v1 = vadd.f32 %v2497_v57, %v2352_v32  ;;  %v2507_v12 = vadd.f32 %v2499_v58, %v2354_v33  ;;  %v2782_v33 = vrot.slane %v7371_v20, %v8835_v49  ;;  %v2790_v34 = vrot.slane %v7371_v20, %v8837_v50 }
 0x1da   :  { %v2506_v5 = vadd.f32 %v2498_v63, %v2353_v36  ;;  %v2508_v8 = vadd.f32 %v2500_v0, %v2355_v37  ;;  %v2786_v37 = vrot.slane %v7371_v20, %v8839_v51  ;;  %v2794_v38 = vrot.slane %v7371_v20, %v8841_v52 }
 0x1dc   :  { %v2571_v7 = vpop.f32.mrb[64].mxu0  ;;  %v2614_v9 = vpop.f32.mrb[64].mxu1 }
 0x1dd   :  { %v2646_v10 = vmul.f32 %v2629_v2, %v2571_v7  ;;  %v2648_v13 = vmul.f32 %v2637_v4, %v2614_v9  ;;  %v2573_v14 = vpop.f32.mrb[65].mxu0  ;;  %v2616_v15 = vpop.f32.mrb[65].mxu1 }
 0x1de   :  { %v2647_v16 = vmul.f32 %v2633_v11, %v2573_v14  ;;  %v2649_v17 = vmul.f32 %v2641_v6, %v2616_v15  ;;  %v2575_v18 = vpop.f32.mrb[66].mxu0  ;;  %v2618_v19 = vpop.f32.mrb[66].mxu1 }
 0x1df   :  { %v2654_v21 = vadd.f32 %v2646_v10, %v2501_v55  ;;  %v2656_v22 = vadd.f32 %v2648_v13, %v2503_v56  ;;  %v2650_v23 = vmul.f32 %v2629_v2, %v2575_v18  ;;  %v2652_v24 = vmul.f32 %v2637_v4, %v2618_v19  ;;  %v2577_v25 = vpop.f32.mrb[67].mxu0  ;;  %v2620_v26 = vpop.f32.mrb[67].mxu1  ;;  %v7383_v19 = vld [vmem:[%s9735_s3 + $0x43] ss:$8 sm:$0xf] }
 0x1e0   :  { %v2655_v27 = vadd.f32 %v2647_v16, %v2502_v61  ;;  %v2657_v28 = vadd.f32 %v2649_v17, %v2504_v62  ;;  %v2651_v29 = vmul.f32 %v2633_v11, %v2577_v25  ;;  %v2653_v30 = vmul.f32 %v2641_v6, %v2620_v26 }
 0x1e1   :  { %v2658_v31 = vadd.f32 %v2650_v23, %v2505_v1  ;;  %v2660_v32 = vadd.f32 %v2652_v24, %v2507_v12  ;;  %v2935_v12 = vrot.slane %v7377_v53, %v8835_v49  ;;  %v2943_v2 = vrot.slane %v7377_v53, %v8837_v50 }
 0x1e2   :  { %v2659_v35 = vadd.f32 %v2651_v29, %v2506_v5  ;;  %v2661_v36 = vadd.f32 %v2653_v30, %v2508_v8  ;;  %v2939_v8 = vrot.slane %v7377_v53, %v8839_v51  ;;  %v2947_v11 = vrot.slane %v7377_v53, %v8841_v52 }
 0x1e4   :  { %v2724_v39 = vpop.f32.mrb[68].mxu0  ;;  %v2767_v40 = vpop.f32.mrb[68].mxu1 }
 0x1e5   :  { %v2799_v41 = vmul.f32 %v2782_v33, %v2724_v39  ;;  %v2801_v42 = vmul.f32 %v2790_v34, %v2767_v40  ;;  %v2726_v43 = vpop.f32.mrb[69].mxu0  ;;  %v2769_v44 = vpop.f32.mrb[69].mxu1 }
 0x1e6   :  { %v2800_v46 = vmul.f32 %v2786_v37, %v2726_v43  ;;  %v2802_v47 = vmul.f32 %v2794_v38, %v2769_v44  ;;  %v2728_v48 = vpop.f32.mrb[70].mxu0  ;;  %v2771_v3 = vpop.f32.mrb[70].mxu1 }
 0x1e7   :  { %v2807_v54 = vadd.f32 %v2799_v41, %v2654_v21  ;;  %v2809_v55 = vadd.f32 %v2801_v42, %v2656_v22  ;;  %v2803_v56 = vmul.f32 %v2782_v33, %v2728_v48  ;;  %v2805_v57 = vmul.f32 %v2790_v34, %v2771_v3  ;;  %v2730_v58 = vpop.f32.mrb[71].mxu0  ;;  %v2773_v59 = vpop.f32.mrb[71].mxu1  ;;  %v7389_v3 = vld [vmem:[%s9735_s3 + $0x44] ss:$8 sm:$0xf] }
 0x1e8   :  { %v2808_v60 = vadd.f32 %v2800_v46, %v2655_v27  ;;  %v2810_v61 = vadd.f32 %v2802_v47, %v2657_v28  ;;  %v2804_v62 = vmul.f32 %v2786_v37, %v2730_v58  ;;  %v2806_v63 = vmul.f32 %v2794_v38, %v2773_v59 }
 0x1e9   :  { %v2811_v0 = vadd.f32 %v2803_v56, %v2658_v31  ;;  %v2813_v1 = vadd.f32 %v2805_v57, %v2660_v32  ;;  %v3088_v32 = vrot.slane %v7383_v19, %v8835_v49  ;;  %v3096_v33 = vrot.slane %v7383_v19, %v8837_v50 }
 0x1ea   :  { %v2812_v4 = vadd.f32 %v2804_v62, %v2659_v35  ;;  %v2814_v5 = vadd.f32 %v2806_v63, %v2661_v36  ;;  %v3092_v36 = vrot.slane %v7383_v19, %v8839_v51  ;;  %v3100_v37 = vrot.slane %v7383_v19, %v8841_v52 }
 0x1ec   :  { %v2877_v6 = vpop.f32.mrb[72].mxu0  ;;  %v2920_v7 = vpop.f32.mrb[72].mxu1 }
 0x1ed   :  { %v2952_v9 = vmul.f32 %v2935_v12, %v2877_v6  ;;  %v2954_v10 = vmul.f32 %v2943_v2, %v2920_v7  ;;  %v2879_v13 = vpop.f32.mrb[73].mxu0  ;;  %v2922_v14 = vpop.f32.mrb[73].mxu1 }
 0x1ee   :  { %v2953_v15 = vmul.f32 %v2939_v8, %v2879_v13  ;;  %v2955_v16 = vmul.f32 %v2947_v11, %v2922_v14  ;;  %v2881_v17 = vpop.f32.mrb[74].mxu0  ;;  %v2924_v18 = vpop.f32.mrb[74].mxu1 }
 0x1ef   :  { %v2960_v20 = vadd.f32 %v2952_v9, %v2807_v54  ;;  %v2962_v21 = vadd.f32 %v2954_v10, %v2809_v55  ;;  %v2956_v22 = vmul.f32 %v2935_v12, %v2881_v17  ;;  %v2958_v23 = vmul.f32 %v2943_v2, %v2924_v18  ;;  %v2883_v24 = vpop.f32.mrb[75].mxu0  ;;  %v2926_v25 = vpop.f32.mrb[75].mxu1  ;;  %v7395_v18 = vld [vmem:[%s9735_s3 + $0x45] ss:$8 sm:$0xf] }
 0x1f0   :  { %v2961_v26 = vadd.f32 %v2953_v15, %v2808_v60  ;;  %v2963_v27 = vadd.f32 %v2955_v16, %v2810_v61  ;;  %v2957_v28 = vmul.f32 %v2939_v8, %v2883_v24  ;;  %v2959_v29 = vmul.f32 %v2947_v11, %v2926_v25 }
 0x1f1   :  { %v2964_v30 = vadd.f32 %v2956_v22, %v2811_v0  ;;  %v2966_v31 = vadd.f32 %v2958_v23, %v2813_v1  ;;  %v3241_v1 = vrot.slane %v7389_v3, %v8835_v49  ;;  %v3249_v12 = vrot.slane %v7389_v3, %v8837_v50 }
 0x1f2   :  { %v2965_v34 = vadd.f32 %v2957_v28, %v2812_v4  ;;  %v2967_v35 = vadd.f32 %v2959_v29, %v2814_v5  ;;  %v3245_v5 = vrot.slane %v7389_v3, %v8839_v51  ;;  %v3253_v8 = vrot.slane %v7389_v3, %v8841_v52 }
 0x1f4   :  { %v3030_v38 = vpop.f32.mrb[76].mxu0  ;;  %v3073_v39 = vpop.f32.mrb[76].mxu1 }
 0x1f5   :  { %v3105_v40 = vmul.f32 %v3088_v32, %v3030_v38  ;;  %v3107_v41 = vmul.f32 %v3096_v33, %v3073_v39  ;;  %v3032_v42 = vpop.f32.mrb[77].mxu0  ;;  %v3075_v43 = vpop.f32.mrb[77].mxu1 }
 0x1f6   :  { %v3106_v44 = vmul.f32 %v3092_v36, %v3032_v42  ;;  %v3108_v46 = vmul.f32 %v3100_v37, %v3075_v43  ;;  %v3034_v47 = vpop.f32.mrb[78].mxu0  ;;  %v3077_v48 = vpop.f32.mrb[78].mxu1 }
 0x1f7   :  { %v3113_v53 = vadd.f32 %v3105_v40, %v2960_v20  ;;  %v3115_v54 = vadd.f32 %v3107_v41, %v2962_v21  ;;  %v3109_v55 = vmul.f32 %v3088_v32, %v3034_v47  ;;  %v3111_v56 = vmul.f32 %v3096_v33, %v3077_v48  ;;  %v3036_v57 = vpop.f32.mrb[79].mxu0  ;;  %v3079_v58 = vpop.f32.mrb[79].mxu1  ;;  %v7401_v48 = vld [vmem:[%s9735_s3 + $0x46] ss:$8 sm:$0xf] }
 0x1f8   :  { %v3114_v59 = vadd.f32 %v3106_v44, %v2961_v26  ;;  %v3116_v60 = vadd.f32 %v3108_v46, %v2963_v27  ;;  %v3110_v61 = vmul.f32 %v3092_v36, %v3036_v57  ;;  %v3112_v62 = vmul.f32 %v3100_v37, %v3079_v58 }
 0x1f9   :  { %v3117_v63 = vadd.f32 %v3109_v55, %v2964_v30  ;;  %v3119_v0 = vadd.f32 %v3111_v56, %v2966_v31  ;;  %v3394_v31 = vrot.slane %v7395_v18, %v8835_v49  ;;  %v3402_v32 = vrot.slane %v7395_v18, %v8837_v50 }
 0x1fa   :  { %v3118_v2 = vadd.f32 %v3110_v61, %v2965_v34  ;;  %v3120_v4 = vadd.f32 %v3112_v62, %v2967_v35  ;;  %v3398_v35 = vrot.slane %v7395_v18, %v8839_v51  ;;  %v3406_v36 = vrot.slane %v7395_v18, %v8841_v52 }
 0x1fc   :  { %v3183_v11 = vpop.f32.mrb[80].mxu0  ;;  %v3226_v6 = vpop.f32.mrb[80].mxu1 }
 0x1fd   :  { %v3258_v7 = vmul.f32 %v3241_v1, %v3183_v11  ;;  %v3260_v9 = vmul.f32 %v3249_v12, %v3226_v6  ;;  %v3185_v10 = vpop.f32.mrb[81].mxu0  ;;  %v3228_v13 = vpop.f32.mrb[81].mxu1 }
 0x1fe   :  { %v3259_v14 = vmul.f32 %v3245_v5, %v3185_v10  ;;  %v3261_v15 = vmul.f32 %v3253_v8, %v3228_v13  ;;  %v3187_v16 = vpop.f32.mrb[82].mxu0  ;;  %v3230_v17 = vpop.f32.mrb[82].mxu1 }
 0x1ff   :  { %v3266_v19 = vadd.f32 %v3258_v7, %v3113_v53  ;;  %v3268_v20 = vadd.f32 %v3260_v9, %v3115_v54  ;;  %v3262_v21 = vmul.f32 %v3241_v1, %v3187_v16  ;;  %v3264_v22 = vmul.f32 %v3249_v12, %v3230_v17  ;;  %v3189_v23 = vpop.f32.mrb[83].mxu0  ;;  %v3232_v24 = vpop.f32.mrb[83].mxu1  ;;  %v7407_v17 = vld [vmem:[%s9735_s3 + $0x47] ss:$8 sm:$0xf] }
 0x200   :  { %v3267_v25 = vadd.f32 %v3259_v14, %v3114_v59  ;;  %v3269_v26 = vadd.f32 %v3261_v15, %v3116_v60  ;;  %v3263_v27 = vmul.f32 %v3245_v5, %v3189_v23  ;;  %v3265_v28 = vmul.f32 %v3253_v8, %v3232_v24 }
 0x201   :  { %v3270_v29 = vadd.f32 %v3262_v21, %v3117_v63  ;;  %v3272_v30 = vadd.f32 %v3264_v22, %v3119_v0  ;;  %v3547_v0 = vrot.slane %v7401_v48, %v8835_v49  ;;  %v3555_v1 = vrot.slane %v7401_v48, %v8837_v50 }
 0x202   :  { %v3271_v33 = vadd.f32 %v3263_v27, %v3118_v2  ;;  %v3273_v34 = vadd.f32 %v3265_v28, %v3120_v4  ;;  %v3551_v4 = vrot.slane %v7401_v48, %v8839_v51  ;;  %v3559_v5 = vrot.slane %v7401_v48, %v8841_v52 }
 0x204   :  { %v3336_v37 = vpop.f32.mrb[84].mxu0  ;;  %v3379_v38 = vpop.f32.mrb[84].mxu1 }
 0x205   :  { %v3411_v39 = vmul.f32 %v3394_v31, %v3336_v37  ;;  %v3413_v40 = vmul.f32 %v3402_v32, %v3379_v38  ;;  %v3338_v41 = vpop.f32.mrb[85].mxu0  ;;  %v3381_v42 = vpop.f32.mrb[85].mxu1 }
 0x206   :  { %v3412_v43 = vmul.f32 %v3398_v35, %v3338_v41  ;;  %v3414_v44 = vmul.f32 %v3406_v36, %v3381_v42  ;;  %v3340_v46 = vpop.f32.mrb[86].mxu0  ;;  %v3383_v47 = vpop.f32.mrb[86].mxu1 }
 0x207   :  { %v3419_v3 = vadd.f32 %v3411_v39, %v3266_v19  ;;  %v3421_v53 = vadd.f32 %v3413_v40, %v3268_v20  ;;  %v3415_v54 = vmul.f32 %v3394_v31, %v3340_v46  ;;  %v3417_v55 = vmul.f32 %v3402_v32, %v3383_v47  ;;  %v3342_v56 = vpop.f32.mrb[87].mxu0  ;;  %v3385_v57 = vpop.f32.mrb[87].mxu1  ;;  %v7413_v47 = vld [vmem:[%s9735_s3 + $0x60] ss:$8 sm:$0xf]  ;;  %s9737_s3 = smov 16  }
 0x208   :  { %v3420_v58 = vadd.f32 %v3412_v43, %v3267_v25  ;;  %v3422_v59 = vadd.f32 %v3414_v44, %v3269_v26  ;;  %v3416_v60 = vmul.f32 %v3398_v35, %v3342_v56  ;;  %v3418_v61 = vmul.f32 %v3406_v36, %v3385_v57 }
 0x209   :  { %v3423_v62 = vadd.f32 %v3415_v54, %v3270_v29  ;;  %v3425_v63 = vadd.f32 %v3417_v55, %v3272_v30  ;;  %v3700_v30 = vrot.slane %v7407_v17, %v8835_v49  ;;  %v3708_v31 = vrot.slane %v7407_v17, %v8837_v50 }
 0x20a   :  { %v3424_v12 = vadd.f32 %v3416_v60, %v3271_v33  ;;  %v3426_v2 = vadd.f32 %v3418_v61, %v3273_v34  ;;  %v3704_v34 = vrot.slane %v7407_v17, %v8839_v51  ;;  %v3712_v35 = vrot.slane %v7407_v17, %v8841_v52 }
 0x20c   :  { %v3489_v8 = vpop.f32.mrb[88].mxu0  ;;  %v3532_v11 = vpop.f32.mrb[88].mxu1 }
 0x20d   :  { %v3564_v6 = vmul.f32 %v3547_v0, %v3489_v8  ;;  %v3566_v7 = vmul.f32 %v3555_v1, %v3532_v11  ;;  %v3491_v9 = vpop.f32.mrb[89].mxu0  ;;  %v3534_v10 = vpop.f32.mrb[89].mxu1 }
 0x20e   :  { %v3565_v13 = vmul.f32 %v3551_v4, %v3491_v9  ;;  %v3567_v14 = vmul.f32 %v3559_v5, %v3534_v10  ;;  %v3493_v15 = vpop.f32.mrb[90].mxu0  ;;  %v3536_v16 = vpop.f32.mrb[90].mxu1 }
 0x20f   :  { %v3572_v18 = vadd.f32 %v3564_v6, %v3419_v3  ;;  %v3574_v19 = vadd.f32 %v3566_v7, %v3421_v53  ;;  %v3568_v20 = vmul.f32 %v3547_v0, %v3493_v15  ;;  %v3570_v21 = vmul.f32 %v3555_v1, %v3536_v16  ;;  %v3495_v22 = vpop.f32.mrb[91].mxu0  ;;  %v3538_v23 = vpop.f32.mrb[91].mxu1 }
 0x210   :  { %v3573_v24 = vadd.f32 %v3565_v13, %v3420_v58  ;;  %v3575_v25 = vadd.f32 %v3567_v14, %v3422_v59  ;;  %v3569_v26 = vmul.f32 %v3551_v4, %v3495_v22  ;;  %v3571_v27 = vmul.f32 %v3559_v5, %v3538_v23 }
 0x211   :  { %v3576_v28 = vadd.f32 %v3568_v20, %v3423_v62  ;;  %v3578_v29 = vadd.f32 %v3570_v21, %v3425_v63  ;;  %v3853_v63 = vrot.slane %v7413_v47, %v8835_v49  ;;  %v3861_v0 = vrot.slane %v7413_v47, %v8837_v50 }
 0x212   :  { %v3577_v32 = vadd.f32 %v3569_v26, %v3424_v12  ;;  %v3579_v33 = vadd.f32 %v3571_v27, %v3426_v2  ;;  %v3857_v2 = vrot.slane %v7413_v47, %v8839_v51  ;;  %v3865_v4 = vrot.slane %v7413_v47, %v8841_v52 }
 0x214   :  { %v3642_v36 = vpop.f32.mrb[92].mxu0  ;;  %v3685_v37 = vpop.f32.mrb[92].mxu1 }
 0x215   :  { %v3717_v38 = vmul.f32 %v3700_v30, %v3642_v36  ;;  %v3719_v39 = vmul.f32 %v3708_v31, %v3685_v37  ;;  %v3644_v40 = vpop.f32.mrb[93].mxu0  ;;  %v3687_v41 = vpop.f32.mrb[93].mxu1 }
 0x216   :  { %v3718_v42 = vmul.f32 %v3704_v34, %v3644_v40  ;;  %v3720_v43 = vmul.f32 %v3712_v35, %v3687_v41  ;;  %v3646_v44 = vpop.f32.mrb[94].mxu0  ;;  %v3689_v46 = vpop.f32.mrb[94].mxu1 }
 0x217   :  { %v3725_v48 = vadd.f32 %v3717_v38, %v3572_v18  ;;  %v3727_v3 = vadd.f32 %v3719_v39, %v3574_v19  ;;  %v3721_v53 = vmul.f32 %v3700_v30, %v3646_v44  ;;  %v3723_v54 = vmul.f32 %v3708_v31, %v3689_v46  ;;  %v3648_v55 = vpop.f32.mrb[95].mxu0  ;;  %v3691_v56 = vpop.f32.mrb[95].mxu1 }
 0x218   :  { %v3726_v57 = vadd.f32 %v3718_v42, %v3573_v24  ;;  %v3728_v58 = vadd.f32 %v3720_v43, %v3575_v25  ;;  %v3722_v59 = vmul.f32 %v3704_v34, %v3648_v55  ;;  %v3724_v60 = vmul.f32 %v3712_v35, %v3691_v56 }
 0x219   :  { %v3729_v61 = vadd.f32 %v3721_v53, %v3576_v28  ;;  %v3731_v62 = vadd.f32 %v3723_v54, %v3578_v29  ;;  %v8267_v30 = vmov 0.0  }
 0x21a   :  { %v3730_v1 = vadd.f32 %v3722_v59, %v3577_v32  ;;  %v3732_v12 = vadd.f32 %v3724_v60, %v3579_v33  ;;  %7803 = vmatprep.subr.bf16.mxu0 %v8267_v30  ;;  %7809 = vmatprep.subr.bf16.mxu1 %v8267_v30  ;;  %v5844_v59 = vld [vmem:[%s9697_s6] sm:$0xff] }
 0x21c   :  { %v3795_v5 = vpop.f32.mrb[96].mxu0  ;;  %v3838_v8 = vpop.f32.mrb[96].mxu1 }
 0x21d   :  { %v3870_v11 = vmul.f32 %v3853_v63, %v3795_v5  ;;  %v3872_v6 = vmul.f32 %v3861_v0, %v3838_v8  ;;  %v3797_v7 = vpop.f32.mrb[97].mxu0  ;;  %v3840_v9 = vpop.f32.mrb[97].mxu1  ;;  %v8187_v8 = vld [vmem:[%s9696_s5 + $0x28] sm:$0xff]  }
 0x21e   :  { %v3871_v10 = vmul.f32 %v3857_v2, %v3797_v7  ;;  %v3873_v13 = vmul.f32 %v3865_v4, %v3840_v9  ;;  %v3799_v14 = vpop.f32.mrb[98].mxu0  ;;  %v3842_v15 = vpop.f32.mrb[98].mxu1  ;;  %v8189_v9 = vld [vmem:[%s9696_s5 + $0x38] sm:$0xff]  }
 0x21f   :  { %v3878_v16 = vadd.f32 %v3870_v11, %v3725_v48  ;;  %v3880_v49 = vadd.f32 %v3872_v6, %v3727_v3  ;;  %v3874_v17 = vmul.f32 %v3853_v63, %v3799_v14  ;;  %v3876_v50 = vmul.f32 %v3861_v0, %v3842_v15  ;;  %v3801_v18 = vpop.f32.mrb[99].mxu0  ;;  %v3844_v19 = vpop.f32.mrb[99].mxu1  ;;  %v8184_v63 = vld [vmem:[%s9696_s5] sm:$0xff]   ;;  %v8191_v15 = vld [vmem:[%s9696_s5 + $0x48] sm:$0xff]  }
 0x220   :  { %v3879_v20 = vadd.f32 %v3871_v10, %v3726_v57  ;;  %v3881_v51 = vadd.f32 %v3873_v13, %v3728_v58  ;;  %v3875_v21 = vmul.f32 %v3857_v2, %v3801_v18  ;;  %v3877_v52 = vmul.f32 %v3865_v4, %v3844_v19  ;;  %v5845_v58 = vld [vmem:[%s9697_s6 + $0x8] sm:$0xff]  ;;  %v8186_v2 = vld [vmem:[%s9696_s5 + $0x10] sm:$0xff]   ;;  %v8188_v11 = vld [vmem:[%s9696_s5 + $0x20] sm:$0xff]  }
 0x221   :  { %v3882_v22 = vadd.f32 %v3874_v17, %v3729_v61  ;;  %v3884_v23 = vadd.f32 %v3876_v50, %v3731_v62  ;;  %v8183_v62 = vld [vmem:[%s9696_s5 + $0x8] sm:$0xff]   ;;  %v8190_v10 = vld [vmem:[%s9696_s5 + $0x30] sm:$0xff]   ;;  %v8193_v50 = vld [vmem:[%s9696_s5 + $0x58] sm:$0xff]  }
 0x222   :  { %v3883_v24 = vadd.f32 %v3875_v21, %v3730_v1  ;;  %v3885_v25 = vadd.f32 %v3877_v52, %v3732_v12  ;;  %v3959_v31 = vpop.permute.xlu0 %3958  ;;  %v8185_v12 = vld [vmem:[%s9696_s5 + $0x18] sm:$0xff]   ;;  %v8194_v18 = vld [vmem:[%s9696_s5 + $0x50] sm:$0xff]  }
 0x223   :  { %v3886_v26 = vpack.c.bf16 %v3882_v22, %v3878_v16  ;;  %v3888_v27 = vpack.c.bf16 %v3884_v23, %v3880_v49  ;;  %v3964_v32 = vpop.permute.xlu1 %3963  ;;  %v8192_v16 = vld [vmem:[%s9696_s5 + $0x40] sm:$0xff]   ;;  %v8197_v22 = vld [vmem:[%s9696_s5 + $0x70] sm:$0xff]   ;;  %v8198_v23 = vld [vmem:[%s9696_s5 + $0x78] sm:$0xff]  }
 0x224   :  { %v3887_v28 = vpack.c.bf16 %v3883_v24, %v3879_v20  ;;  %v3889_v29 = vpack.c.bf16 %v3885_v25, %v3881_v51  ;;  %v8195_v20 = vld [vmem:[%s9696_s5 + $0x60] sm:$0xff]   ;;  %v8196_v51 = vld [vmem:[%s9696_s5 + $0x68] sm:$0xff]  }
 0x226   :  { %4190 = vmatprep.mubr.bf16.mxu0 %v3887_v28  ;;  %4231 = vmatprep.mubr.bf16.mxu1 %v3889_v29 }
 0x227   :  { %4191 = vmatmul.mubr.bf16.vlgmr.msra.gmra.mrb[100].mxu0 %v3886_v26  ;;  %4232 = vmatmul.mubr.bf16.vlgmr.msra.gmra.mrb[100].mxu1 %v3888_v27  ;;  %v8199_v26 = vld [vmem:[%s9696_s5 + $0x80] sm:$0xff]   ;;  %v8200_v27 = vld [vmem:[%s9696_s5 + $0x88] sm:$0xff]  }
 0x228   :  { %7805 = vmatprep.mubr.msk.bf16.mxu0 %vm8268_vm9, %v8267_v30  ;;  %7811 = vmatprep.mubr.msk.bf16.mxu1 %vm8268_vm9, %v8267_v30 }
 0x2fa   :  { %v7680_v33 = vpop.f32.mrb[100].mxu0  ;;  %v7702_v34 = vpop.f32.mrb[100].mxu1 }
 0x2fb   :  { %v7681_v35 = vpop.f32.mrb[101].mxu0  ;;  %v7703_v36 = vpop.f32.mrb[101].mxu1 }
 0x2fc   :  { %v7682_v37 = vadd.f32 %v7681_v35, %v7680_v33  ;;  %v7704_v38 = vadd.f32 %v7703_v36, %v7702_v34  ;;  %v7683_v39 = vpop.f32.mrb[102].mxu0  ;;  %v7705_v40 = vpop.f32.mrb[102].mxu1  ;;  %v8203_v35 = vld [vmem:[%s9696_s5 + $0xa0] sm:$0xff]   ;;  %v8204_v36 = vld [vmem:[%s9696_s5 + $0xa8] sm:$0xff]  }
 0x2fd   :  { %v7684_v41 = vpop.f32.mrb[103].mxu0  ;;  %v7706_v42 = vpop.f32.mrb[103].mxu1 }
 0x2fe   :  { %v7685_v43 = vadd.f32 %v7684_v41, %v7683_v39  ;;  %v7707_v44 = vadd.f32 %v7706_v42, %v7705_v40  ;;  %v4193_v46 = vadd.f32 %v7682_v37, %v3959_v31  ;;  %v8201_v31 = vld [vmem:[%s9696_s5 + $0x90] sm:$0xff]   ;;  %v8206_v40 = vld [vmem:[%s9696_s5 + $0xb8] sm:$0xff]   ;;  %v8207_v42 = vld [vmem:[%s9696_s5 + $0xc0] sm:$0xff]  }
 0x2ff   :  { %v8205_v39 = vld [vmem:[%s9696_s5 + $0xb0] sm:$0xff]  }
 0x300   :  { %v4234_v47 = vadd.f32 %v7704_v38, %v4193_v46  ;;  %v4196_v48 = vadd.f32 %v7685_v43, %v3964_v32  ;;  %v8202_v32 = vld [vmem:[%s9696_s5 + $0x98] sm:$0xff]   ;;  %v7448_v43 = vld [vmem:[%s9698_s9] ss:$0 sm:$0xff] }
 0x302   :  { %v4242_v3 = vmul.f32 0.01, %v4234_v47  ;;  %v4237_v53 = vadd.f32 %v7707_v44, %v4196_v48  ;;  %vm4240_vm10 = vcmp.gt.f32.partialorder %v4234_v47, 0.0  ;;  %v7453_v44 = vld [vmem:[%s9698_s9 + $0x1] ss:$0 sm:$0xff] }
 0x304   :  { %vm4241_vm11 = vcmp.gt.f32.partialorder %v4237_v53, 0.0  ;;  %v4243_v54 = vmul.f32 0.01, %v4237_v53  ;;  %v4244_v55 = vsel %vm4240_vm10, %v4234_v47, %v4242_v3 }
 0x306   :  { %v4245_v56 = vsel %vm4241_vm11, %v4237_v53, %v4243_v54 }
 0x307   :  { %v9126_v57 = vpack.c.bf16 %v4245_v56, %v4244_v55 }
 0x309   :  { %4319 = vrot.lane.b32.xlu0 %v9126_v57, %s8249_s24  ;;  %4255 = vrot.lane.b32.xlu1 %v9126_v57, %s8248_s23  ;;  %s8271_s24 = smov 9   ;;  %s8272_s23 = smov 6  }
 0x30d   :  { %4447 = vrot.lane.b32.xlu0 %v9126_v57, %s8251_s4  ;;  %4383 = vrot.lane.b32.xlu1 %v9126_v57, %s9737_s3  ;;  %s8273_s4 = smov 7   ;;  %s8278_s3 = smov 118  }
 0x311   :  { %4575 = vrot.lane.b32.xlu0 %v9126_v57, %s8269_s25  ;;  %4511 = vrot.lane.b32.xlu1 %v9126_v57, %s9738_s26  ;;  %s9744_s25 = smov 112   ;;  %s9745_s26 = smov 113  }
 0x315   :  { %4703 = vrot.lane.b32.xlu0 %v9126_v57, %s8270_s27  ;;  %4639 = vrot.lane.b32.xlu1 %v9126_v57, %s8271_s24 }
 0x319   :  { %4831 = vrot.lane.b32.xlu0 %v9126_v57, %s8272_s23  ;;  %4767 = vrot.lane.b32.xlu1 %v9126_v57, %s8273_s4  ;;  %s9746_s23 = smov 110  }
 0x31d   :  { %4959 = vrot.lane.b32.xlu0 %v9126_v57, %s9739_s28  ;;  %4895 = vrot.lane.b32.xlu1 %v9126_v57, %s9740_s21  ;;  %s9747_s21 = smov 111  }
 0x321   :  { %5148 = vrot.lane.b32.xlu0 %v9126_v57, %s9741_s20  ;;  %5084 = vrot.lane.b32.xlu1 %v9126_v57, %s9742_s29 }
 0x325   :  { %5276 = vrot.lane.b32.xlu0 %v9126_v57, %s8274_s0  ;;  %5212 = vrot.lane.b32.xlu1 %v9126_v57, %s8275_s30 }
 0x329   :  { %5404 = vrot.lane.b32.xlu0 %v9126_v57, %s8276_s22  ;;  %5340 = vrot.lane.b32.xlu1 %v9126_v57, %s9728_s2 }
 0x32d   :  { %5532 = vrot.lane.b32.xlu0 %v9126_v57, %s9743_s1  ;;  %5468 = vrot.lane.b32.xlu1 %v9126_v57, %s8278_s3 }
 0x331   :  { %5660 = vrot.lane.b32.xlu0 %v9126_v57, %s9744_s25  ;;  %5596 = vrot.lane.b32.xlu1 %v9126_v57, %s9745_s26  ;;  %s8281_s26 = smov 3  }
 0x335   :  { %5788 = vrot.lane.b32.xlu0 %v9126_v57, %s9746_s23  ;;  %5724 = vrot.lane.b32.xlu1 %v9126_v57, %s9747_s21  ;;  %s8282_s23 = smov 125  }
 0x339   :  { %5853 = vperm.xlu0 %8124, %v5845_v58   ;;  %5848 = vperm.xlu1 %8125, %v5844_v59  }
 0x37b   :  { %v4320_v60 = vpop.permute.xlu0 %4319  ;;  %v4256_v61 = vpop.permute.xlu1 %4255 }
 0x37c   :  { %7804 = vmatpush3.bf16.msra.mxu0 %v4256_v61  ;;  %7810 = vmatpush3.bf16.msra.mxu1 %v4320_v60 }
 0x37d   :  { %7821 = vmatprep.subr.bf16.mxu1 %v8267_v30  ;;  %7815 = vmatprep.subr.bf16.mxu0 %v8267_v30 }
 0x37f   :  { %7812 = vmatmul.mubr.msk.bf16.vlgmr.msra.gmra.mrb[104].mxu1 %vm103_vm1, %v8183_v62  ;;  %v4448_v0 = vpop.permute.xlu0 %4447  ;;  %7806 = vmatmul.mubr.msk.bf16.vlgmr.msra.gmra.mrb[104].mxu0 %vm103_vm1, %v8184_v63  ;;  %v4384_v1 = vpop.permute.xlu1 %4383  ;;  %v7458_v63 = vld [vmem:[%s9698_s9 + $0x2] ss:$0 sm:$0xff] }
 0x380   :  { %7816 = vmatpush3.bf16.msra.mxu0 %v4384_v1  ;;  %7822 = vmatpush3.bf16.msra.mxu1 %v4448_v0  ;;  %v7463_v0 = vld [vmem:[%s9698_s9 + $0x3] ss:$0 sm:$0xff] }
 0x381   :  { %7817 = vmatprep.mubr.msk.bf16.mxu0 %vm8268_vm9, %v8267_v30  ;;  %7823 = vmatprep.mubr.msk.bf16.mxu1 %vm8268_vm9, %v8267_v30 }
 0x382   :  { %7827 = vmatprep.subr.bf16.mxu0 %v8267_v30  ;;  %7833 = vmatprep.subr.bf16.mxu1 %v8267_v30 }
 0x383   :  { %v4576_v4 = vpop.permute.xlu0 %4575  ;;  %v4512_v5 = vpop.permute.xlu1 %4511 }
 0x387   :  { %7824 = vmatmul.mubr.msk.bf16.vlgmr.msra.gmra.mrb[108].mxu1 %vm103_vm1, %v8185_v12  ;;  %7818 = vmatmul.mubr.msk.bf16.vlgmr.msra.gmra.mrb[108].mxu0 %vm103_vm1, %v8186_v2  ;;  %v4704_v6 = vpop.permute.xlu0 %4703  ;;  %v4640_v7 = vpop.permute.xlu1 %4639 }
 0x388   :  { %7834 = vmatpush3.bf16.msra.mxu1 %v4576_v4  ;;  %7828 = vmatpush3.bf16.msra.mxu0 %v4512_v5 }
 0x389   :  { %7829 = vmatprep.mubr.msk.bf16.mxu0 %vm8268_vm9, %v8267_v30  ;;  %7835 = vmatprep.mubr.msk.bf16.mxu1 %vm8268_vm9, %v8267_v30 }
 0x38a   :  { %7839 = vmatprep.subr.bf16.mxu0 %v8267_v30  ;;  %7845 = vmatprep.subr.bf16.mxu1 %v8267_v30 }
 0x38b   :  { %v4832_v13 = vpop.permute.xlu0 %4831  ;;  %v4768_v14 = vpop.permute.xlu1 %4767 }
 0x38f   :  { %7836 = vmatmul.mubr.msk.bf16.vlgmr.msra.gmra.mrb[112].mxu1 %vm103_vm1, %v8187_v8  ;;  %7830 = vmatmul.mubr.msk.bf16.vlgmr.msra.gmra.mrb[112].mxu0 %vm103_vm1, %v8188_v11  ;;  %v4960_v49 = vpop.permute.xlu0 %4959  ;;  %v4896_v17 = vpop.permute.xlu1 %4895 }
 0x390   :  { %7846 = vmatpush3.bf16.msra.mxu1 %v4704_v6  ;;  %7840 = vmatpush3.bf16.msra.mxu0 %v4640_v7 }
 0x391   :  { %7841 = vmatprep.mubr.msk.bf16.mxu0 %vm8268_vm9, %v8267_v30  ;;  %7847 = vmatprep.mubr.msk.bf16.mxu1 %vm8268_vm9, %v8267_v30 }
 0x392   :  { %7851 = vmatprep.subr.bf16.mxu0 %v8267_v30  ;;  %7857 = vmatprep.subr.bf16.mxu1 %v8267_v30 }
 0x393   :  { %v5085_v19 = vpop.permute.xlu1 %5084  ;;  %v5149_v21 = vpop.permute.xlu0 %5148 }
 0x397   :  { %7848 = vmatmul.mubr.msk.bf16.vlgmr.msra.gmra.mrb[116].mxu1 %vm103_vm1, %v8189_v9  ;;  %7842 = vmatmul.mubr.msk.bf16.vlgmr.msra.gmra.mrb[116].mxu0 %vm103_vm1, %v8190_v10  ;;  %v5213_v52 = vpop.permute.xlu1 %5212  ;;  %v5277_v24 = vpop.permute.xlu0 %5276 }
 0x398   :  { %7858 = vmatpush3.bf16.msra.mxu1 %v4832_v13  ;;  %7852 = vmatpush3.bf16.msra.mxu0 %v4768_v14 }
 0x399   :  { %7853 = vmatprep.mubr.msk.bf16.mxu0 %vm8268_vm9, %v8267_v30  ;;  %7859 = vmatprep.mubr.msk.bf16.mxu1 %vm8268_vm9, %v8267_v30 }
 0x39a   :  { %7863 = vmatprep.subr.bf16.mxu0 %v8267_v30  ;;  %7869 = vmatprep.subr.bf16.mxu1 %v8267_v30 }
 0x39b   :  { %v5341_v25 = vpop.permute.xlu1 %5340  ;;  %v5405_v28 = vpop.permute.xlu0 %5404 }
 0x39f   :  { %7860 = vmatmul.mubr.msk.bf16.vlgmr.msra.gmra.mrb[120].mxu1 %vm103_vm1, %v8191_v15  ;;  %7854 = vmatmul.mubr.msk.bf16.vlgmr.msra.gmra.mrb[120].mxu0 %vm103_vm1, %v8192_v16  ;;  %v5469_v29 = vpop.permute.xlu1 %5468  ;;  %v5533_v33 = vpop.permute.xlu0 %5532 }
 0x3a0   :  { %7870 = vmatpush3.bf16.msra.mxu1 %v4960_v49  ;;  %7864 = vmatpush3.bf16.msra.mxu0 %v4896_v17  ;;  %v7468_v49 = vld [vmem:[%s9698_s9 + $0x4] ss:$0 sm:$0xff]  ;;  %v7473_v17 = vld [vmem:[%s9698_s9 + $0x5] ss:$0 sm:$0xff] }
 0x3a1   :  { %7865 = vmatprep.mubr.msk.bf16.mxu0 %vm8268_vm9, %v8267_v30  ;;  %7871 = vmatprep.mubr.msk.bf16.mxu1 %vm8268_vm9, %v8267_v30 }
 0x3a2   :  { %7875 = vmatprep.subr.bf16.mxu0 %v8267_v30  ;;  %7881 = vmatprep.subr.bf16.mxu1 %v8267_v30 }
 0x3a3   :  { %v5597_v34 = vpop.permute.xlu1 %5596  ;;  %v5661_v37 = vpop.permute.xlu0 %5660 }
 0x3a7   :  { %7872 = vmatmul.mubr.msk.bf16.vlgmr.msra.gmra.mrb[124].mxu1 %vm103_vm1, %v8193_v50  ;;  %7866 = vmatmul.mubr.msk.bf16.vlgmr.msra.gmra.mrb[124].mxu0 %vm103_vm1, %v8194_v18  ;;  %v5725_v38 = vpop.permute.xlu1 %5724  ;;  %v5789_v41 = vpop.permute.xlu0 %5788 }
 0x3a8   :  { %7876 = vmatpush3.bf16.msra.mxu0 %v9126_v57  ;;  %7882 = vmatpush3.bf16.msra.mxu1 %v5085_v19 }
 0x3a9   :  { %7877 = vmatprep.mubr.msk.bf16.mxu0 %vm8268_vm9, %v8267_v30  ;;  %7883 = vmatprep.mubr.msk.bf16.mxu1 %vm8268_vm9, %v8267_v30 }
 0x3aa   :  { %7887 = vmatprep.subr.bf16.mxu0 %v8267_v30  ;;  %7893 = vmatprep.subr.bf16.mxu1 %v8267_v30 }
 0x3af   :  { %7878 = vmatmul.mubr.msk.bf16.vlgmr.msra.gmra.mrb[128].mxu0 %vm103_vm1, %v8195_v20  ;;  %7884 = vmatmul.mubr.msk.bf16.vlgmr.msra.gmra.mrb[128].mxu1 %vm103_vm1, %v8196_v51 }
 0x3b0   :  { %7888 = vmatpush3.bf16.msra.mxu0 %v5149_v21  ;;  %7894 = vmatpush3.bf16.msra.mxu1 %v5213_v52 }
 0x3b1   :  { %7889 = vmatprep.mubr.msk.bf16.mxu0 %vm8268_vm9, %v8267_v30  ;;  %7895 = vmatprep.mubr.msk.bf16.mxu1 %vm8268_vm9, %v8267_v30 }
 0x3b2   :  { %7899 = vmatprep.subr.bf16.mxu0 %v8267_v30  ;;  %7905 = vmatprep.subr.bf16.mxu1 %v8267_v30 }
 0x3b7   :  { %7890 = vmatmul.mubr.msk.bf16.vlgmr.msra.gmra.mrb[132].mxu0 %vm103_vm1, %v8197_v22  ;;  %7896 = vmatmul.mubr.msk.bf16.vlgmr.msra.gmra.mrb[132].mxu1 %vm103_vm1, %v8198_v23 }
 0x3b8   :  { %7900 = vmatpush3.bf16.msra.mxu0 %v5277_v24  ;;  %7906 = vmatpush3.bf16.msra.mxu1 %v5341_v25 }
 0x3b9   :  { %7901 = vmatprep.mubr.msk.bf16.mxu0 %vm8268_vm9, %v8267_v30  ;;  %7907 = vmatprep.mubr.msk.bf16.mxu1 %vm8268_vm9, %v8267_v30 }
 0x3ba   :  { %7911 = vmatprep.subr.bf16.mxu0 %v8267_v30  ;;  %7917 = vmatprep.subr.bf16.mxu1 %v8267_v30 }
 0x3bf   :  { %7902 = vmatmul.mubr.msk.bf16.vlgmr.msra.gmra.mrb[136].mxu0 %vm103_vm1, %v8199_v26  ;;  %7908 = vmatmul.mubr.msk.bf16.vlgmr.msra.gmra.mrb[136].mxu1 %vm103_vm1, %v8200_v27 }
 0x3c0   :  { %7912 = vmatpush3.bf16.msra.mxu0 %v5405_v28  ;;  %7918 = vmatpush3.bf16.msra.mxu1 %v5469_v29 }
 0x3c1   :  { %7913 = vmatprep.mubr.msk.bf16.mxu0 %vm8268_vm9, %v8267_v30  ;;  %7919 = vmatprep.mubr.msk.bf16.mxu1 %vm8268_vm9, %v8267_v30 }
 0x3c2   :  { %7923 = vmatprep.subr.bf16.mxu0 %v8267_v30  ;;  %7929 = vmatprep.subr.bf16.mxu1 %v8267_v30 }
 0x3c7   :  { %7914 = vmatmul.mubr.msk.bf16.vlgmr.msra.gmra.mrb[140].mxu0 %vm103_vm1, %v8201_v31  ;;  %7920 = vmatmul.mubr.msk.bf16.vlgmr.msra.gmra.mrb[140].mxu1 %vm103_vm1, %v8202_v32  ;;  %v7478_v32 = vld [vmem:[%s9698_s9 + $0x6] ss:$0 sm:$0xff] }
 0x3c8   :  { %7924 = vmatpush3.bf16.msra.mxu0 %v5533_v33  ;;  %7930 = vmatpush3.bf16.msra.mxu1 %v5597_v34  ;;  %v7483_v33 = vld [vmem:[%s9698_s9 + $0x7] ss:$0 sm:$0xff] }
 0x3c9   :  { %7925 = vmatprep.mubr.msk.bf16.mxu0 %vm8268_vm9, %v8267_v30  ;;  %7931 = vmatprep.mubr.msk.bf16.mxu1 %vm8268_vm9, %v8267_v30 }
 0x3ca   :  { %7935 = vmatprep.subr.bf16.mxu0 %v8267_v30  ;;  %7941 = vmatprep.subr.bf16.mxu1 %v8267_v30 }
 0x3cf   :  { %7926 = vmatmul.mubr.msk.bf16.vlgmr.msra.gmra.mrb[144].mxu0 %vm103_vm1, %v8203_v35  ;;  %7932 = vmatmul.mubr.msk.bf16.vlgmr.msra.gmra.mrb[144].mxu1 %vm103_vm1, %v8204_v36 }
 0x3d0   :  { %7936 = vmatpush3.bf16.msra.mxu0 %v5661_v37  ;;  %7942 = vmatpush3.bf16.msra.mxu1 %v5725_v38 }
 0x3d1   :  { %7937 = vmatprep.mubr.msk.bf16.mxu0 %vm8268_vm9, %v8267_v30  ;;  %7947 = vmatprep.subr.bf16.mxu0 %v8267_v30 }
 0x3d2   :  { %7943 = vmatprep.mubr.msk.bf16.mxu1 %vm8268_vm9, %v8267_v30  ;;  %7953 = vmatprep.subr.bf16.mxu1 %v8267_v30 }
 0x3d7   :  { %7938 = vmatmul.mubr.msk.bf16.vlgmr.msra.gmra.mrb[148].mxu0 %vm103_vm1, %v8205_v39  ;;  %7944 = vmatmul.mubr.msk.bf16.vlgmr.msra.gmra.mrb[148].mxu1 %vm103_vm1, %v8206_v40 }
 0x3d8   :  { %7948 = vmatpush3.bf16.msra.mxu0 %v5789_v41  ;;  %7949 = vmatprep.mubr.msk.bf16.mxu0 %vm8268_vm9, %v8267_v30 }
 0x3d9   :  { %7959 = vmatprep.subr.bf16.mxu0 %v8267_v30  ;;  %7955 = vmatprep.mubr.msk.bf16.mxu1 %vm8268_vm9, %v8267_v30 }
 0x3df   :  { %7950 = vmatmul.mubr.msk.bf16.vlgmr.msra.gmra.mrb[152].mxu0 %vm103_vm1, %v8207_v42 }
 0x3e0   :  { %7961 = vmatprep.mubr.msk.bf16.mxu0 %vm8268_vm9, %v8267_v30 }
 0x452   :  { %v4295_v46 = vpop.f32.mrb[104].mxu0  ;;  %v4359_v47 = vpop.f32.mrb[104].mxu1 }
 0x453   :  { %v4307_v48 = vmul.f32 %v7448_v43, %v4295_v46  ;;  %v4371_v3 = vmul.f32 %v7453_v44, %v4359_v47  ;;  %v7807_v53 = vpop.f32.mrb[105].mxu0  ;;  %v7813_v54 = vpop.f32.mrb[105].mxu1 }
 0x454   :  { %v4298_v55 = vpop.f32.mrb[106].mxu0  ;;  %v4362_v56 = vpop.f32.mrb[106].mxu1  ;;  %v7488_v54 = vld [vmem:[%s9698_s9 + $0x8] ss:$0 sm:$0xff] }
 0x455   :  { %v4373_v57 = vadd.f32 %v4371_v3, %v4307_v48  ;;  %v4308_v58 = vmul.f32 %v7448_v43, %v4298_v55  ;;  %v4372_v59 = vmul.f32 %v7453_v44, %v4362_v56  ;;  %v7808_v60 = vpop.f32.mrb[107].mxu0  ;;  %v7814_v61 = vpop.f32.mrb[107].mxu1  ;;  %v7493_v55 = vld [vmem:[%s9698_s9 + $0x9] ss:$0 sm:$0xff] }
 0x457   :  { %v4374_v62 = vadd.f32 %v4372_v59, %v4308_v58 }
 0x45a   :  { %v4423_v1 = vpop.f32.mrb[108].mxu0  ;;  %v4487_v12 = vpop.f32.mrb[108].mxu1 }
 0x45b   :  { %v4435_v2 = vmul.f32 %v7458_v63, %v4423_v1  ;;  %v7819_v4 = vpop.f32.mrb[109].mxu0  ;;  %v4499_v5 = vmul.f32 %v7463_v0, %v4487_v12  ;;  %v7825_v8 = vpop.f32.mrb[109].mxu1 }
 0x45c   :  { %v4426_v11 = vpop.f32.mrb[110].mxu0  ;;  %v4490_v6 = vpop.f32.mrb[110].mxu1 }
 0x45d   :  { %v4437_v7 = vadd.f32 %v4435_v2, %v4373_v57  ;;  %v4436_v9 = vmul.f32 %v7458_v63, %v4426_v11  ;;  %v7820_v10 = vpop.f32.mrb[111].mxu0  ;;  %v4500_v13 = vmul.f32 %v7463_v0, %v4490_v6  ;;  %v7826_v14 = vpop.f32.mrb[111].mxu1  ;;  %v7498_v6 = vld [vmem:[%s9698_s9 + $0xa] ss:$0 sm:$0xff] }
 0x45f   :  { %v4438_v15 = vadd.f32 %v4436_v9, %v4374_v62  ;;  %v4501_v16 = vadd.f32 %v4499_v5, %v4437_v7  ;;  %v7503_v7 = vld [vmem:[%s9698_s9 + $0xb] ss:$0 sm:$0xff] }
 0x461   :  { %v4502_v50 = vadd.f32 %v4500_v13, %v4438_v15 }
 0x462   :  { %v4551_v18 = vpop.f32.mrb[112].mxu0  ;;  %v4615_v19 = vpop.f32.mrb[112].mxu1 }
 0x463   :  { %v4563_v20 = vmul.f32 %v7468_v49, %v4551_v18  ;;  %v7831_v51 = vpop.f32.mrb[113].mxu0  ;;  %v4627_v21 = vmul.f32 %v7473_v17, %v4615_v19  ;;  %v7837_v52 = vpop.f32.mrb[113].mxu1 }
 0x464   :  { %v4554_v22 = vpop.f32.mrb[114].mxu0  ;;  %v4618_v23 = vpop.f32.mrb[114].mxu1 }
 0x465   :  { %v4565_v24 = vadd.f32 %v4563_v20, %v4501_v16  ;;  %v4564_v25 = vmul.f32 %v7468_v49, %v4554_v22  ;;  %v7832_v26 = vpop.f32.mrb[115].mxu0  ;;  %v4628_v27 = vmul.f32 %v7473_v17, %v4618_v23  ;;  %v7838_v28 = vpop.f32.mrb[115].mxu1  ;;  %v7508_v23 = vld [vmem:[%s9698_s9 + $0xc] ss:$0 sm:$0xff] }
 0x467   :  { %v4566_v29 = vadd.f32 %v4564_v25, %v4502_v50  ;;  %v4629_v31 = vadd.f32 %v4627_v21, %v4565_v24  ;;  %v7513_v24 = vld [vmem:[%s9698_s9 + $0xd] ss:$0 sm:$0xff] }
 0x469   :  { %v4630_v34 = vadd.f32 %v4628_v27, %v4566_v29 }
 0x46a   :  { %v4679_v35 = vpop.f32.mrb[116].mxu0  ;;  %v4743_v36 = vpop.f32.mrb[116].mxu1 }
 0x46b   :  { %v4691_v37 = vmul.f32 %v7478_v32, %v4679_v35  ;;  %v7843_v38 = vpop.f32.mrb[117].mxu0  ;;  %v4755_v39 = vmul.f32 %v7483_v33, %v4743_v36  ;;  %v7849_v40 = vpop.f32.mrb[117].mxu1 }
 0x46c   :  { %v4682_v41 = vpop.f32.mrb[118].mxu0  ;;  %v4746_v42 = vpop.f32.mrb[118].mxu1 }
 0x46d   :  { %v4693_v43 = vadd.f32 %v4691_v37, %v4629_v31  ;;  %v4692_v44 = vmul.f32 %v7478_v32, %v4682_v41  ;;  %v7844_v46 = vpop.f32.mrb[119].mxu0  ;;  %v4756_v47 = vmul.f32 %v7483_v33, %v4746_v42  ;;  %v7850_v48 = vpop.f32.mrb[119].mxu1  ;;  %v7518_v42 = vld [vmem:[%s9698_s9 + $0xe] ss:$0 sm:$0xff] }
 0x46f   :  { %v4694_v3 = vadd.f32 %v4692_v44, %v4630_v34  ;;  %v4757_v53 = vadd.f32 %v4755_v39, %v4693_v43  ;;  %v7523_v43 = vld [vmem:[%s9698_s9 + $0xf] ss:$0 sm:$0xff] }
 0x471   :  { %v4758_v56 = vadd.f32 %v4756_v47, %v4694_v3 }
 0x472   :  { %v4807_v57 = vpop.f32.mrb[120].mxu0  ;;  %v4871_v58 = vpop.f32.mrb[120].mxu1 }
 0x473   :  { %v4819_v59 = vmul.f32 %v7488_v54, %v4807_v57  ;;  %v7855_v60 = vpop.f32.mrb[121].mxu0  ;;  %v4883_v61 = vmul.f32 %v7493_v55, %v4871_v58  ;;  %v7861_v62 = vpop.f32.mrb[121].mxu1 }
 0x474   :  { %v4810_v63 = vpop.f32.mrb[122].mxu0  ;;  %v4874_v0 = vpop.f32.mrb[122].mxu1 }
 0x475   :  { %v4821_v1 = vadd.f32 %v4819_v59, %v4757_v53  ;;  %v4820_v12 = vmul.f32 %v7488_v54, %v4810_v63  ;;  %v7856_v2 = vpop.f32.mrb[123].mxu0  ;;  %v4884_v4 = vmul.f32 %v7493_v55, %v4874_v0  ;;  %v7862_v5 = vpop.f32.mrb[123].mxu1  ;;  %v7528_v0 = vld [vmem:[%s9698_s9 + $0x10] ss:$0 sm:$0xff] }
 0x477   :  { %v4822_v8 = vadd.f32 %v4820_v12, %v4758_v56  ;;  %v4885_v11 = vadd.f32 %v4883_v61, %v4821_v1  ;;  %v7533_v1 = vld [vmem:[%s9698_s9 + $0x11] ss:$0 sm:$0xff] }
 0x479   :  { %v4886_v9 = vadd.f32 %v4884_v4, %v4822_v8 }
 0x47a   :  { %v4935_v10 = vpop.f32.mrb[124].mxu0  ;;  %v4999_v13 = vpop.f32.mrb[124].mxu1 }
 0x47b   :  { %v4947_v14 = vmul.f32 %v7498_v6, %v4935_v10  ;;  %v7867_v15 = vpop.f32.mrb[125].mxu0  ;;  %v5011_v16 = vmul.f32 %v7503_v7, %v4999_v13  ;;  %v7873_v49 = vpop.f32.mrb[125].mxu1 }
 0x47c   :  { %v4938_v17 = vpop.f32.mrb[126].mxu0  ;;  %v5002_v50 = vpop.f32.mrb[126].mxu1 }
 0x47d   :  { %v4949_v18 = vadd.f32 %v4947_v14, %v4885_v11  ;;  %v4948_v19 = vmul.f32 %v7498_v6, %v4938_v17  ;;  %v7868_v20 = vpop.f32.mrb[127].mxu0  ;;  %v5012_v51 = vmul.f32 %v7503_v7, %v5002_v50  ;;  %v7874_v21 = vpop.f32.mrb[127].mxu1  ;;  %v7538_v50 = vld [vmem:[%s9698_s9 + $0x12] ss:$0 sm:$0xff] }
 0x47f   :  { %v4950_v52 = vadd.f32 %v4948_v19, %v4886_v9  ;;  %v5013_v22 = vadd.f32 %v5011_v16, %v4949_v18  ;;  %v7543_v18 = vld [vmem:[%s9698_s9 + $0x13] ss:$0 sm:$0xff] }
 0x481   :  { %v5014_v25 = vadd.f32 %v5012_v51, %v4950_v52 }
 0x482   :  { %v5060_v26 = vpop.f32.mrb[128].mxu0  ;;  %v5124_v27 = vpop.f32.mrb[128].mxu1 }
 0x483   :  { %v5072_v28 = vmul.f32 %v7508_v23, %v5060_v26  ;;  %v7879_v29 = vpop.f32.mrb[129].mxu0  ;;  %v5136_v31 = vmul.f32 %v7513_v24, %v5124_v27  ;;  %v7885_v32 = vpop.f32.mrb[129].mxu1 }
 0x484   :  { %v5063_v33 = vpop.f32.mrb[130].mxu0  ;;  %v5127_v34 = vpop.f32.mrb[130].mxu1 }
 0x485   :  { %v5074_v35 = vadd.f32 %v5072_v28, %v5013_v22  ;;  %v5073_v36 = vmul.f32 %v7508_v23, %v5063_v33  ;;  %v7880_v37 = vpop.f32.mrb[131].mxu0  ;;  %v5137_v38 = vmul.f32 %v7513_v24, %v5127_v34  ;;  %v7886_v39 = vpop.f32.mrb[131].mxu1  ;;  %v7548_v34 = vld [vmem:[%s9698_s9 + $0x14] ss:$0 sm:$0xff] }
 0x487   :  { %v5075_v40 = vadd.f32 %v5073_v36, %v5014_v25  ;;  %v5138_v41 = vadd.f32 %v5136_v31, %v5074_v35  ;;  %v7553_v35 = vld [vmem:[%s9698_s9 + $0x15] ss:$0 sm:$0xff] }
 0x489   :  { %v5139_v44 = vadd.f32 %v5137_v38, %v5075_v40 }
 0x48a   :  { %v5188_v46 = vpop.f32.mrb[132].mxu0  ;;  %v5252_v47 = vpop.f32.mrb[132].mxu1 }
 0x48b   :  { %v5200_v48 = vmul.f32 %v7518_v42, %v5188_v46  ;;  %v7891_v3 = vpop.f32.mrb[133].mxu0  ;;  %v5264_v53 = vmul.f32 %v7523_v43, %v5252_v47  ;;  %v7897_v54 = vpop.f32.mrb[133].mxu1 }
 0x48c   :  { %v5191_v55 = vpop.f32.mrb[134].mxu0  ;;  %v5255_v56 = vpop.f32.mrb[134].mxu1 }
 0x48d   :  { %v5202_v57 = vadd.f32 %v5200_v48, %v5138_v41  ;;  %v5201_v58 = vmul.f32 %v7518_v42, %v5191_v55  ;;  %v7892_v59 = vpop.f32.mrb[135].mxu0  ;;  %v5265_v60 = vmul.f32 %v7523_v43, %v5255_v56  ;;  %v7898_v61 = vpop.f32.mrb[135].mxu1  ;;  %v7558_v56 = vld [vmem:[%s9698_s9 + $0x16] ss:$0 sm:$0xff] }
 0x48f   :  { %v5203_v62 = vadd.f32 %v5201_v58, %v5139_v44  ;;  %v5266_v63 = vadd.f32 %v5264_v53, %v5202_v57  ;;  %v7563_v57 = vld [vmem:[%s9698_s9 + $0x17] ss:$0 sm:$0xff] }
 0x491   :  { %v5267_v12 = vadd.f32 %v5265_v60, %v5203_v62 }
 0x492   :  { %v5316_v2 = vpop.f32.mrb[136].mxu0  ;;  %v5380_v4 = vpop.f32.mrb[136].mxu1 }
 0x493   :  { %v5328_v5 = vmul.f32 %v7528_v0, %v5316_v2  ;;  %v7903_v8 = vpop.f32.mrb[137].mxu0  ;;  %v5392_v11 = vmul.f32 %v7533_v1, %v5380_v4  ;;  %v7909_v6 = vpop.f32.mrb[137].mxu1 }
 0x494   :  { %v5319_v7 = vpop.f32.mrb[138].mxu0  ;;  %v5383_v9 = vpop.f32.mrb[138].mxu1 }
 0x495   :  { %v5330_v10 = vadd.f32 %v5328_v5, %v5266_v63  ;;  %v5329_v13 = vmul.f32 %v7528_v0, %v5319_v7  ;;  %v7904_v14 = vpop.f32.mrb[139].mxu0  ;;  %v5393_v15 = vmul.f32 %v7533_v1, %v5383_v9  ;;  %v7910_v16 = vpop.f32.mrb[139].mxu1  ;;  %v7568_v9 = vld [vmem:[%s9698_s9 + $0x18] ss:$0 sm:$0xff] }
 0x497   :  { %v5331_v49 = vadd.f32 %v5329_v13, %v5267_v12  ;;  %v5394_v17 = vadd.f32 %v5392_v11, %v5330_v10 }
 0x499   :  { %v5395_v19 = vadd.f32 %v5393_v15, %v5331_v49 }
 0x49a   :  { %v5444_v20 = vpop.f32.mrb[140].mxu0  ;;  %v5508_v51 = vpop.f32.mrb[140].mxu1 }
 0x49b   :  { %v5456_v21 = vmul.f32 %v7538_v50, %v5444_v20  ;;  %v7915_v52 = vpop.f32.mrb[141].mxu0  ;;  %v5520_v22 = vmul.f32 %v7543_v18, %v5508_v51  ;;  %v7921_v23 = vpop.f32.mrb[141].mxu1 }
 0x49c   :  { %v5447_v24 = vpop.f32.mrb[142].mxu0  ;;  %v5511_v25 = vpop.f32.mrb[142].mxu1 }
 0x49d   :  { %v5458_v26 = vadd.f32 %v5456_v21, %v5394_v17  ;;  %v5457_v27 = vmul.f32 %v7538_v50, %v5447_v24  ;;  %v7916_v28 = vpop.f32.mrb[143].mxu0  ;;  %v5521_v29 = vmul.f32 %v7543_v18, %v5511_v25  ;;  %v7922_v31 = vpop.f32.mrb[143].mxu1  ;;  %v5865_v25 = vld [vmem:[%s9699_s7 + $0x8] sm:$0xff] }
 0x49e   :  { %v5849_v18 = vpop.permute.xlu1 %5848  ;;  %v5854_v51 = vpop.permute.xlu0 %5853 }
 0x49f   :  { %v5459_v32 = vadd.f32 %v5457_v27, %v5395_v19  ;;  %v5522_v33 = vadd.f32 %v5520_v22, %v5458_v26  ;;  %v5864_v26 = vld [vmem:[%s9699_s7] sm:$0xff]  ;;  %s9748_s7 = smov 120  }
 0x4a1   :  { %v5523_v36 = vadd.f32 %v5521_v29, %v5459_v32 }
 0x4a2   :  { %v5572_v37 = vpop.f32.mrb[144].mxu0  ;;  %v5636_v38 = vpop.f32.mrb[144].mxu1 }
 0x4a3   :  { %v5584_v39 = vmul.f32 %v7548_v34, %v5572_v37  ;;  %v7927_v40 = vpop.f32.mrb[145].mxu0  ;;  %v5648_v41 = vmul.f32 %v7553_v35, %v5636_v38  ;;  %v7933_v42 = vpop.f32.mrb[145].mxu1  ;;  %v5867_v37 = vld [vmem:[%s9700_s8 + $0x8] sm:$0xff] }
 0x4a4   :  { %v5575_v43 = vpop.f32.mrb[146].mxu0  ;;  %v5639_v44 = vpop.f32.mrb[146].mxu1 }
 0x4a5   :  { %v5586_v46 = vadd.f32 %v5584_v39, %v5522_v33  ;;  %v5585_v47 = vmul.f32 %v7548_v34, %v5575_v43  ;;  %v7928_v48 = vpop.f32.mrb[147].mxu0  ;;  %v5649_v3 = vmul.f32 %v7553_v35, %v5639_v44  ;;  %v7934_v53 = vpop.f32.mrb[147].mxu1 }
 0x4a7   :  { %v5587_v54 = vadd.f32 %v5585_v47, %v5523_v36  ;;  %v5650_v55 = vadd.f32 %v5648_v41, %v5586_v46  ;;  %v5866_v36 = vld [vmem:[%s9700_s8] sm:$0xff] }
 0x4a9   :  { %v5651_v58 = vadd.f32 %v5649_v3, %v5587_v54 }
 0x4aa   :  { %v5700_v59 = vpop.f32.mrb[148].mxu0  ;;  %v5764_v60 = vpop.f32.mrb[148].mxu1 }
 0x4ab   :  { %v5712_v61 = vmul.f32 %v7558_v56, %v5700_v59  ;;  %v7939_v62 = vpop.f32.mrb[149].mxu0  ;;  %v5776_v63 = vmul.f32 %v7563_v57, %v5764_v60  ;;  %v7945_v0 = vpop.f32.mrb[149].mxu1 }
 0x4ac   :  { %v5703_v1 = vpop.f32.mrb[150].mxu0  ;;  %v5767_v12 = vpop.f32.mrb[150].mxu1  ;;  %v6506_v62 = vld [vmem:[%s9702_s11] sm:$0xff] }
 0x4ad   :  { %v5714_v2 = vadd.f32 %v5712_v61, %v5650_v55  ;;  %v5713_v4 = vmul.f32 %v7558_v56, %v5703_v1  ;;  %v7940_v5 = vpop.f32.mrb[151].mxu0  ;;  %v5777_v8 = vmul.f32 %v7563_v57, %v5767_v12  ;;  %v7946_v11 = vpop.f32.mrb[151].mxu1  ;;  %v6507_v61 = vld [vmem:[%s9702_s11 + $0x8] sm:$0xff]  ;;  %v8209_v12 = vld [vmem:[%s9701_s10] sm:$0xff]  }
 0x4ae   :  { %v8208_v1 = vld [vmem:[%s9701_s10 + $0x8] sm:$0xff]   ;;  %v8210_v5 = vld [vmem:[%s9701_s10 + $0x18] sm:$0xff]  }
 0x4af   :  { %v5715_v6 = vadd.f32 %v5713_v4, %v5651_v58  ;;  %v5778_v7 = vadd.f32 %v5776_v63, %v5714_v2 }
 0x4b1   :  { %v5779_v10 = vadd.f32 %v5777_v8, %v5715_v6  ;;  %v8211_v8 = vld [vmem:[%s9701_s10 + $0x10] sm:$0xff]   ;;  %v8212_v6 = vld [vmem:[%s9701_s10 + $0x20] sm:$0xff]  }
 0x4b2   :  { %v5828_v13 = vpop.f32.mrb[152].mxu0 }
 0x4b3   :  { %v5840_v14 = vmul.f32 %v7568_v9, %v5828_v13  ;;  %v7951_v15 = vpop.f32.mrb[153].mxu0  ;;  %v8214_v13 = vld [vmem:[%s9701_s10 + $0x30] sm:$0xff]  }
 0x4b4   :  { %v5831_v16 = vpop.f32.mrb[154].mxu0 }
 0x4b5   :  { %v5842_v49 = vadd.f32 %v5840_v14, %v5778_v7  ;;  %v5841_v17 = vmul.f32 %v7568_v9, %v5831_v16  ;;  %v7952_v50 = vpop.f32.mrb[155].mxu0  ;;  %v8213_v7 = vld [vmem:[%s9701_s10 + $0x28] sm:$0xff]   ;;  %v8215_v14 = vld [vmem:[%s9701_s10 + $0x38] sm:$0xff]   ;;  %v8216_v16 = vld [vmem:[%s9701_s10 + $0x40] sm:$0xff]  }
 0x4b6   :  { %v8219_v50 = vld [vmem:[%s9703_s15 + $0x10] sm:$0xff]  }
 0x4b7   :  { %v5856_v19 = vadd.f32 %v5849_v18, %v5842_v49  ;;  %v5843_v20 = vadd.f32 %v5841_v17, %v5779_v10  ;;  %v8217_v49 = vld [vmem:[%s9703_s15] sm:$0xff]   ;;  %v8218_v17 = vld [vmem:[%s9703_s15 + $0x8] sm:$0xff]   ;;  %v8220_v18 = vld [vmem:[%s9703_s15 + $0x18] sm:$0xff]  }
 0x4b9   :  { %v5857_v21 = vadd.f32 %v5854_v51, %v5843_v20  ;;  %vm5858_vm12 = vcmp.gt.f32.partialorder %v5856_v19, 0.0  ;;  %v5860_v52 = vmul.f32 0.01, %v5856_v19  ;;  %v8222_v20 = vld [vmem:[%s9703_s15 + $0x28] sm:$0xff]   ;;  %v8223_v51 = vld [vmem:[%s9703_s15 + $0x30] sm:$0xff]  }
 0x4bb   :  { %v5862_v22 = vsel %vm5858_vm12, %v5856_v19, %v5860_v52  ;;  %vm5859_vm13 = vcmp.gt.f32.partialorder %v5857_v21, 0.0  ;;  %v5861_v23 = vmul.f32 0.01, %v5857_v21  ;;  %v8221_v19 = vld [vmem:[%s9703_s15 + $0x20] sm:$0xff]  }
 0x4bc   :  { %5868 = vadd.xlane.f32.xlu1 %v5862_v22  ;;  %v7571_v52 = vld [vmem:[%s9704_s14] ss:$0 sm:$0xff] }
 0x4bd   :  { %v5863_v24 = vsel %vm5859_vm13, %v5857_v21, %v5861_v23  ;;  %v8224_v21 = vld [vmem:[%s9703_s15 + $0x38] sm:$0xff]  }
 0x4be   :  { %5870 = vadd.xlane.f32.xlu0 %v5863_v24 }
 0x4cd   :  { %5898 = vperm.xlu1 %8125, %v5865_v25  }
 0x4d4   :  { %5893 = vperm.xlu0 %8124, %v5864_v26  }
 0x549   :  { %v5869_v27 = vpop.xlane.xlu1 %5868 }
 0x54a   :  { %v5873_v28 = vmul.f32 0.0078125, %v5869_v27 }
 0x54b   :  { %v5871_v29 = vpop.xlane.xlu0 %5870 }
 0x54c   :  { %v5875_v31 = vsub.f32 %v5862_v22, %v5873_v28  ;;  %v5874_v32 = vmul.f32 0.0078125, %v5871_v29  ;;  %v7576_v22 = vld [vmem:[%s9704_s14 + $0x1] ss:$0 sm:$0xff] }
 0x54d   :  { %v5899_v39 = vpop.permute.xlu1 %5898 }
 0x54e   :  { %v5876_v33 = vsub.f32 %v5863_v24, %v5874_v32  ;;  %v5877_v34 = vmul.f32 %v5875_v31, %v5875_v31 }
 0x550   :  { %5879 = vadd.xlane.f32.xlu0 %v5877_v34  ;;  %v5878_v35 = vmul.f32 %v5876_v33, %v5876_v33 }
 0x552   :  { %5881 = vadd.xlane.f32.xlu1 %v5878_v35 }
 0x553   :  { %v5894_v38 = vpop.permute.xlu0 %5893 }
 0x563   :  { %5905 = vperm.xlu1 %8125, %v5866_v36  }
 0x566   :  { %5910 = vperm.xlu0 %8124, %v5867_v37  }
 0x5dd   :  { %v5880_v40 = vpop.xlane.xlu0 %5879 }
 0x5de   :  { %v5883_v41 = vmul.f32 0.0078125, %v5880_v40 }
 0x5df   :  { %v5882_v42 = vpop.xlane.xlu1 %5881 }
 0x5e0   :  { %v5885_v43 = vadd.f32 1e-05, %v5883_v41  ;;  %v5884_v44 = vmul.f32 0.0078125, %v5882_v42 }
 0x5e2   :  { %8234 = vrsqrt.f32 %v5885_v43  ;;  %v5886_v46 = vadd.f32 1e-05, %v5884_v44 }
 0x5e3   :  { %v5906_v56 = vpop.permute.xlu1 %5905 }
 0x5e4   :  { %8236 = vrsqrt.f32 %v5886_v46 }
 0x5e5   :  { %v5911_v57 = vpop.permute.xlu0 %5910 }
 0x5ec   :  { %v8235_v47 = vpop.eup %8234 }
 0x5ed   :  { %v5889_v48 = vmul.f32 %v8235_v47, %v5875_v31 }
 0x5ee   :  { %v8237_v3 = vpop.eup %8236 }
 0x5ef   :  { %v5901_v53 = vmul.f32 %v5894_v38, %v5889_v48  ;;  %v5890_v54 = vmul.f32 %v8237_v3, %v5876_v33  ;;  %v7581_v38 = vld [vmem:[%s9704_s14 + $0x2] ss:$0 sm:$0xff] }
 0x5f1   :  { %v5902_v55 = vmul.f32 %v5899_v39, %v5890_v54  ;;  %v5913_v58 = vadd.f32 %v5906_v56, %v5901_v53  ;;  %v7586_v39 = vld [vmem:[%s9704_s14 + $0x3] ss:$0 sm:$0xff] }
 0x5f3   :  { %v5914_v59 = vadd.f32 %v5911_v57, %v5902_v55 }
 0x5f5   :  { %v5915_v60 = vpack.c.bf16 %v5914_v59, %v5913_v58  ;;  %v7591_v59 = vld [vmem:[%s9704_s14 + $0x4] ss:$0 sm:$0xff] }
 0x5f7   :  { %5988 = vrot.lane.b32.xlu0 %v5915_v60, %s8270_s27  ;;  %5924 = vrot.lane.b32.xlu1 %v5915_v60, %s8271_s24  ;;  %s8283_s27 = smov 123   ;;  %s8284_s24 = smov 124  }
 0x5fb   :  { %6116 = vrot.lane.b32.xlu0 %v5915_v60, %s9739_s28  ;;  %6052 = vrot.lane.b32.xlu1 %v5915_v60, %s8273_s4 }
 0x5ff   :  { %6305 = vrot.lane.b32.xlu0 %v5915_v60, %s8274_s0  ;;  %6241 = vrot.lane.b32.xlu1 %v5915_v60, %s9742_s29 }
 0x603   :  { %6433 = vrot.lane.b32.xlu0 %v5915_v60, %s8276_s22  ;;  %6369 = vrot.lane.b32.xlu1 %v5915_v60, %s9748_s7  ;;  %s8280_s7 = smov 5  }
 0x607   :  { %6515 = vperm.xlu0 %8124, %v6507_v61   ;;  %6510 = vperm.xlu1 %8125, %v6506_v62  }
 0x669   :  { %v5989_v63 = vpop.permute.xlu0 %5988  ;;  %v5925_v0 = vpop.permute.xlu1 %5924 }
 0x66a   :  { %7954 = vmatpush3.bf16.msra.mxu1 %v5925_v0  ;;  %7960 = vmatpush3.bf16.msra.mxu0 %v5989_v63 }
 0x66b   :  { %7971 = vmatprep.subr.bf16.mxu0 %v8267_v30  ;;  %7965 = vmatprep.subr.bf16.mxu1 %v8267_v30 }
 0x66d   :  { %7962 = vmatmul.mubr.msk.bf16.vlgmr.msra.gmra.mrb[156].mxu0 %vm103_vm1, %v8208_v1  ;;  %v6117_v2 = vpop.permute.xlu0 %6116  ;;  %7956 = vmatmul.mubr.msk.bf16.vlgmr.msra.gmra.mrb[152].mxu1 %vm103_vm1, %v8209_v12  ;;  %v6053_v4 = vpop.permute.xlu1 %6052 }
 0x66e   :  { %7966 = vmatpush3.bf16.msra.mxu1 %v6053_v4  ;;  %7972 = vmatpush3.bf16.msra.mxu0 %v6117_v2 }
 0x66f   :  { %7967 = vmatprep.mubr.msk.bf16.mxu1 %vm8268_vm9, %v8267_v30  ;;  %7973 = vmatprep.mubr.msk.bf16.mxu0 %vm8268_vm9, %v8267_v30 }
 0x670   :  { %7977 = vmatprep.subr.bf16.mxu1 %v8267_v30  ;;  %7983 = vmatprep.subr.bf16.mxu0 %v8267_v30 }
 0x671   :  { %v6242_v11 = vpop.permute.xlu1 %6241  ;;  %v6306_v9 = vpop.permute.xlu0 %6305 }
 0x675   :  { %7974 = vmatmul.mubr.msk.bf16.vlgmr.msra.gmra.mrb[160].mxu0 %vm103_vm1, %v8210_v5  ;;  %7968 = vmatmul.mubr.msk.bf16.vlgmr.msra.gmra.mrb[156].mxu1 %vm103_vm1, %v8211_v8  ;;  %v6370_v10 = vpop.permute.xlu1 %6369  ;;  %v6434_v15 = vpop.permute.xlu0 %6433 }
 0x676   :  { %7978 = vmatpush3.bf16.msra.mxu1 %v5915_v60  ;;  %7984 = vmatpush3.bf16.msra.mxu0 %v6242_v11  ;;  %v7596_v60 = vld [vmem:[%s9704_s14 + $0x5] ss:$0 sm:$0xff] }
 0x677   :  { %7979 = vmatprep.mubr.msk.bf16.mxu1 %vm8268_vm9, %v8267_v30  ;;  %7985 = vmatprep.mubr.msk.bf16.mxu0 %vm8268_vm9, %v8267_v30 }
 0x678   :  { %7989 = vmatprep.subr.bf16.mxu1 %v8267_v30  ;;  %7995 = vmatprep.subr.bf16.mxu0 %v8267_v30 }
 0x67d   :  { %7980 = vmatmul.mubr.msk.bf16.vlgmr.msra.gmra.mrb[160].mxu1 %vm103_vm1, %v8212_v6  ;;  %7986 = vmatmul.mubr.msk.bf16.vlgmr.msra.gmra.mrb[164].mxu0 %vm103_vm1, %v8213_v7 }
 0x67e   :  { %7990 = vmatpush3.bf16.msra.mxu1 %v6306_v9  ;;  %7996 = vmatpush3.bf16.msra.mxu0 %v6370_v10 }
 0x67f   :  { %7991 = vmatprep.mubr.msk.bf16.mxu1 %vm8268_vm9, %v8267_v30  ;;  %8001 = vmatprep.subr.bf16.mxu1 %v8267_v30 }
 0x680   :  { %7997 = vmatprep.mubr.msk.bf16.mxu0 %vm8268_vm9, %v8267_v30  ;;  %8007 = vmatprep.subr.bf16.mxu0 %v8267_v30 }
 0x685   :  { %7992 = vmatmul.mubr.msk.bf16.vlgmr.msra.gmra.mrb[164].mxu1 %vm103_vm1, %v8214_v13  ;;  %7998 = vmatmul.mubr.msk.bf16.vlgmr.msra.gmra.mrb[168].mxu0 %vm103_vm1, %v8215_v14  ;;  %v7601_v14 = vld [vmem:[%s9704_s14 + $0x6] ss:$0 sm:$0xff] }
 0x686   :  { %8002 = vmatpush3.bf16.msra.mxu1 %v6434_v15  ;;  %8003 = vmatprep.mubr.msk.bf16.mxu1 %vm8268_vm9, %v8267_v30  ;;  %v7606_v15 = vld [vmem:[%s9704_s14 + $0x7] ss:$0 sm:$0xff] }
 0x687   :  { %8023 = vmatprep.mubr.msk.bf16.mxu0 %vm8268_vm9, %v8267_v30  ;;  %8027 = vmatprep.subr.bf16.mxu1 %v8267_v30 }
 0x688   :  { %8008 = vmatpush3.bf16.msra.mxu0 %v8217_v49 }
 0x689   :  { %8009 = vmatprep.subr.bf16.mxu0 %v8267_v30 }
 0x68c   :  { %8010 = vmatpush3.bf16.msra.mxu0 %v8218_v17 }
 0x68d   :  { %8004 = vmatmul.mubr.msk.bf16.vlgmr.msra.gmra.mrb[168].mxu1 %vm103_vm1, %v8216_v16  ;;  %8011 = vmatprep.subr.bf16.mxu0 %v8267_v30 }
 0x68e   :  { %8029 = vmatprep.mubr.msk.bf16.mxu1 %vm8268_vm9, %v8267_v30 }
 0x690   :  { %8012 = vmatpush3.bf16.msra.mxu0 %v8219_v50 }
 0x691   :  { %8013 = vmatprep.subr.bf16.mxu0 %v8267_v30 }
 0x694   :  { %8014 = vmatpush3.bf16.msra.mxu0 %v8220_v18 }
 0x695   :  { %8015 = vmatprep.subr.bf16.mxu0 %v8267_v30 }
 0x698   :  { %8016 = vmatpush3.bf16.msra.mxu0 %v8221_v19 }
 0x699   :  { %8017 = vmatprep.subr.bf16.mxu0 %v8267_v30 }
 0x69c   :  { %8018 = vmatpush3.bf16.msra.mxu0 %v8222_v20 }
 0x69d   :  { %8019 = vmatprep.subr.bf16.mxu0 %v8267_v30 }
 0x6a0   :  { %8020 = vmatpush3.bf16.msra.mxu0 %v8223_v51 }
 0x6a1   :  { %8021 = vmatprep.subr.bf16.mxu0 %v8267_v30 }
 0x6a4   :  { %8022 = vmatpush3.bf16.msra.mxu0 %v8224_v21 }
 0x6a5   :  { %8051 = vmatprep.subr.bf16.mxu0 %v8267_v30 }
 0x740   :  { %v5964_v23 = vpop.f32.mrb[152].mxu1  ;;  %v6028_v24 = vpop.f32.mrb[156].mxu0 }
 0x741   :  { %v5976_v25 = vmul.f32 %v7571_v52, %v5964_v23  ;;  %v6040_v26 = vmul.f32 %v7576_v22, %v6028_v24  ;;  %v7957_v27 = vpop.f32.mrb[153].mxu1  ;;  %v7963_v28 = vpop.f32.mrb[157].mxu0 }
 0x742   :  { %v5967_v29 = vpop.f32.mrb[154].mxu1  ;;  %v6031_v31 = vpop.f32.mrb[158].mxu0  ;;  %v7611_v28 = vld [vmem:[%s9704_s14 + $0x8] ss:$0 sm:$0xff] }
 0x743   :  { %v6042_v32 = vadd.f32 %v6040_v26, %v5976_v25  ;;  %v5977_v33 = vmul.f32 %v7571_v52, %v5967_v29  ;;  %v6041_v34 = vmul.f32 %v7576_v22, %v6031_v31  ;;  %v7958_v35 = vpop.f32.mrb[155].mxu1  ;;  %v7964_v36 = vpop.f32.mrb[159].mxu0 }
 0x745   :  { %v6043_v37 = vadd.f32 %v6041_v34, %v5977_v33 }
 0x748   :  { %v6092_v40 = vpop.f32.mrb[156].mxu1  ;;  %v6156_v41 = vpop.f32.mrb[160].mxu0 }
 0x749   :  { %v6104_v42 = vmul.f32 %v7581_v38, %v6092_v40  ;;  %v7969_v43 = vpop.f32.mrb[157].mxu1  ;;  %v6168_v44 = vmul.f32 %v7586_v39, %v6156_v41  ;;  %v7975_v46 = vpop.f32.mrb[161].mxu0  ;;  %v6618_v40 = vand.u32 127, %v195_v45 }
 0x74a   :  { %v6095_v47 = vpop.f32.mrb[158].mxu1  ;;  %v6159_v48 = vpop.f32.mrb[162].mxu0 }
 0x74b   :  { %v6106_v3 = vadd.f32 %v6104_v42, %v6042_v32  ;;  %v6105_v53 = vmul.f32 %v7581_v38, %v6095_v47  ;;  %v7970_v54 = vpop.f32.mrb[159].mxu1  ;;  %v6169_v55 = vmul.f32 %v7586_v39, %v6159_v48  ;;  %v7976_v56 = vpop.f32.mrb[163].mxu0  ;;  %vm6619_vm14 = vcmp.lt.s32.totalorder %v6618_v40, 32  ;;  %v8230_v40 = vld [vmem:[%s9707_s16 + $0x18] sm:$0xff]  }
 0x74c   :  { %v6511_v41 = vpop.permute.xlu1 %6510  ;;  %v6516_v46 = vpop.permute.xlu0 %6515  ;;  %v7620_v54 = vsel %vm6619_vm14, 1.0, %v8267_v30 }
 0x74d   :  { %v6107_v57 = vadd.f32 %v6105_v53, %v6043_v37  ;;  %v6170_v58 = vadd.f32 %v6168_v44, %v6106_v3 }
 0x74f   :  { %v6171_v61 = vadd.f32 %v6169_v55, %v6107_v57 }
 0x750   :  { %v6217_v62 = vpop.f32.mrb[160].mxu1  ;;  %v6281_v63 = vpop.f32.mrb[164].mxu0 }
 0x751   :  { %v6229_v0 = vmul.f32 %v7591_v59, %v6217_v62  ;;  %v7981_v1 = vpop.f32.mrb[161].mxu1  ;;  %v6293_v12 = vmul.f32 %v7596_v60, %v6281_v63  ;;  %v7987_v2 = vpop.f32.mrb[165].mxu0 }
 0x752   :  { %v6220_v4 = vpop.f32.mrb[162].mxu1  ;;  %v6284_v5 = vpop.f32.mrb[166].mxu0 }
 0x753   :  { %v6231_v8 = vadd.f32 %v6229_v0, %v6170_v58  ;;  %v6230_v11 = vmul.f32 %v7591_v59, %v6220_v4  ;;  %v7982_v6 = vpop.f32.mrb[163].mxu1  ;;  %v6294_v7 = vmul.f32 %v7596_v60, %v6284_v5  ;;  %v7988_v9 = vpop.f32.mrb[167].mxu0  ;;  %v6614_v59 = vld [vmem:[%s9705_s12 + $0x8] sm:$0xff]  ;;  %v6613_v60 = vld [vmem:[%s9705_s12] sm:$0xff] }
 0x754   :  { %v6616_v6 = vld [vmem:[%s9706_s13 + $0x8] sm:$0xff] }
 0x755   :  { %v6232_v10 = vadd.f32 %v6230_v11, %v6171_v61  ;;  %v6295_v13 = vadd.f32 %v6293_v12, %v6231_v8  ;;  %v6615_v11 = vld [vmem:[%s9706_s13] sm:$0xff]  ;;  %s8279_s13 = smov 4  }
 0x757   :  { %v6296_v16 = vadd.f32 %v6294_v7, %v6232_v10 }
 0x758   :  { %v6345_v49 = vpop.f32.mrb[164].mxu1  ;;  %v6409_v17 = vpop.f32.mrb[168].mxu0 }
 0x759   :  { %v6357_v50 = vmul.f32 %v7601_v14, %v6345_v49  ;;  %v7993_v18 = vpop.f32.mrb[165].mxu1  ;;  %v6421_v19 = vmul.f32 %v7606_v15, %v6409_v17  ;;  %v7999_v20 = vpop.f32.mrb[169].mxu0 }
 0x75a   :  { %v6348_v51 = vpop.f32.mrb[166].mxu1  ;;  %v6412_v21 = vpop.f32.mrb[170].mxu0 }
 0x75b   :  { %v6359_v52 = vadd.f32 %v6357_v50, %v6295_v13  ;;  %v6358_v22 = vmul.f32 %v7601_v14, %v6348_v51  ;;  %v7994_v23 = vpop.f32.mrb[167].mxu1  ;;  %v6422_v24 = vmul.f32 %v7606_v15, %v6412_v21  ;;  %v8000_v25 = vpop.f32.mrb[171].mxu0 }
 0x75c   :  { %v8226_v25 = vld [vmem:[%s9707_s16 + $0x20] sm:$0xff]  }
 0x75d   :  { %v6360_v26 = vadd.f32 %v6358_v22, %v6296_v16  ;;  %v6423_v27 = vadd.f32 %v6421_v19, %v6359_v52 }
 0x75f   :  { %v6424_v29 = vadd.f32 %v6422_v24, %v6360_v26  ;;  %v7248_v26 = vld [vmem:[%s9708_s17 + $0x8] sm:$0xff] }
 0x760   :  { %v6473_v31 = vpop.f32.mrb[168].mxu1 }
 0x761   :  { %v6485_v32 = vmul.f32 %v7611_v28, %v6473_v31  ;;  %v8005_v33 = vpop.f32.mrb[169].mxu1  ;;  %v8225_v31 = vld [vmem:[%s9707_s16] sm:$0xff]  }
 0x762   :  { %v6476_v34 = vpop.f32.mrb[170].mxu1 }
 0x763   :  { %v6487_v35 = vadd.f32 %v6485_v32, %v6423_v27  ;;  %v6486_v36 = vmul.f32 %v7611_v28, %v6476_v34  ;;  %v8006_v37 = vpop.f32.mrb[171].mxu1  ;;  %v7247_v27 = vld [vmem:[%s9708_s17] sm:$0xff]  ;;  %v8227_v34 = vld [vmem:[%s9707_s16 + $0x8] sm:$0xff]  }
 0x765   :  { %v6488_v38 = vadd.f32 %v6486_v36, %v6424_v29 }
 0x767   :  { %v6489_v39 = vpack.c.bf16 %v6488_v38, %v6487_v35  ;;  %v8228_v35 = vld [vmem:[%s9707_s16 + $0x30] sm:$0xff]  }
 0x768   :  { %v8229_v38 = vld [vmem:[%s9707_s16 + $0x10] sm:$0xff]  }
 0x769   :  { %8024 = vmatmul.mubr.bf16.vlgmr.msra.gmra.mrb[172].mxu0 %v6489_v39  ;;  %v8233_v39 = vld [vmem:[%s9707_s16 + $0x40] sm:$0xff]  }
 0x76a   :  { %8053 = vmatprep.mubr.msk.bf16.mxu0 %vm8268_vm9, %v8267_v30 }
 0x83c   :  { %v6600_v42 = vpop.f32.mrb[172].mxu0 }
 0x83d   :  { %v6601_v43 = vadd.f32 %v6600_v42, %v6511_v41  ;;  %v8025_v44 = vpop.f32.mrb[173].mxu0  ;;  %v8231_v42 = vld [vmem:[%s9707_s16 + $0x28] sm:$0xff]  }
 0x83e   :  { %v6603_v47 = vpop.f32.mrb[174].mxu0  ;;  %v8232_v44 = vld [vmem:[%s9707_s16 + $0x38] sm:$0xff]  }
 0x83f   :  { %vm6607_vm15 = vcmp.gt.f32.partialorder %v6601_v43, 0.0  ;;  %v6609_v48 = vmul.f32 0.01, %v6601_v43  ;;  %v6604_v3 = vadd.f32 %v6603_v47, %v6516_v46  ;;  %v8026_v53 = vpop.f32.mrb[175].mxu0 }
 0x841   :  { %vm6608_vm0 = vcmp.gt.f32.partialorder %v6604_v3, 0.0  ;;  %v6610_v55 = vmul.f32 0.01, %v6604_v3  ;;  %v6611_v56 = vsel %vm6607_vm15, %v6601_v43, %v6609_v48 }
 0x842   :  { %v6622_v57 = vmul.f32 %v7620_v54, %v6611_v56 }
 0x843   :  { %v6612_v58 = vsel %vm6608_vm0, %v6604_v3, %v6610_v55 }
 0x844   :  { %6624 = vadd.xlane.f32.xlu1 %v6622_v57  ;;  %v6623_v45 = vmul.f32 %v7620_v54, %v6612_v58  ;;  %v7623_v57 = vld [vmem:[%s9709_s18] ss:$0 sm:$0xff] }
 0x846   :  { %6626 = vadd.xlane.f32.xlu0 %v6623_v45 }
 0x855   :  { %6656 = vperm.xlu1 %8125, %v6614_v59  }
 0x85c   :  { %6651 = vperm.xlu0 %8124, %v6613_v60  }
 0x8d1   :  { %v6625_v61 = vpop.xlane.xlu1 %6624 }
 0x8d2   :  { %v6629_v62 = vmul.f32 0.03125, %v6625_v61 }
 0x8d3   :  { %v6627_v63 = vpop.xlane.xlu0 %6626 }
 0x8d4   :  { %v6631_v0 = vsub.f32 %v6611_v56, %v6629_v62  ;;  %v6630_v1 = vmul.f32 0.03125, %v6627_v63 }
 0x8d5   :  { %v6657_v9 = vpop.permute.xlu1 %6656 }
 0x8d6   :  { %v6632_v12 = vsub.f32 %v6612_v58, %v6630_v1  ;;  %v6633_v2 = vmul.f32 %v7620_v54, %v6631_v0 }
 0x8d8   :  { %v6635_v4 = vmul.f32 %v6633_v2, %v6633_v2  ;;  %v6634_v5 = vmul.f32 %v7620_v54, %v6632_v12 }
 0x8da   :  { %6637 = vadd.xlane.f32.xlu0 %v6635_v4  ;;  %v6636_v8 = vmul.f32 %v6634_v5, %v6634_v5 }
 0x8db   :  { %v6652_v7 = vpop.permute.xlu0 %6651 }
 0x8dc   :  { %6639 = vadd.xlane.f32.xlu1 %v6636_v8 }
 0x8ed   :  { %6663 = vperm.xlu1 %8125, %v6615_v11   ;;  %v7633_v11 = vld [vmem:[%s9709_s18 + $0x2] ss:$0 sm:$0xff] }
 0x8f0   :  { %6668 = vperm.xlu0 %8124, %v6616_v6  }
 0x967   :  { %v6638_v10 = vpop.xlane.xlu0 %6637 }
 0x968   :  { %v6641_v13 = vmul.f32 0.03125, %v6638_v10 }
 0x969   :  { %v6640_v14 = vpop.xlane.xlu1 %6639 }
 0x96a   :  { %v6643_v15 = vadd.f32 1e-05, %v6641_v13  ;;  %v6642_v16 = vmul.f32 0.03125, %v6640_v14 }
 0x96c   :  { %8238 = vrsqrt.f32 %v6643_v15  ;;  %v6644_v49 = vadd.f32 1e-05, %v6642_v16 }
 0x96d   :  { %v6664_v21 = vpop.permute.xlu1 %6663 }
 0x96e   :  { %8240 = vrsqrt.f32 %v6644_v49 }
 0x96f   :  { %v6669_v52 = vpop.permute.xlu0 %6668 }
 0x976   :  { %v8239_v17 = vpop.eup %8238 }
 0x977   :  { %v6647_v50 = vmul.f32 %v8239_v17, %v6631_v0 }
 0x978   :  { %v8241_v18 = vpop.eup %8240 }
 0x979   :  { %v6659_v19 = vmul.f32 %v6652_v7, %v6647_v50  ;;  %v6648_v20 = vmul.f32 %v8241_v18, %v6632_v12 }
 0x97b   :  { %v6660_v51 = vmul.f32 %v6657_v9, %v6648_v20  ;;  %v6671_v22 = vadd.f32 %v6664_v21, %v6659_v19  ;;  %v7638_v19 = vld [vmem:[%s9709_s18 + $0x3] ss:$0 sm:$0xff]  ;;  %v7643_v20 = vld [vmem:[%s9709_s18 + $0x4] ss:$0 sm:$0xff] }
 0x97d   :  { %v6672_v23 = vadd.f32 %v6669_v52, %v6660_v51 }
 0x97f   :  { %v6673_v24 = vpack.c.bf16 %v6672_v23, %v6671_v22 }
 0x981   :  { %6746 = vrot.lane.b32.xlu0 %v6673_v24, %s8279_s13  ;;  %6682 = vrot.lane.b32.xlu1 %v6673_v24, %s8280_s7 }
 0x982   :  { %8052 = vmatpush3.bf16.msra.mxu0 %v6673_v24 }
 0x983   :  { %8063 = vmatprep.subr.bf16.mxu0 %v8267_v30 }
 0x985   :  { %6874 = vrot.lane.b32.xlu0 %v6673_v24, %s9739_s28  ;;  %6810 = vrot.lane.b32.xlu1 %v6673_v24, %s8281_s26 }
 0x986   :  { %8054 = vmatmul.mubr.msk.bf16.vlgmr.msra.gmra.mrb[176].mxu0 %vm103_vm1, %v8226_v25 }
 0x987   :  { %8065 = vmatprep.mubr.msk.bf16.mxu0 %vm8268_vm9, %v8267_v30 }
 0x989   :  { %7063 = vrot.lane.b32.xlu0 %v6673_v24, %s8282_s23  ;;  %6999 = vrot.lane.b32.xlu1 %v6673_v24, %s9742_s29 }
 0x98d   :  { %7191 = vrot.lane.b32.xlu0 %v6673_v24, %s8283_s27  ;;  %7127 = vrot.lane.b32.xlu1 %v6673_v24, %s8284_s24 }
 0x991   :  { %7256 = vperm.xlu0 %8124, %v7248_v26   ;;  %7251 = vperm.xlu1 %8125, %v7247_v27  }
 0x9f3   :  { %v6747_v28 = vpop.permute.xlu0 %6746  ;;  %v6683_v29 = vpop.permute.xlu1 %6682 }
 0x9f4   :  { %8028 = vmatpush3.bf16.msra.mxu1 %v6683_v29 }
 0x9f5   :  { %8033 = vmatprep.subr.bf16.mxu1 %v8267_v30 }
 0x9f7   :  { %v6875_v32 = vpop.permute.xlu0 %6874  ;;  %8030 = vmatmul.mubr.msk.bf16.vlgmr.msra.gmra.mrb[172].mxu1 %vm103_vm1, %v8225_v31  ;;  %v6811_v36 = vpop.permute.xlu1 %6810  ;;  %v7648_v31 = vld [vmem:[%s9709_s18 + $0x5] ss:$0 sm:$0xff] }
 0x9f8   :  { %8034 = vmatpush3.bf16.msra.mxu1 %v6747_v28  ;;  %8035 = vmatprep.mubr.msk.bf16.mxu1 %vm8268_vm9, %v8267_v30 }
 0x9f9   :  { %8039 = vmatprep.subr.bf16.mxu1 %v8267_v30 }
 0x9fb   :  { %v7064_v33 = vpop.permute.xlu0 %7063  ;;  %v7000_v41 = vpop.permute.xlu1 %6999 }
 0x9fc   :  { %8064 = vmatpush3.bf16.msra.mxu0 %v7064_v33 }
 0x9fd   :  { %8075 = vmatprep.subr.bf16.mxu0 %v8267_v30 }
 0x9ff   :  { %v7192_v37 = vpop.permute.xlu0 %7191  ;;  %8036 = vmatmul.mubr.msk.bf16.vlgmr.msra.gmra.mrb[176].mxu1 %vm103_vm1, %v8227_v34  ;;  %8066 = vmatmul.mubr.msk.bf16.vlgmr.msra.gmra.mrb[180].mxu0 %vm103_vm1, %v8228_v35  ;;  %v7128_v43 = vpop.permute.xlu1 %7127 }
 0xa00   :  { %8040 = vmatpush3.bf16.msra.mxu1 %v6811_v36  ;;  %8076 = vmatpush3.bf16.msra.mxu0 %v7192_v37 }
 0xa01   :  { %8041 = vmatprep.mubr.msk.bf16.mxu1 %vm8268_vm9, %v8267_v30  ;;  %8045 = vmatprep.subr.bf16.mxu1 %v8267_v30 }
 0xa02   :  { %8077 = vmatprep.mubr.msk.bf16.mxu0 %vm8268_vm9, %v8267_v30 }
 0xa07   :  { %8042 = vmatmul.mubr.msk.bf16.vlgmr.msra.gmra.mrb[180].mxu1 %vm103_vm1, %v8229_v38  ;;  %8078 = vmatmul.mubr.msk.bf16.vlgmr.msra.gmra.mrb[184].mxu0 %vm103_vm1, %v8233_v39 }
 0xa08   :  { %8046 = vmatpush3.bf16.msra.mxu1 %v6875_v32  ;;  %8047 = vmatprep.mubr.msk.bf16.mxu1 %vm8268_vm9, %v8267_v30  ;;  %v7653_v32 = vld [vmem:[%s9709_s18 + $0x6] ss:$0 sm:$0xff] }
 0xa09   :  { %8057 = vmatprep.subr.bf16.mxu1 %v8267_v30 }
 0xa0f   :  { %8048 = vmatmul.mubr.msk.bf16.vlgmr.msra.gmra.mrb[184].mxu1 %vm103_vm1, %v8230_v40 }
 0xa10   :  { %8058 = vmatpush3.bf16.msra.mxu1 %v7000_v41  ;;  %8059 = vmatprep.mubr.msk.bf16.mxu1 %vm8268_vm9, %v8267_v30 }
 0xa11   :  { %8069 = vmatprep.subr.bf16.mxu1 %v8267_v30 }
 0xa17   :  { %8060 = vmatmul.mubr.msk.bf16.vlgmr.msra.gmra.mrb[188].mxu1 %vm103_vm1, %v8231_v42 }
 0xa18   :  { %8070 = vmatpush3.bf16.msra.mxu1 %v7128_v43  ;;  %8071 = vmatprep.mubr.msk.bf16.mxu1 %vm8268_vm9, %v8267_v30  ;;  %v7628_v30 = vld [vmem:[%s9709_s18 + $0x1] ss:$0 sm:$0xff] }
 0xa1f   :  { %8072 = vmatmul.mubr.msk.bf16.vlgmr.msra.gmra.mrb[192].mxu1 %vm103_vm1, %v8232_v44 }
 0xa59   :  { %v6975_v46 = vpop.f32.mrb[176].mxu0 }
 0xa5a   :  { %v8055_v47 = vpop.f32.mrb[177].mxu0  ;;  %v6987_v22 = vmul.f32 %v7643_v20, %v6975_v46  ;;  %v7658_v46 = vld [vmem:[%s9709_s18 + $0x7] ss:$0 sm:$0xff] }
 0xa5b   :  { %v6978_v48 = vpop.f32.mrb[178].mxu0  ;;  %v7663_v47 = vld [vmem:[%s9709_s18 + $0x8] ss:$0 sm:$0xff] }
 0xa5c   :  { %v8056_v3 = vpop.f32.mrb[179].mxu0  ;;  %v6988_v29 = vmul.f32 %v7643_v20, %v6978_v48 }
 0xaca   :  { %v6722_v53 = vpop.f32.mrb[172].mxu1 }
 0xacb   :  { %v8031_v54 = vpop.f32.mrb[173].mxu1  ;;  %v6734_v59 = vmul.f32 %v7623_v57, %v6722_v53 }
 0xacc   :  { %v6725_v55 = vpop.f32.mrb[174].mxu1 }
 0xacd   :  { %v8032_v56 = vpop.f32.mrb[175].mxu1  ;;  %v6735_v1 = vmul.f32 %v7623_v57, %v6725_v55 }
 0xad2   :  { %v6786_v58 = vpop.f32.mrb[176].mxu1  ;;  %v7103_v45 = vpop.f32.mrb[180].mxu0 }
 0xad3   :  { %v6798_v60 = vmul.f32 %v7628_v30, %v6786_v58  ;;  %v8037_v61 = vpop.f32.mrb[177].mxu1  ;;  %v8067_v62 = vpop.f32.mrb[181].mxu0  ;;  %v7115_v37 = vmul.f32 %v7653_v32, %v7103_v45 }
 0xad4   :  { %v6789_v63 = vpop.f32.mrb[178].mxu1  ;;  %v7106_v0 = vpop.f32.mrb[182].mxu0 }
 0xad5   :  { %v6800_v12 = vadd.f32 %v6798_v60, %v6734_v59  ;;  %v6799_v2 = vmul.f32 %v7628_v30, %v6789_v63  ;;  %v8038_v4 = vpop.f32.mrb[179].mxu1  ;;  %v8068_v5 = vpop.f32.mrb[183].mxu0  ;;  %v7116_v44 = vmul.f32 %v7653_v32, %v7106_v0 }
 0xad6   :  { %v7252_v61 = vpop.permute.xlu1 %7251  ;;  %v7257_v0 = vpop.permute.xlu0 %7256 }
 0xad7   :  { %v6801_v8 = vadd.f32 %v6799_v2, %v6735_v1 }
 0xada   :  { %v6850_v6 = vpop.f32.mrb[180].mxu1  ;;  %v7231_v7 = vpop.f32.mrb[184].mxu0 }
 0xadb   :  { %v6862_v9 = vmul.f32 %v7633_v11, %v6850_v6  ;;  %v8043_v10 = vpop.f32.mrb[181].mxu1  ;;  %v8079_v13 = vpop.f32.mrb[185].mxu0  ;;  %v7243_v55 = vmul.f32 %v7663_v47, %v7231_v7 }
 0xadc   :  { %v6853_v14 = vpop.f32.mrb[182].mxu1  ;;  %v7234_v15 = vpop.f32.mrb[186].mxu0 }
 0xadd   :  { %v6864_v16 = vadd.f32 %v6862_v9, %v6800_v12  ;;  %v6863_v49 = vmul.f32 %v7633_v11, %v6853_v14  ;;  %v8044_v17 = vpop.f32.mrb[183].mxu1  ;;  %v8080_v50 = vpop.f32.mrb[187].mxu0  ;;  %v7244_v60 = vmul.f32 %v7663_v47, %v7234_v15 }
 0xadf   :  { %v6865_v18 = vadd.f32 %v6863_v49, %v6801_v8 }
 0xae2   :  { %v6914_v51 = vpop.f32.mrb[184].mxu1 }
 0xae3   :  { %v6926_v21 = vmul.f32 %v7638_v19, %v6914_v51  ;;  %v8049_v52 = vpop.f32.mrb[185].mxu1 }
 0xae4   :  { %v6917_v23 = vpop.f32.mrb[186].mxu1 }
 0xae5   :  { %v6928_v24 = vadd.f32 %v6926_v21, %v6864_v16  ;;  %v6927_v25 = vmul.f32 %v7638_v19, %v6917_v23  ;;  %v8050_v26 = vpop.f32.mrb[187].mxu1 }
 0xae7   :  { %v6929_v27 = vadd.f32 %v6927_v25, %v6865_v18  ;;  %v6989_v28 = vadd.f32 %v6987_v22, %v6928_v24 }
 0xae9   :  { %v6990_v33 = vadd.f32 %v6988_v29, %v6929_v27 }
 0xaea   :  { %v7039_v34 = vpop.f32.mrb[188].mxu1 }
 0xaeb   :  { %v7051_v35 = vmul.f32 %v7648_v31, %v7039_v34  ;;  %v8061_v36 = vpop.f32.mrb[189].mxu1 }
 0xaec   :  { %v7042_v38 = vpop.f32.mrb[190].mxu1 }
 0xaed   :  { %v7053_v39 = vadd.f32 %v7051_v35, %v6989_v28  ;;  %v7052_v40 = vmul.f32 %v7648_v31, %v7042_v38  ;;  %v8062_v41 = vpop.f32.mrb[191].mxu1 }
 0xaef   :  { %v7054_v42 = vadd.f32 %v7052_v40, %v6990_v33  ;;  %v7117_v43 = vadd.f32 %v7115_v37, %v7053_v39 }
 0xaf1   :  { %v7118_v48 = vadd.f32 %v7116_v44, %v7054_v42 }
 0xaf2   :  { %v7167_v3 = vpop.f32.mrb[192].mxu1 }
 0xaf3   :  { %v7179_v53 = vmul.f32 %v7658_v46, %v7167_v3  ;;  %v8073_v54 = vpop.f32.mrb[193].mxu1 }
 0xaf4   :  { %v7170_v56 = vpop.f32.mrb[194].mxu1 }
 0xaf5   :  { %v7181_v57 = vadd.f32 %v7179_v53, %v7117_v43  ;;  %v7180_v30 = vmul.f32 %v7658_v46, %v7170_v56  ;;  %v8074_v58 = vpop.f32.mrb[195].mxu1 }
 0xaf7   :  { %v7182_v45 = vadd.f32 %v7180_v30, %v7118_v48  ;;  %v7245_v59 = vadd.f32 %v7243_v55, %v7181_v57 }
 0xaf9   :  { %v7259_v62 = vadd.f32 %v7252_v61, %v7245_v59  ;;  %v7246_v63 = vadd.f32 %v7244_v60, %v7182_v45 }
 0xafb   :  { %7261 = vst [vmem:[%s9710_s19] sm:$0xff] %v7259_v62  ;;  %v7260_v1 = vadd.f32 %v7257_v0, %v7246_v63 }
 0xafd   :  { %7262 = vst [vmem:[%s9710_s19 + $0x8] sm:$0xff] %v7260_v1 }

</bundles_post_ra>
